<compile_context>
chip_gen: v7x
topology: tpu7x:2x2x1
jax: 0.10.0
libtpu: 0.0.40
codegen_flags: <defaults>
</compile_context>

<pallas_src>
import functools
import math

import jax
import jax.numpy as jnp
from jax.experimental import pallas as pl
from jax.experimental.pallas import tpu as pltpu

BN_EPS = 1e-5
BN_SCALE = 1.0 / math.sqrt(1.0 + BN_EPS)   # eval-mode BatchNorm2d, default stats


# ----------------------------------------------------------------------------
# Small helpers
# ----------------------------------------------------------------------------
def _const_spec(shape):
    """Full-array block that is identical for every grid step (stays resident)."""
    nd = len(shape)

    def imap(i):
        return (0,) * nd

    return pl.BlockSpec(shape, imap)


def _softmax(x, axis):
    m = jnp.max(x, axis=axis, keepdims=True)
    e = jnp.exp(x - m)
    return e / jnp.sum(e, axis=axis, keepdims=True)


def _mm(a, b):
    return jnp.dot(a, b, preferred_element_type=jnp.float32)


# ----------------------------------------------------------------------------
# Fused multi-layer FullyConnected (1x1 convs + folded eval-mode BN + act)
# ----------------------------------------------------------------------------
def _fc_kernel(*refs, acts):
    x_ref, o_ref = refs[0], refs[-1]
    wb = refs[1:-1]
    h = x_ref[...]
    for i, act in enumerate(acts):
        w = wb[2 * i][...]
        b = wb[2 * i + 1][...]
        if h.shape[-1] == 1:          # degenerate K=1 contraction -> broadcast multiply
            h = h * w + b
        else:
            h = _mm(h, w) + b
        if act == "relu":
            h = jnp.maximum(h, 0.0)
    o_ref[...] = h


def pallas_fc(x, layers, acts):
    """act_n(... act_1(x @ w1 + b1) ... @ wn + bn), fused into one kernel.  x: (M, Din)."""
    M = x.shape[0]
    d_out = layers[-1]["w"].shape[1]
    operands, specs = [x], [_const_spec(x.shape)]
    for lyr in layers:
        operands += [lyr["w"], lyr["b"]]
        specs += [_const_spec(lyr["w"].shape), _const_spec(lyr["b"].shape)]
    return pl.pallas_call(
        functools.partial(_fc_kernel, acts=tuple(acts)),
        out_shape=jax.ShapeDtypeStruct((M, d_out), jnp.float32),
        grid=(1,),
        in_specs=specs,
        out_specs=_const_spec((M, d_out)),
        compiler_params=pltpu.CompilerParams(dimension_semantics=("arbitrary",)),
    )(*operands)


def fc_apply(layers, x, acts):
    shp = x.shape
    y = pallas_fc(x.reshape(-1, shp[-1]), layers, acts)
    return y.reshape(shp[:-1] + (y.shape[-1],))


# ----------------------------------------------------------------------------
# Fused LinearSpatialAttention (EfficientSelfAttention + to_out + fc_out ReLU)
# ----------------------------------------------------------------------------
def _spatial_attn_kernel(x_ref, s_ref,
                         wqx_ref, wqs_ref, bq_ref,
                         wvx_ref, wvs_ref, bv_ref,
                         wo_ref, bo_ref, wf_ref, bf_ref,
                         o_ref, *, n_heads, scale):
    x = x_ref[0]                                      # (N, Dh)
    s = s_ref[0]                                      # (N, Dp)
    # projections of concat([x, ste], -1) via split weights (no in-kernel concat)
    q = _mm(x, wqx_ref[...]) + _mm(s, wqs_ref[...]) + bq_ref[...]       # (N, Dcat)
    v = _mm(x, wvx_ref[...]) + _mm(s, wvs_ref[...]) + bv_ref[...]       # (N, Dcat)
    d_cat = q.shape[-1]
    dh = d_cat // n_heads
    wo = wo_ref[...]
    att = jnp.zeros((x.shape[0], d_cat), jnp.float32)
    for h in range(n_heads):
        sl = slice(h * dh, (h + 1) * dh)
        qh, vh = q[:, sl], v[:, sl]
        # torch: q = softmax(q, -1) * scale^-0.25 ; k = softmax(q, -2) * scale^-0.25
        # (the separate key projection is computed but never used, as in torch)
        q1 = _softmax(qh, axis=-1) * scale
        k1 = _softmax(q1, axis=0) * scale
        ctx = jnp.einsum("nd,ne->de", k1, vh, preferred_element_type=jnp.float32)
        ah = _mm(q1, ctx)                             # (N, dh)
        if n_heads > 1:                               # to_out folded per head
            att = att + _mm(ah, wo[sl, :])
        else:                                         # to_out == Identity
            att = ah
    if n_heads > 1:
        att = att + bo_ref[...]                       # Dropout == identity (inference)
    y = _mm(att, wf_ref[...]) + bf_ref[...]           # fc_out (nn.Linear, no BN)
    o_ref[0] = jnp.maximum(y, 0.0)                    # relu(fc_out(.))


def pallas_spatial_attention(p, x, ste, n_heads):
    B, L, N, Dh = x.shape
    Dp = ste.shape[-1]
    d_cat = Dh + Dp
    dh = d_cat // n_heads
    scale = float((dh ** 0.5) ** (-0.25))
    x2 = x.reshape(B * L, N, Dh)
    s2 = ste.reshape(B * L, N, Dp)
    wq, bq = p["esa_q"]["w"], p["esa_q"]["b"]
    wv, bv = p["esa_v"]["w"], p["esa_v"]["b"]
    wo, bo = p["esa_o"]["w"], p["esa_o"]["b"]
    wf, bf = p["fc_out"]["w"], p["fc_out"]["b"]
    out = pl.pallas_call(
        functools.partial(_spatial_attn_kernel, n_heads=n_heads, scale=scale),
        out_shape=jax.ShapeDtypeStruct((B * L, N, Dh), jnp.float32),
        grid=(B * L,),
        in_specs=[
            pl.BlockSpec((1, N, Dh), lambda i: (i, 0, 0)),
            pl.BlockSpec((1, N, Dp), lambda i: (i, 0, 0)),
            _const_spec((Dh, d_cat)), _const_spec((Dp, d_cat)), _const_spec((1, d_cat)),
            _const_spec((Dh, d_cat)), _const_spec((Dp, d_cat)), _const_spec((1, d_cat)),
            _const_spec((d_cat, d_cat)), _const_spec((1, d_cat)),
            _const_spec((d_cat, Dh)), _const_spec((1, Dh)),
        ],
        out_specs=pl.BlockSpec((1, N, Dh), lambda i: (i, 0, 0)),
        compiler_params=pltpu.CompilerParams(dimension_semantics=("parallel",)),
    )(x2, s2, wq[:Dh], wq[Dh:], bq, wv[:Dh], wv[Dh:], bv, wo, bo, wf, bf)
    return out.reshape(B, L, N, Dh)


# ----------------------------------------------------------------------------
# Fused TemporalAttention (q/k/v FCs + per-head MHA over time + 2-layer fc_out)
# ----------------------------------------------------------------------------
def _temporal_attn_kernel(x_ref, s_ref,
                          wqx_ref, wqs_ref, bq_ref,
                          wkx_ref, wks_ref, bk_ref,
                          wvx_ref, wvs_ref, bv_ref,
                          w1_ref, b1_ref, w2_ref, b2_ref,
                          o_ref, *, n_heads):
    x = x_ref[0]                                      # (T, Dh)
    s = s_ref[0]                                      # (T, Dp)

    def proj(wx_ref, ws_ref, b_ref):                  # relu(FC(concat([x, ste])))
        return jnp.maximum(_mm(x, wx_ref[...]) + _mm(s, ws_ref[...]) + b_ref[...], 0.0)

    q = proj(wqx_ref, wqs_ref, bq_ref)                # (T, Dh)
    k = proj(wkx_ref, wks_ref, bk_ref)
    v = proj(wvx_ref, wvs_ref, bv_ref)
    dh = q.shape[-1] // n_heads
    scale = 1.0 / math.sqrt(dh)
    w1 = w1_ref[...]
    acc = jnp.zeros((x.shape[0], w1.shape[1]), jnp.float32)
    for h in range(n_heads):
        sl = slice(h * dh, (h + 1) * dh)
        qh, kh, vh = q[:, sl], k[:, sl], v[:, sl]
        sc = jnp.einsum("td,sd->ts", qh, kh, preferred_element_type=jnp.float32) * scale
        pr = _softmax(sc, axis=-1)
        acc = acc + _mm(_mm(pr, vh), w1[sl, :])       # head output folded into fc_out layer 1
    y = jnp.maximum(acc + b1_ref[...], 0.0)
    o_ref[0] = _mm(y, w2_ref[...]) + b2_ref[...]


def pallas_temporal_attention(p, x, ste, n_heads):
    B, T, N, Dh = x.shape
    Dp = ste.shape[-1]
    xt = jnp.transpose(x, (0, 2, 1, 3)).reshape(B * N, T, Dh)
    st = jnp.transpose(ste, (0, 2, 1, 3)).reshape(B * N, T, Dp)
    wq, bq = p["fc_q"]["w"], p["fc_q"]["b"]
    wk, bk = p["fc_k"]["w"], p["fc_k"]["b"]
    wv, bv = p["fc_v"]["w"], p["fc_v"]["b"]
    (w1, b1), (w2, b2) = [(l["w"], l["b"]) for l in p["fc_out"]]
    out = pl.pallas_call(
        functools.partial(_temporal_attn_kernel, n_heads=n_heads),
        out_shape=jax.ShapeDtypeStruct((B * N, T, Dh), jnp.float32),
        grid=(B * N,),
        in_specs=[
            pl.BlockSpec((1, T, Dh), lambda i: (i, 0, 0)),
            pl.BlockSpec((1, T, Dp), lambda i: (i, 0, 0)),
            _const_spec((Dh, Dh)), _const_spec((Dp, Dh)), _const_spec((1, Dh)),
            _const_spec((Dh, Dh)), _const_spec((Dp, Dh)), _const_spec((1, Dh)),
            _const_spec((Dh, Dh)), _const_spec((Dp, Dh)), _const_spec((1, Dh)),
            _const_spec(w1.shape), _const_spec(b1.shape),
            _const_spec(w2.shape), _const_spec(b2.shape),
        ],
        out_specs=pl.BlockSpec((1, T, Dh), lambda i: (i, 0, 0)),
        compiler_params=pltpu.CompilerParams(dimension_semantics=("parallel",)),
    )(xt, st, wq[:Dh], wq[Dh:], bq, wk[:Dh], wk[Dh:], bk, wv[:Dh], wv[Dh:], bv,
      w1, b1, w2, b2)
    return jnp.transpose(out.reshape(B, N, T, Dh), (0, 2, 1, 3))


# ----------------------------------------------------------------------------
# Fused TransformAttention (q/k/v FCs + per-head MHA previous->future + fc_out)
# ----------------------------------------------------------------------------
def _transform_attn_kernel(x_ref, sp_ref, sf_ref,
                           wq_ref, bq_ref, wk_ref, bk_ref, wv_ref, bv_ref,
                           w1_ref, b1_ref, w2_ref, b2_ref,
                           o_ref, *, n_heads):
    x = x_ref[0]                                      # (Tp, Dh)
    sp = sp_ref[0]                                    # (Tp, Dp)
    sf = sf_ref[0]                                    # (Tf, Dp)
    q = jnp.maximum(_mm(sf, wq_ref[...]) + bq_ref[...], 0.0)            # (Tf, Dh)
    k = jnp.maximum(_mm(sp, wk_ref[...]) + bk_ref[...], 0.0)            # (Tp, Dh)
    v = jnp.maximum(_mm(x, wv_ref[...]) + bv_ref[...], 0.0)             # (Tp, Dh)
    dh = q.shape[-1] // n_heads
    scale = 1.0 / math.sqrt(dh)
    w1 = w1_ref[...]
    acc = jnp.zeros((q.shape[0], w1.shape[1]), jnp.float32)
    for h in range(n_heads):
        sl = slice(h * dh, (h + 1) * dh)
        qh, kh, vh = q[:, sl], k[:, sl], v[:, sl]
        sc = jnp.einsum("td,sd->ts", qh, kh, preferred_element_type=jnp.float32) * scale
        pr = _softmax(sc, axis=-1)
        acc = acc + _mm(_mm(pr, vh), w1[sl, :])
    y = jnp.maximum(acc + b1_ref[...], 0.0)
    o_ref[0] = _mm(y, w2_ref[...]) + b2_ref[...]


def pallas_transform_attention(p, x, ste_prev, ste_fut, n_heads):
    B, Tp, N, Dh = x.shape
    Tf = ste_fut.shape[1]
    Dp = ste_prev.shape[-1]
    xt = jnp.transpose(x, (0, 2, 1, 3)).reshape(B * N, Tp, Dh)
    spt = jnp.transpose(ste_prev, (0, 2, 1, 3)).reshape(B * N, Tp, Dp)
    sft = jnp.transpose(ste_fut, (0, 2, 1, 3)).reshape(B * N, Tf, Dp)
    wq, bq = p["fc_q"]["w"], p["fc_q"]["b"]
    wk, bk = p["fc_k"]["w"], p["fc_k"]["b"]
    wv, bv = p["fc_v"]["w"], p["fc_v"]["b"]
    (w1, b1), (w2, b2) = [(l["w"], l["b"]) for l in p["fc_out"]]
    out = pl.pallas_call(
        functools.partial(_transform_attn_kernel, n_heads=n_heads),
        out_shape=jax.ShapeDtypeStruct((B * N, Tf, Dh), jnp.float32),
        grid=(B * N,),
        in_specs=[
            pl.BlockSpec((1, Tp, Dh), lambda i: (i, 0, 0)),
            pl.BlockSpec((1, Tp, Dp), lambda i: (i, 0, 0)),
            pl.BlockSpec((1, Tf, Dp), lambda i: (i, 0, 0)),
            _const_spec(wq.shape), _const_spec(bq.shape),
            _const_spec(wk.shape), _const_spec(bk.shape),
            _const_spec(wv.shape), _const_spec(bv.shape),
            _const_spec(w1.shape), _const_spec(b1.shape),
            _const_spec(w2.shape), _const_spec(b2.shape),
        ],
        out_specs=pl.BlockSpec((1, Tf, Dh), lambda i: (i, 0, 0)),
        compiler_params=pltpu.CompilerParams(dimension_semantics=("parallel",)),
    )(xt, spt, sft, wq, bq, wk, bk, wv, bv, w1, b1, w2, b2)
    return jnp.transpose(out.reshape(B, N, Tf, Dh), (0, 2, 1, 3))


# ----------------------------------------------------------------------------
# Fused GatedFusion (+ 2-layer fc_h + ST-block residual)
# ----------------------------------------------------------------------------
def _fusion_kernel(hs_ref, ht_ref, xres_ref,
                   wxs_ref, wxt_ref, bxt_ref,
                   wh1_ref, bh1_ref, wh2_ref, bh2_ref, o_ref):
    hs = hs_ref[...]
    ht = ht_ref[...]
    xs = _mm(hs, wxs_ref[...])                         # FC, use_bias=False
    xt = _mm(ht, wxt_ref[...]) + bxt_ref[...]
    z = jax.nn.sigmoid(xs + xt)
    h = z * hs + (1.0 - z) * ht
    h = jnp.maximum(_mm(h, wh1_ref[...]) + bh1_ref[...], 0.0)
    h = _mm(h, wh2_ref[...]) + bh2_ref[...]
    o_ref[...] = xres_ref[...] + h                     # residual of the ST block


def pallas_gated_fusion(p, x, hs, ht):
    shp = hs.shape
    D = shp[-1]
    hs2, ht2, x2 = hs.reshape(-1, D), ht.reshape(-1, D), x.reshape(-1, D)
    M = hs2.shape[0]
    wxs = p["fc_xs"]["w"]
    wxt, bxt = p["fc_xt"]["w"], p["fc_xt"]["b"]
    (wh1, bh1), (wh2, bh2) = [(l["w"], l["b"]) for l in p["fc_h"]]
    out = pl.pallas_call(
        _fusion_kernel,
        out_shape=jax.ShapeDtypeStruct((M, D), jnp.float32),
        grid=(1,),
        in_specs=[_const_spec((M, D)), _const_spec((M, D)), _const_spec((M, D)),
                  _const_spec(wxs.shape),
                  _const_spec(wxt.shape), _const_spec(bxt.shape),
                  _const_spec(wh1.shape), _const_spec(bh1.shape),
                  _const_spec(wh2.shape), _const_spec(bh2.shape)],
        out_specs=_const_spec((M, D)),
        compiler_params=pltpu.CompilerParams(dimension_semantics=("arbitrary",)),
    )(hs2, ht2, x2, wxs, wxt, bxt, wh1, bh1, wh2, bh2)
    return out.reshape(shp)


# ----------------------------------------------------------------------------
# Fused SpatioTemporalEmbedding (both 2-layer FCs in one kernel)
# ----------------------------------------------------------------------------
def _st_emb_kernel(se_ref, te_ref,
                   ws1_ref, bs1_ref, ws2_ref, bs2_ref,
                   wt1_ref, bt1_ref, wt2_ref, bt2_ref,
                   se_o_ref, te_o_ref):
    se = jnp.maximum(_mm(se_ref[...], ws1_ref[...]) + bs1_ref[...], 0.0)
    se_o_ref[...] = _mm(se, ws2_ref[...]) + bs2_ref[...]          # (N, Dp)
    te = jnp.maximum(_mm(te_ref[...], wt1_ref[...]) + bt1_ref[...], 0.0)
    te_o_ref[...] = _mm(te, wt2_ref[...]) + bt2_ref[...]          # (B*T, Dp)


def pallas_st_embedding(p, se, temporal_features):
    # TODO(synk): temporal features are assumed already (one-hot) encoded upstream.
    B, Ttot, dt = temporal_features.shape
    N, dse = se.shape
    Dp = p["fc_se"][1]["w"].shape[1]
    te2 = temporal_features.reshape(B * Ttot, dt)
    (ws1, bs1), (ws2, bs2) = [(l["w"], l["b"]) for l in p["fc_se"]]
    (wt1, bt1), (wt2, bt2) = [(l["w"], l["b"]) for l in p["fc_te"]]
    se_h, te_h = pl.pallas_call(
        _st_emb_kernel,
        out_shape=(jax.ShapeDtypeStruct((N, Dp), jnp.float32),
                   jax.ShapeDtypeStruct((B * Ttot, Dp), jnp.float32)),
        grid=(1,),
        in_specs=[
            _const_spec((N, dse)), _const_spec((B * Ttot, dt)),
            _const_spec(ws1.shape), _const_spec(bs1.shape),
            _const_spec(ws2.shape), _const_spec(bs2.shape),
            _const_spec(wt1.shape), _const_spec(bt1.shape),
            _const_spec(wt2.shape), _const_spec(bt2.shape),
        ],
        out_specs=(_const_spec((N, Dp)), _const_spec((B * Ttot, Dp))),
        compiler_params=pltpu.CompilerParams(dimension_semantics=("arbitrary",)),
    )(se, te2, ws1, bs1, ws2, bs2, wt1, bt1, wt2, bt2)
    # broadcast-add (SE over batch/time, TE over nodes) is a trivial XLA op
    return te_h.reshape(B, Ttot, 1, Dp) + se_h.reshape(1, 1, N, Dp)


# ----------------------------------------------------------------------------
# Parameter construction (deterministic, in-script; arrays only -> jit-safe)
# ----------------------------------------------------------------------------
class KeyGen:
    def __init__(self, seed=0):
        self._key = jax.random.PRNGKey(seed)

    def __call__(self):
        self._key, k = jax.random.split(self._key)
        return k


def _dense(kg, din, dout, bn=False, bias=True):
    w = jax.random.normal(kg(), (din, dout), jnp.float32) / math.sqrt(din)
    b = (0.02 * jax.random.normal(kg(), (dout,), jnp.float32)) if bias \
        else jnp.zeros((dout,), jnp.float32)
    if bn:   # fold eval-mode BatchNorm2d (running mean 0, var 1) into the affine map
        w = w * BN_SCALE
        b = b * BN_SCALE
    return {"w": w, "b": b.reshape(1, dout)}


def init_params(kg, cfg):
    dh, dp = cfg["d_hidden"], cfg["d_hidden_pos"]
    dse, dt = cfg["d_se"], cfg["d_time"]
    dcat = dh + dp

    def block_params():
        return {
            "spatial": {
                "esa_q": _dense(kg, dcat, dcat),
                "esa_k": _dense(kg, dcat, dcat),   # declared in __init__, unused in forward
                "esa_v": _dense(kg, dcat, dcat),
                "esa_o": _dense(kg, dcat, dcat),
                "fc_out": _dense(kg, dcat, dh),
            },
            "temporal": {
                "fc_q": _dense(kg, dcat, dh, bn=True),
                "fc_k": _dense(kg, dcat, dh, bn=True),
                "fc_v": _dense(kg, dcat, dh, bn=True),
                "fc_out": [_dense(kg, dh, dh, bn=True), _dense(kg, dh, dh, bn=True)],
            },
            "fusion": {
                "fc_xs": _dense(kg, dh, dh, bn=True, bias=False),
                "fc_xt": _dense(kg, dh, dh, bn=True),
                "fc_h": [_dense(kg, dh, dh, bn=True), _dense(kg, dh, dh, bn=True)],
            },
        }

    return {
        "pos_emb": jax.random.normal(kg(), (cfg["n_nodes"], dse), jnp.float32),
        "fc_in": [_dense(kg, 1, dh, bn=True), _dense(kg, dh, dh, bn=True)],
        "st_emb": {
            "fc_se": [_dense(kg, dse, dp, bn=True), _dense(kg, dp, dp, bn=True)],
            "fc_te": [_dense(kg, dt, dp, bn=True), _dense(kg, dp, dp, bn=True)],
        },
        "encoder": [block_params() for _ in range(cfg["n_blocks"])],
        "transform": {
            "fc_q": _dense(kg, dp, dh, bn=True),
            "fc_k": _dense(kg, dp, dh, bn=True),
            "fc_v": _dense(kg, dh, dh, bn=True),
            "fc_out": [_dense(kg, dh, dh, bn=True), _dense(kg, dh, dh, bn=True)],
        },
        "decoder": [block_params() for _ in range(cfg["n_blocks"])],
        "fc_out": [_dense(kg, dh, dh, bn=True), _dense(kg, dh, 1, bn=True)],
    }


# ----------------------------------------------------------------------------
# Functional forward pass
# ----------------------------------------------------------------------------
def st_block(p, x, ste, n_heads):
    hs = pallas_spatial_attention(p["spatial"], x, ste, n_heads)
    ht = pallas_temporal_attention(p["temporal"], x, ste, n_heads)
    return pallas_gated_fusion(p["fusion"], x, hs, ht)     # includes x + h residual


def gman_forward(params, x_signal, x_temporal, y_temporal, n_heads=4):
    x = fc_apply(params["fc_in"], x_signal, ("relu", None))            # (B, Tp, N, Dh)
    temporal_features = jnp.concatenate([x_temporal, y_temporal], axis=1)
    first_future = temporal_features.shape[1] // 2
    ste = pallas_st_embedding(params["st_emb"], params["pos_emb"], temporal_features)
    ste_prev, ste_fut = ste[:, :first_future], ste[:, first_future:]
    for blk in params["encoder"]:
        x = st_block(blk, x, ste_prev, n_heads)
    x = pallas_transform_attention(params["transform"], x, ste_prev, ste_fut, n_heads)
    for blk in params["decoder"]:
        x = st_block(blk, x, ste_fut, n_heads)
    x = fc_apply(params["fc_out"], x, ("relu", None))                  # (B, Tf, N, 1)
    return jnp.squeeze(x, axis=3)                                      # (B, Tf, N)


# ----------------------------------------------------------------------------
if __name__ == "__main__":
    cfg = dict(d_hidden=32, d_hidden_pos=16, n_heads=4, n_blocks=1,
               n_nodes=8, n_previous=4, n_future=4, d_se=16, d_time=12)
    B = 2

    params = init_params(KeyGen(0), cfg)

    k1, k2, k3 = jax.random.split(jax.random.PRNGKey(0), 3)
    x_signal = jax.random.normal(k1, (B, cfg["n_previous"], cfg["n_nodes"], 1), jnp.float32)
    x_temporal = jax.random.normal(k2, (B, cfg["n_previous"], cfg["d_time"]), jnp.float32)
    y_temporal = jax.random.normal(k3, (B, cfg["n_future"], cfg["d_time"]), jnp.float32)

    fwd = jax.jit(functools.partial(gman_forward, n_heads=cfg["n_heads"]))
    out = fwd(params, x_signal, x_temporal, y_temporal)
    jax.block_until_ready(out)
    assert out.shape == (B, cfg["n_future"], cfg["n_nodes"]), out.shape
    assert bool(jnp.all(jnp.isfinite(out)))
    print("KERNEL_OK")
</pallas_src>

<mosaic_0001>
module attributes {stable_mosaic.version = 11 : i64} {
  func.func @_st_emb_kernel(%arg0: i32, %arg1: memref<8x16xf32, #tpu.memory_space<vmem>>, %arg2: memref<16x12xf32, #tpu.memory_space<vmem>>, %arg3: memref<16x16xf32, #tpu.memory_space<vmem>>, %arg4: memref<1x16xf32, #tpu.memory_space<vmem>>, %arg5: memref<16x16xf32, #tpu.memory_space<vmem>>, %arg6: memref<1x16xf32, #tpu.memory_space<vmem>>, %arg7: memref<12x16xf32, #tpu.memory_space<vmem>>, %arg8: memref<1x16xf32, #tpu.memory_space<vmem>>, %arg9: memref<16x16xf32, #tpu.memory_space<vmem>>, %arg10: memref<1x16xf32, #tpu.memory_space<vmem>>, %arg11: memref<8x16xf32, #tpu.memory_space<vmem>>, %arg12: memref<16x16xf32, #tpu.memory_space<vmem>>) attributes {dimension_semantics = [#tpu.dimension_semantics<arbitrary>], iteration_bounds = array<i64: 1>, scalar_prefetch = 0 : i64, scratch_operands = 0 : i64, tpu.core_type = #tpu.core_type<tc>, window_params = [{pipeline_mode = #tpu.pipeline_mode<synchronous>, transform_indices = @transform_0, window_bounds = array<i64: 8, 16>}, {pipeline_mode = #tpu.pipeline_mode<synchronous>, transform_indices = @transform_1, window_bounds = array<i64: 16, 12>}, {pipeline_mode = #tpu.pipeline_mode<synchronous>, transform_indices = @transform_2, window_bounds = array<i64: 16, 16>}, {pipeline_mode = #tpu.pipeline_mode<synchronous>, transform_indices = @transform_3, window_bounds = array<i64: 1, 16>}, {pipeline_mode = #tpu.pipeline_mode<synchronous>, transform_indices = @transform_4, window_bounds = array<i64: 16, 16>}, {pipeline_mode = #tpu.pipeline_mode<synchronous>, transform_indices = @transform_5, window_bounds = array<i64: 1, 16>}, {pipeline_mode = #tpu.pipeline_mode<synchronous>, transform_indices = @transform_6, window_bounds = array<i64: 12, 16>}, {pipeline_mode = #tpu.pipeline_mode<synchronous>, transform_indices = @transform_7, window_bounds = array<i64: 1, 16>}, {pipeline_mode = #tpu.pipeline_mode<synchronous>, transform_indices = @transform_8, window_bounds = array<i64: 16, 16>}, {pipeline_mode = #tpu.pipeline_mode<synchronous>, transform_indices = @transform_9, window_bounds = array<i64: 1, 16>}, {pipeline_mode = #tpu.pipeline_mode<synchronous>, transform_indices = @transform_10, window_bounds = array<i64: 8, 16>}, {pipeline_mode = #tpu.pipeline_mode<synchronous>, transform_indices = @transform_11, window_bounds = array<i64: 16, 16>}]} {
    %c0 = arith.constant 0 : index
    %c0_0 = arith.constant 0 : index
    %0 = vector.load %arg1[%c0, %c0_0] : memref<8x16xf32, #tpu.memory_space<vmem>>, vector<8x16xf32>
    %c0_1 = arith.constant 0 : index
    %c0_2 = arith.constant 0 : index
    %1 = vector.load %arg3[%c0_1, %c0_2] : memref<16x16xf32, #tpu.memory_space<vmem>>, vector<16x16xf32>
    %cst = arith.constant dense<0.000000e+00> : vector<8x16xf32>
    %2 = tpu.matmul %0, %1, %cst {dimension_numbers = #tpu.dot_dimension_numbers<[1], [0], [0], [1], [0, 0, 1, 1], [], []>} : vector<8x16xf32>, vector<16x16xf32>, vector<8x16xf32> -> vector<8x16xf32>
    %c0_3 = arith.constant 0 : index
    %c0_4 = arith.constant 0 : index
    %3 = vector.load %arg4[%c0_3, %c0_4] : memref<1x16xf32, #tpu.memory_space<vmem>>, vector<1x16xf32>
    %4 = vector.broadcast %3 : vector<1x16xf32> to vector<8x16xf32>
    %5 = arith.addf %2, %4 : vector<8x16xf32>
    %cst_5 = arith.constant 0.000000e+00 : f32
    %6 = vector.broadcast %cst_5 : f32 to vector<8x16xf32>
    %7 = arith.maximumf %5, %6 : vector<8x16xf32>
    %c0_6 = arith.constant 0 : index
    %c0_7 = arith.constant 0 : index
    %8 = vector.load %arg5[%c0_6, %c0_7] : memref<16x16xf32, #tpu.memory_space<vmem>>, vector<16x16xf32>
    %cst_8 = arith.constant dense<0.000000e+00> : vector<8x16xf32>
    %9 = tpu.matmul %7, %8, %cst_8 {dimension_numbers = #tpu.dot_dimension_numbers<[1], [0], [0], [1], [0, 0, 1, 1], [], []>} : vector<8x16xf32>, vector<16x16xf32>, vector<8x16xf32> -> vector<8x16xf32>
    %c0_9 = arith.constant 0 : index
    %c0_10 = arith.constant 0 : index
    %10 = vector.load %arg6[%c0_9, %c0_10] : memref<1x16xf32, #tpu.memory_space<vmem>>, vector<1x16xf32>
    %11 = vector.broadcast %10 : vector<1x16xf32> to vector<8x16xf32>
    %12 = arith.addf %9, %11 : vector<8x16xf32>
    %c0_11 = arith.constant 0 : index
    %c0_12 = arith.constant 0 : index
    %13 = vector.load %arg11[%c0_11, %c0_12] : memref<8x16xf32, #tpu.memory_space<vmem>>, vector<8x16xf32>
    tpu.vector_store %arg11[%c0_11, %c0_12], %12 {strides = array<i32>} : memref<8x16xf32, #tpu.memory_space<vmem>>, vector<8x16xf32>,
    %c0_13 = arith.constant 0 : index
    %c0_14 = arith.constant 0 : index
    %14 = vector.load %arg2[%c0_13, %c0_14] : memref<16x12xf32, #tpu.memory_space<vmem>>, vector<16x12xf32>
    %c0_15 = arith.constant 0 : index
    %c0_16 = arith.constant 0 : index
    %15 = vector.load %arg7[%c0_15, %c0_16] : memref<12x16xf32, #tpu.memory_space<vmem>>, vector<12x16xf32>
    %cst_17 = arith.constant dense<0.000000e+00> : vector<16x16xf32>
    %16 = tpu.matmul %14, %15, %cst_17 {dimension_numbers = #tpu.dot_dimension_numbers<[1], [0], [0], [1], [0, 0, 1, 1], [], []>} : vector<16x12xf32>, vector<12x16xf32>, vector<16x16xf32> -> vector<16x16xf32>
    %c0_18 = arith.constant 0 : index
    %c0_19 = arith.constant 0 : index
    %17 = vector.load %arg8[%c0_18, %c0_19] : memref<1x16xf32, #tpu.memory_space<vmem>>, vector<1x16xf32>
    %18 = vector.broadcast %17 : vector<1x16xf32> to vector<16x16xf32>
    %19 = arith.addf %16, %18 : vector<16x16xf32>
    %cst_20 = arith.constant 0.000000e+00 : f32
    %20 = vector.broadcast %cst_20 : f32 to vector<16x16xf32>
    %21 = arith.maximumf %19, %20 : vector<16x16xf32>
    %c0_21 = arith.constant 0 : index
    %c0_22 = arith.constant 0 : index
    %22 = vector.load %arg9[%c0_21, %c0_22] : memref<16x16xf32, #tpu.memory_space<vmem>>, vector<16x16xf32>
    %cst_23 = arith.constant dense<0.000000e+00> : vector<16x16xf32>
    %23 = tpu.matmul %21, %22, %cst_23 {dimension_numbers = #tpu.dot_dimension_numbers<[1], [0], [0], [1], [0, 0, 1, 1], [], []>} : vector<16x16xf32>, vector<16x16xf32>, vector<16x16xf32> -> vector<16x16xf32>
    %c0_24 = arith.constant 0 : index
    %c0_25 = arith.constant 0 : index
    %24 = vector.load %arg10[%c0_24, %c0_25] : memref<1x16xf32, #tpu.memory_space<vmem>>, vector<1x16xf32>
    %25 = vector.broadcast %24 : vector<1x16xf32> to vector<16x16xf32>
    %26 = arith.addf %23, %25 : vector<16x16xf32>
    %c0_26 = arith.constant 0 : index
    %c0_27 = arith.constant 0 : index
    %27 = vector.load %arg12[%c0_26, %c0_27] : memref<16x16xf32, #tpu.memory_space<vmem>>, vector<16x16xf32>
    tpu.vector_store %arg12[%c0_26, %c0_27], %26 {strides = array<i32>} : memref<16x16xf32, #tpu.memory_space<vmem>>, vector<16x16xf32>,
    return
  }
  func.func @transform_0(%arg0: i32) -> (i32, i32) {
    %c0_i32 = arith.constant 0 : i32
    %c0_i32_0 = arith.constant 0 : i32
    %c0_i32_1 = arith.constant 0 : i32
    return %c0_i32, %c0_i32_0 : i32, i32
  }
  func.func @transform_1(%arg0: i32) -> (i32, i32) {
    %c0_i32 = arith.constant 0 : i32
    %c0_i32_0 = arith.constant 0 : i32
    %c0_i32_1 = arith.constant 0 : i32
    return %c0_i32, %c0_i32_0 : i32, i32
  }
  func.func @transform_2(%arg0: i32) -> (i32, i32) {
    %c0_i32 = arith.constant 0 : i32
    %c0_i32_0 = arith.constant 0 : i32
    %c0_i32_1 = arith.constant 0 : i32
    return %c0_i32, %c0_i32_0 : i32, i32
  }
  func.func @transform_3(%arg0: i32) -> (i32, i32) {
    %c0_i32 = arith.constant 0 : i32
    %c0_i32_0 = arith.constant 0 : i32
    %c0_i32_1 = arith.constant 0 : i32
    return %c0_i32, %c0_i32_0 : i32, i32
  }
  func.func @transform_4(%arg0: i32) -> (i32, i32) {
    %c0_i32 = arith.constant 0 : i32
    %c0_i32_0 = arith.constant 0 : i32
    %c0_i32_1 = arith.constant 0 : i32
    return %c0_i32, %c0_i32_0 : i32, i32
  }
  func.func @transform_5(%arg0: i32) -> (i32, i32) {
    %c0_i32 = arith.constant 0 : i32
    %c0_i32_0 = arith.constant 0 : i32
    %c0_i32_1 = arith.constant 0 : i32
    return %c0_i32, %c0_i32_0 : i32, i32
  }
  func.func @transform_6(%arg0: i32) -> (i32, i32) {
    %c0_i32 = arith.constant 0 : i32
    %c0_i32_0 = arith.constant 0 : i32
    %c0_i32_1 = arith.constant 0 : i32
    return %c0_i32, %c0_i32_0 : i32, i32
  }
  func.func @transform_7(%arg0: i32) -> (i32, i32) {
    %c0_i32 = arith.constant 0 : i32
    %c0_i32_0 = arith.constant 0 : i32
    %c0_i32_1 = arith.constant 0 : i32
    return %c0_i32, %c0_i32_0 : i32, i32
  }
  func.func @transform_8(%arg0: i32) -> (i32, i32) {
    %c0_i32 = arith.constant 0 : i32
    %c0_i32_0 = arith.constant 0 : i32
    %c0_i32_1 = arith.constant 0 : i32
    return %c0_i32, %c0_i32_0 : i32, i32
  }
  func.func @transform_9(%arg0: i32) -> (i32, i32) {
    %c0_i32 = arith.constant 0 : i32
    %c0_i32_0 = arith.constant 0 : i32
    %c0_i32_1 = arith.constant 0 : i32
    return %c0_i32, %c0_i32_0 : i32, i32
  }
  func.func @transform_10(%arg0: i32) -> (i32, i32) {
    %c0_i32 = arith.constant 0 : i32
    %c0_i32_0 = arith.constant 0 : i32
    %c0_i32_1 = arith.constant 0 : i32
    return %c0_i32, %c0_i32_0 : i32, i32
  }
  func.func @transform_11(%arg0: i32) -> (i32, i32) {
    %c0_i32 = arith.constant 0 : i32
    %c0_i32_0 = arith.constant 0 : i32
    %c0_i32_1 = arith.constant 0 : i32
    return %c0_i32, %c0_i32_0 : i32, i32
  }
}

module attributes {stable_mosaic.version = 11 : i64} {
  func.func @_fc_kernel(%arg0: i32, %arg1: memref<64x1xf32, #tpu.memory_space<vmem>>, %arg2: memref<1x32xf32, #tpu.memory_space<vmem>>, %arg3: memref<1x32xf32, #tpu.memory_space<vmem>>, %arg4: memref<32x32xf32, #tpu.memory_space<vmem>>, %arg5: memref<1x32xf32, #tpu.memory_space<vmem>>, %arg6: memref<64x32xf32, #tpu.memory_space<vmem>>) attributes {dimension_semantics = [#tpu.dimension_semantics<arbitrary>], iteration_bounds = array<i64: 1>, scalar_prefetch = 0 : i64, scratch_operands = 0 : i64, tpu.core_type = #tpu.core_type<tc>, window_params = [{pipeline_mode = #tpu.pipeline_mode<synchronous>, transform_indices = @transform_0, window_bounds = array<i64: 64, 1>}, {pipeline_mode = #tpu.pipeline_mode<synchronous>, transform_indices = @transform_1, window_bounds = array<i64: 1, 32>}, {pipeline_mode = #tpu.pipeline_mode<synchronous>, transform_indices = @transform_2, window_bounds = array<i64: 1, 32>}, {pipeline_mode = #tpu.pipeline_mode<synchronous>, transform_indices = @transform_3, window_bounds = array<i64: 32, 32>}, {pipeline_mode = #tpu.pipeline_mode<synchronous>, transform_indices = @transform_4, window_bounds = array<i64: 1, 32>}, {pipeline_mode = #tpu.pipeline_mode<synchronous>, transform_indices = @transform_5, window_bounds = array<i64: 64, 32>}]} {
    %c0 = arith.constant 0 : index
    %c0_0 = arith.constant 0 : index
    %0 = vector.load %arg1[%c0, %c0_0] : memref<64x1xf32, #tpu.memory_space<vmem>>, vector<64x1xf32>
    %c0_1 = arith.constant 0 : index
    %c0_2 = arith.constant 0 : index
    %1 = vector.load %arg2[%c0_1, %c0_2] : memref<1x32xf32, #tpu.memory_space<vmem>>, vector<1x32xf32>
    %c0_3 = arith.constant 0 : index
    %c0_4 = arith.constant 0 : index
    %2 = vector.load %arg3[%c0_3, %c0_4] : memref<1x32xf32, #tpu.memory_space<vmem>>, vector<1x32xf32>
    %3 = vector.broadcast %0 : vector<64x1xf32> to vector<64x32xf32>
    %4 = vector.broadcast %1 : vector<1x32xf32> to vector<64x32xf32>
    %5 = arith.mulf %3, %4 : vector<64x32xf32>
    %6 = vector.broadcast %2 : vector<1x32xf32> to vector<64x32xf32>
    %7 = arith.addf %5, %6 : vector<64x32xf32>
    %cst = arith.constant 0.000000e+00 : f32
    %8 = vector.broadcast %cst : f32 to vector<64x32xf32>
    %9 = arith.maximumf %7, %8 : vector<64x32xf32>
    %c0_5 = arith.constant 0 : index
    %c0_6 = arith.constant 0 : index
    %10 = vector.load %arg4[%c0_5, %c0_6] : memref<32x32xf32, #tpu.memory_space<vmem>>, vector<32x32xf32>
    %c0_7 = arith.constant 0 : index
    %c0_8 = arith.constant 0 : index
    %11 = vector.load %arg5[%c0_7, %c0_8] : memref<1x32xf32, #tpu.memory_space<vmem>>, vector<1x32xf32>
    %cst_9 = arith.constant dense<0.000000e+00> : vector<64x32xf32>
    %12 = tpu.matmul %9, %10, %cst_9 {dimension_numbers = #tpu.dot_dimension_numbers<[1], [0], [0], [1], [0, 0, 1, 1], [], []>} : vector<64x32xf32>, vector<32x32xf32>, vector<64x32xf32> -> vector<64x32xf32>
    %13 = vector.broadcast %11 : vector<1x32xf32> to vector<64x32xf32>
    %14 = arith.addf %12, %13 : vector<64x32xf32>
    %c0_10 = arith.constant 0 : index
    %c0_11 = arith.constant 0 : index
    %15 = vector.load %arg6[%c0_10, %c0_11] : memref<64x32xf32, #tpu.memory_space<vmem>>, vector<64x32xf32>
    tpu.vector_store %arg6[%c0_10, %c0_11], %14 {strides = array<i32>} : memref<64x32xf32, #tpu.memory_space<vmem>>, vector<64x32xf32>,
    return
  }
  func.func @transform_0(%arg0: i32) -> (i32, i32) {
    %c0_i32 = arith.constant 0 : i32
    %c0_i32_0 = arith.constant 0 : i32
    %c0_i32_1 = arith.constant 0 : i32
    return %c0_i32, %c0_i32_0 : i32, i32
  }
  func.func @transform_1(%arg0: i32) -> (i32, i32) {
    %c0_i32 = arith.constant 0 : i32
    %c0_i32_0 = arith.constant 0 : i32
    %c0_i32_1 = arith.constant 0 : i32
    return %c0_i32, %c0_i32_0 : i32, i32
  }
  func.func @transform_2(%arg0: i32) -> (i32, i32) {
    %c0_i32 = arith.constant 0 : i32
    %c0_i32_0 = arith.constant 0 : i32
    %c0_i32_1 = arith.constant 0 : i32
    return %c0_i32, %c0_i32_0 : i32, i32
  }
  func.func @transform_3(%arg0: i32) -> (i32, i32) {
    %c0_i32 = arith.constant 0 : i32
    %c0_i32_0 = arith.constant 0 : i32
    %c0_i32_1 = arith.constant 0 : i32
    return %c0_i32, %c0_i32_0 : i32, i32
  }
  func.func @transform_4(%arg0: i32) -> (i32, i32) {
    %c0_i32 = arith.constant 0 : i32
    %c0_i32_0 = arith.constant 0 : i32
    %c0_i32_1 = arith.constant 0 : i32
    return %c0_i32, %c0_i32_0 : i32, i32
  }
  func.func @transform_5(%arg0: i32) -> (i32, i32) {
    %c0_i32 = arith.constant 0 : i32
    %c0_i32_0 = arith.constant 0 : i32
    %c0_i32_1 = arith.constant 0 : i32
    return %c0_i32, %c0_i32_0 : i32, i32
  }
}

module attributes {stable_mosaic.version = 11 : i64} {
  func.func @_temporal_attn_kernel(%arg0: i32, %arg1: memref<1x4x32xf32, #tpu.memory_space<vmem>>, %arg2: memref<1x4x16xf32, #tpu.memory_space<vmem>>, %arg3: memref<32x32xf32, #tpu.memory_space<vmem>>, %arg4: memref<16x32xf32, #tpu.memory_space<vmem>>, %arg5: memref<1x32xf32, #tpu.memory_space<vmem>>, %arg6: memref<32x32xf32, #tpu.memory_space<vmem>>, %arg7: memref<16x32xf32, #tpu.memory_space<vmem>>, %arg8: memref<1x32xf32, #tpu.memory_space<vmem>>, %arg9: memref<32x32xf32, #tpu.memory_space<vmem>>, %arg10: memref<16x32xf32, #tpu.memory_space<vmem>>, %arg11: memref<1x32xf32, #tpu.memory_space<vmem>>, %arg12: memref<32x32xf32, #tpu.memory_space<vmem>>, %arg13: memref<1x32xf32, #tpu.memory_space<vmem>>, %arg14: memref<32x32xf32, #tpu.memory_space<vmem>>, %arg15: memref<1x32xf32, #tpu.memory_space<vmem>>, %arg16: memref<1x4x32xf32, #tpu.memory_space<vmem>>) attributes {dimension_semantics = [#tpu.dimension_semantics<parallel>], iteration_bounds = array<i64: 16>, scalar_prefetch = 0 : i64, scratch_operands = 0 : i64, tpu.core_type = #tpu.core_type<tc>, window_params = [{transform_indices = @transform_0, window_bounds = array<i64: 1, 4, 32>}, {transform_indices = @transform_1, window_bounds = array<i64: 1, 4, 16>}, {pipeline_mode = #tpu.pipeline_mode<synchronous>, transform_indices = @transform_2, window_bounds = array<i64: 32, 32>}, {pipeline_mode = #tpu.pipeline_mode<synchronous>, transform_indices = @transform_3, window_bounds = array<i64: 16, 32>}, {pipeline_mode = #tpu.pipeline_mode<synchronous>, transform_indices = @transform_4, window_bounds = array<i64: 1, 32>}, {pipeline_mode = #tpu.pipeline_mode<synchronous>, transform_indices = @transform_5, window_bounds = array<i64: 32, 32>}, {pipeline_mode = #tpu.pipeline_mode<synchronous>, transform_indices = @transform_6, window_bounds = array<i64: 16, 32>}, {pipeline_mode = #tpu.pipeline_mode<synchronous>, transform_indices = @transform_7, window_bounds = array<i64: 1, 32>}, {pipeline_mode = #tpu.pipeline_mode<synchronous>, transform_indices = @transform_8, window_bounds = array<i64: 32, 32>}, {pipeline_mode = #tpu.pipeline_mode<synchronous>, transform_indices = @transform_9, window_bounds = array<i64: 16, 32>}, {pipeline_mode = #tpu.pipeline_mode<synchronous>, transform_indices = @transform_10, window_bounds = array<i64: 1, 32>}, {pipeline_mode = #tpu.pipeline_mode<synchronous>, transform_indices = @transform_11, window_bounds = array<i64: 32, 32>}, {pipeline_mode = #tpu.pipeline_mode<synchronous>, transform_indices = @transform_12, window_bounds = array<i64: 1, 32>}, {pipeline_mode = #tpu.pipeline_mode<synchronous>, transform_indices = @transform_13, window_bounds = array<i64: 32, 32>}, {pipeline_mode = #tpu.pipeline_mode<synchronous>, transform_indices = @transform_14, window_bounds = array<i64: 1, 32>}, {transform_indices = @transform_15, window_bounds = array<i64: 1, 4, 32>}]} {
    %c0 = arith.constant 0 : index
    %c0_0 = arith.constant 0 : index
    %c0_1 = arith.constant 0 : index
    %0 = vector.load %arg1[%c0, %c0_0, %c0_1] : memref<1x4x32xf32, #tpu.memory_space<vmem>>, vector<1x4x32xf32>
    %1 = vector.shape_cast %0 : vector<1x4x32xf32> to vector<4x32xf32>
    %c0_2 = arith.constant 0 : index
    %c0_3 = arith.constant 0 : index
    %c0_4 = arith.constant 0 : index
    %2 = vector.load %arg2[%c0_2, %c0_3, %c0_4] : memref<1x4x16xf32, #tpu.memory_space<vmem>>, vector<1x4x16xf32>
    %3 = vector.shape_cast %2 : vector<1x4x16xf32> to vector<4x16xf32>
    %c0_5 = arith.constant 0 : index
    %c0_6 = arith.constant 0 : index
    %4 = vector.load %arg3[%c0_5, %c0_6] : memref<32x32xf32, #tpu.memory_space<vmem>>, vector<32x32xf32>
    %cst = arith.constant dense<0.000000e+00> : vector<4x32xf32>
    %5 = tpu.matmul %1, %4, %cst {dimension_numbers = #tpu.dot_dimension_numbers<[1], [0], [0], [1], [0, 0, 1, 1], [], []>} : vector<4x32xf32>, vector<32x32xf32>, vector<4x32xf32> -> vector<4x32xf32>
    %c0_7 = arith.constant 0 : index
    %c0_8 = arith.constant 0 : index
    %6 = vector.load %arg4[%c0_7, %c0_8] : memref<16x32xf32, #tpu.memory_space<vmem>>, vector<16x32xf32>
    %cst_9 = arith.constant dense<0.000000e+00> : vector<4x32xf32>
    %7 = tpu.matmul %3, %6, %cst_9 {dimension_numbers = #tpu.dot_dimension_numbers<[1], [0], [0], [1], [0, 0, 1, 1], [], []>} : vector<4x16xf32>, vector<16x32xf32>, vector<4x32xf32> -> vector<4x32xf32>
    %8 = arith.addf %5, %7 : vector<4x32xf32>
    %c0_10 = arith.constant 0 : index
    %c0_11 = arith.constant 0 : index
    %9 = vector.load %arg5[%c0_10, %c0_11] : memref<1x32xf32, #tpu.memory_space<vmem>>, vector<1x32xf32>
    %10 = vector.broadcast %9 : vector<1x32xf32> to vector<4x32xf32>
    %11 = arith.addf %8, %10 : vector<4x32xf32>
    %cst_12 = arith.constant 0.000000e+00 : f32
    %12 = vector.broadcast %cst_12 : f32 to vector<4x32xf32>
    %13 = arith.maximumf %11, %12 : vector<4x32xf32>
    %c0_13 = arith.constant 0 : index
    %c0_14 = arith.constant 0 : index
    %14 = vector.load %arg6[%c0_13, %c0_14] : memref<32x32xf32, #tpu.memory_space<vmem>>, vector<32x32xf32>
    %cst_15 = arith.constant dense<0.000000e+00> : vector<4x32xf32>
    %15 = tpu.matmul %1, %14, %cst_15 {dimension_numbers = #tpu.dot_dimension_numbers<[1], [0], [0], [1], [0, 0, 1, 1], [], []>} : vector<4x32xf32>, vector<32x32xf32>, vector<4x32xf32> -> vector<4x32xf32>
    %c0_16 = arith.constant 0 : index
    %c0_17 = arith.constant 0 : index
    %16 = vector.load %arg7[%c0_16, %c0_17] : memref<16x32xf32, #tpu.memory_space<vmem>>, vector<16x32xf32>
    %cst_18 = arith.constant dense<0.000000e+00> : vector<4x32xf32>
    %17 = tpu.matmul %3, %16, %cst_18 {dimension_numbers = #tpu.dot_dimension_numbers<[1], [0], [0], [1], [0, 0, 1, 1], [], []>} : vector<4x16xf32>, vector<16x32xf32>, vector<4x32xf32> -> vector<4x32xf32>
    %18 = arith.addf %15, %17 : vector<4x32xf32>
    %c0_19 = arith.constant 0 : index
    %c0_20 = arith.constant 0 : index
    %19 = vector.load %arg8[%c0_19, %c0_20] : memref<1x32xf32, #tpu.memory_space<vmem>>, vector<1x32xf32>
    %20 = vector.broadcast %19 : vector<1x32xf32> to vector<4x32xf32>
    %21 = arith.addf %18, %20 : vector<4x32xf32>
    %cst_21 = arith.constant 0.000000e+00 : f32
    %22 = vector.broadcast %cst_21 : f32 to vector<4x32xf32>
    %23 = arith.maximumf %21, %22 : vector<4x32xf32>
    %c0_22 = arith.constant 0 : index
    %c0_23 = arith.constant 0 : index
    %24 = vector.load %arg9[%c0_22, %c0_23] : memref<32x32xf32, #tpu.memory_space<vmem>>, vector<32x32xf32>
    %cst_24 = arith.constant dense<0.000000e+00> : vector<4x32xf32>
    %25 = tpu.matmul %1, %24, %cst_24 {dimension_numbers = #tpu.dot_dimension_numbers<[1], [0], [0], [1], [0, 0, 1, 1], [], []>} : vector<4x32xf32>, vector<32x32xf32>, vector<4x32xf32> -> vector<4x32xf32>
    %c0_25 = arith.constant 0 : index
    %c0_26 = arith.constant 0 : index
    %26 = vector.load %arg10[%c0_25, %c0_26] : memref<16x32xf32, #tpu.memory_space<vmem>>, vector<16x32xf32>
    %cst_27 = arith.constant dense<0.000000e+00> : vector<4x32xf32>
    %27 = tpu.matmul %3, %26, %cst_27 {dimension_numbers = #tpu.dot_dimension_numbers<[1], [0], [0], [1], [0, 0, 1, 1], [], []>} : vector<4x16xf32>, vector<16x32xf32>, vector<4x32xf32> -> vector<4x32xf32>
    %28 = arith.addf %25, %27 : vector<4x32xf32>
    %c0_28 = arith.constant 0 : index
    %c0_29 = arith.constant 0 : index
    %29 = vector.load %arg11[%c0_28, %c0_29] : memref<1x32xf32, #tpu.memory_space<vmem>>, vector<1x32xf32>
    %30 = vector.broadcast %29 : vector<1x32xf32> to vector<4x32xf32>
    %31 = arith.addf %28, %30 : vector<4x32xf32>
    %cst_30 = arith.constant 0.000000e+00 : f32
    %32 = vector.broadcast %cst_30 : f32 to vector<4x32xf32>
    %33 = arith.maximumf %31, %32 : vector<4x32xf32>
    %c0_31 = arith.constant 0 : index
    %c0_32 = arith.constant 0 : index
    %34 = vector.load %arg12[%c0_31, %c0_32] : memref<32x32xf32, #tpu.memory_space<vmem>>, vector<32x32xf32>
    %cst_33 = arith.constant 0.000000e+00 : f32
    %35 = vector.broadcast %cst_33 : f32 to vector<4x32xf32>
    %36 = vector.extract_strided_slice %13 {offsets = [0, 0], sizes = [4, 8], strides = [1, 1]} : vector<4x32xf32> to vector<4x8xf32>
    %37 = vector.extract_strided_slice %23 {offsets = [0, 0], sizes = [4, 8], strides = [1, 1]} : vector<4x32xf32> to vector<4x8xf32>
    %38 = vector.extract_strided_slice %33 {offsets = [0, 0], sizes = [4, 8], strides = [1, 1]} : vector<4x32xf32> to vector<4x8xf32>
    "tpu.trace_start"() <{level = 10 : i32, message = "td,sd->ts"}> : () -> ()
    %cst_34 = arith.constant dense<0.000000e+00> : vector<4x4xf32>
    %39 = tpu.matmul %36, %37, %cst_34 {dimension_numbers = #tpu.dot_dimension_numbers<[1], [1], [0], [0], [0, 0, 1, 0], [], []>} : vector<4x8xf32>, vector<4x8xf32>, vector<4x4xf32> -> vector<4x4xf32>
    "tpu.trace_stop"() : () -> ()
    %cst_35 = arith.constant 0.353553385 : f32
    %40 = vector.broadcast %cst_35 : f32 to vector<4x4xf32>
    %41 = arith.mulf %39, %40 : vector<4x4xf32>
    %cst_36 = arith.constant dense<0xFF800000> : vector<4xf32>
    %42 = vector.multi_reduction <maximumf>, %41, %cst_36 [1] : vector<4x4xf32> to vector<4xf32>
    %43 = vector.shape_cast %42 : vector<4xf32> to vector<4x1xf32>
    %44 = vector.broadcast %43 : vector<4x1xf32> to vector<4x4xf32>
    %45 = arith.subf %41, %44 : vector<4x4xf32>
    %46 = math.exp %45 : vector<4x4xf32>
    %cst_37 = arith.constant dense<0.000000e+00> : vector<4xf32>
    %47 = vector.multi_reduction <add>, %46, %cst_37 [1] : vector<4x4xf32> to vector<4xf32>
    %48 = vector.shape_cast %47 : vector<4xf32> to vector<4x1xf32>
    %49 = vector.broadcast %48 : vector<4x1xf32> to vector<4x4xf32>
    %50 = arith.divf %46, %49 : vector<4x4xf32>
    %cst_38 = arith.constant dense<0.000000e+00> : vector<4x8xf32>
    %51 = tpu.matmul %50, %38, %cst_38 {dimension_numbers = #tpu.dot_dimension_numbers<[1], [0], [0], [1], [0, 0, 1, 1], [], []>} : vector<4x4xf32>, vector<4x8xf32>, vector<4x8xf32> -> vector<4x8xf32>
    %52 = vector.extract_strided_slice %34 {offsets = [0, 0], sizes = [8, 32], strides = [1, 1]} : vector<32x32xf32> to vector<8x32xf32>
    %cst_39 = arith.constant dense<0.000000e+00> : vector<4x32xf32>
    %53 = tpu.matmul %51, %52, %cst_39 {dimension_numbers = #tpu.dot_dimension_numbers<[1], [0], [0], [1], [0, 0, 1, 1], [], []>} : vector<4x8xf32>, vector<8x32xf32>, vector<4x32xf32> -> vector<4x32xf32>
    %54 = arith.addf %35, %53 : vector<4x32xf32>
    %55 = vector.extract_strided_slice %13 {offsets = [0, 8], sizes = [4, 8], strides = [1, 1]} : vector<4x32xf32> to vector<4x8xf32>
    %56 = vector.extract_strided_slice %23 {offsets = [0, 8], sizes = [4, 8], strides = [1, 1]} : vector<4x32xf32> to vector<4x8xf32>
    %57 = vector.extract_strided_slice %33 {offsets = [0, 8], sizes = [4, 8], strides = [1, 1]} : vector<4x32xf32> to vector<4x8xf32>
    "tpu.trace_start"() <{level = 10 : i32, message = "td,sd->ts"}> : () -> ()
    %cst_40 = arith.constant dense<0.000000e+00> : vector<4x4xf32>
    %58 = tpu.matmul %55, %56, %cst_40 {dimension_numbers = #tpu.dot_dimension_numbers<[1], [1], [0], [0], [0, 0, 1, 0], [], []>} : vector<4x8xf32>, vector<4x8xf32>, vector<4x4xf32> -> vector<4x4xf32>
    "tpu.trace_stop"() : () -> ()
    %cst_41 = arith.constant 0.353553385 : f32
    %59 = vector.broadcast %cst_41 : f32 to vector<4x4xf32>
    %60 = arith.mulf %58, %59 : vector<4x4xf32>
    %cst_42 = arith.constant dense<0xFF800000> : vector<4xf32>
    %61 = vector.multi_reduction <maximumf>, %60, %cst_42 [1] : vector<4x4xf32> to vector<4xf32>
    %62 = vector.shape_cast %61 : vector<4xf32> to vector<4x1xf32>
    %63 = vector.broadcast %62 : vector<4x1xf32> to vector<4x4xf32>
    %64 = arith.subf %60, %63 : vector<4x4xf32>
    %65 = math.exp %64 : vector<4x4xf32>
    %cst_43 = arith.constant dense<0.000000e+00> : vector<4xf32>
    %66 = vector.multi_reduction <add>, %65, %cst_43 [1] : vector<4x4xf32> to vector<4xf32>
    %67 = vector.shape_cast %66 : vector<4xf32> to vector<4x1xf32>
    %68 = vector.broadcast %67 : vector<4x1xf32> to vector<4x4xf32>
    %69 = arith.divf %65, %68 : vector<4x4xf32>
    %cst_44 = arith.constant dense<0.000000e+00> : vector<4x8xf32>
    %70 = tpu.matmul %69, %57, %cst_44 {dimension_numbers = #tpu.dot_dimension_numbers<[1], [0], [0], [1], [0, 0, 1, 1], [], []>} : vector<4x4xf32>, vector<4x8xf32>, vector<4x8xf32> -> vector<4x8xf32>
    %71 = vector.extract_strided_slice %34 {offsets = [8, 0], sizes = [8, 32], strides = [1, 1]} : vector<32x32xf32> to vector<8x32xf32>
    %cst_45 = arith.constant dense<0.000000e+00> : vector<4x32xf32>
    %72 = tpu.matmul %70, %71, %cst_45 {dimension_numbers = #tpu.dot_dimension_numbers<[1], [0], [0], [1], [0, 0, 1, 1], [], []>} : vector<4x8xf32>, vector<8x32xf32>, vector<4x32xf32> -> vector<4x32xf32>
    %73 = arith.addf %54, %72 : vector<4x32xf32>
    %74 = vector.extract_strided_slice %13 {offsets = [0, 16], sizes = [4, 8], strides = [1, 1]} : vector<4x32xf32> to vector<4x8xf32>
    %75 = vector.extract_strided_slice %23 {offsets = [0, 16], sizes = [4, 8], strides = [1, 1]} : vector<4x32xf32> to vector<4x8xf32>
    %76 = vector.extract_strided_slice %33 {offsets = [0, 16], sizes = [4, 8], strides = [1, 1]} : vector<4x32xf32> to vector<4x8xf32>
    "tpu.trace_start"() <{level = 10 : i32, message = "td,sd->ts"}> : () -> ()
    %cst_46 = arith.constant dense<0.000000e+00> : vector<4x4xf32>
    %77 = tpu.matmul %74, %75, %cst_46 {dimension_numbers = #tpu.dot_dimension_numbers<[1], [1], [0], [0], [0, 0, 1, 0], [], []>} : vector<4x8xf32>, vector<4x8xf32>, vector<4x4xf32> -> vector<4x4xf32>
    "tpu.trace_stop"() : () -> ()
    %cst_47 = arith.constant 0.353553385 : f32
    %78 = vector.broadcast %cst_47 : f32 to vector<4x4xf32>
    %79 = arith.mulf %77, %78 : vector<4x4xf32>
    %cst_48 = arith.constant dense<0xFF800000> : vector<4xf32>
    %80 = vector.multi_reduction <maximumf>, %79, %cst_48 [1] : vector<4x4xf32> to vector<4xf32>
    %81 = vector.shape_cast %80 : vector<4xf32> to vector<4x1xf32>
    %82 = vector.broadcast %81 : vector<4x1xf32> to vector<4x4xf32>
    %83 = arith.subf %79, %82 : vector<4x4xf32>
    %84 = math.exp %83 : vector<4x4xf32>
    %cst_49 = arith.constant dense<0.000000e+00> : vector<4xf32>
    %85 = vector.multi_reduction <add>, %84, %cst_49 [1] : vector<4x4xf32> to vector<4xf32>
    %86 = vector.shape_cast %85 : vector<4xf32> to vector<4x1xf32>
    %87 = vector.broadcast %86 : vector<4x1xf32> to vector<4x4xf32>
    %88 = arith.divf %84, %87 : vector<4x4xf32>
    %cst_50 = arith.constant dense<0.000000e+00> : vector<4x8xf32>
    %89 = tpu.matmul %88, %76, %cst_50 {dimension_numbers = #tpu.dot_dimension_numbers<[1], [0], [0], [1], [0, 0, 1, 1], [], []>} : vector<4x4xf32>, vector<4x8xf32>, vector<4x8xf32> -> vector<4x8xf32>
    %90 = vector.extract_strided_slice %34 {offsets = [16, 0], sizes = [8, 32], strides = [1, 1]} : vector<32x32xf32> to vector<8x32xf32>
    %cst_51 = arith.constant dense<0.000000e+00> : vector<4x32xf32>
    %91 = tpu.matmul %89, %90, %cst_51 {dimension_numbers = #tpu.dot_dimension_numbers<[1], [0], [0], [1], [0, 0, 1, 1], [], []>} : vector<4x8xf32>, vector<8x32xf32>, vector<4x32xf32> -> vector<4x32xf32>
    %92 = arith.addf %73, %91 : vector<4x32xf32>
    %93 = vector.extract_strided_slice %13 {offsets = [0, 24], sizes = [4, 8], strides = [1, 1]} : vector<4x32xf32> to vector<4x8xf32>
    %94 = vector.extract_strided_slice %23 {offsets = [0, 24], sizes = [4, 8], strides = [1, 1]} : vector<4x32xf32> to vector<4x8xf32>
    %95 = vector.extract_strided_slice %33 {offsets = [0, 24], sizes = [4, 8], strides = [1, 1]} : vector<4x32xf32> to vector<4x8xf32>
    "tpu.trace_start"() <{level = 10 : i32, message = "td,sd->ts"}> : () -> ()
    %cst_52 = arith.constant dense<0.000000e+00> : vector<4x4xf32>
    %96 = tpu.matmul %93, %94, %cst_52 {dimension_numbers = #tpu.dot_dimension_numbers<[1], [1], [0], [0], [0, 0, 1, 0], [], []>} : vector<4x8xf32>, vector<4x8xf32>, vector<4x4xf32> -> vector<4x4xf32>
    "tpu.trace_stop"() : () -> ()
    %cst_53 = arith.constant 0.353553385 : f32
    %97 = vector.broadcast %cst_53 : f32 to vector<4x4xf32>
    %98 = arith.mulf %96, %97 : vector<4x4xf32>
    %cst_54 = arith.constant dense<0xFF800000> : vector<4xf32>
    %99 = vector.multi_reduction <maximumf>, %98, %cst_54 [1] : vector<4x4xf32> to vector<4xf32>
    %100 = vector.shape_cast %99 : vector<4xf32> to vector<4x1xf32>
    %101 = vector.broadcast %100 : vector<4x1xf32> to vector<4x4xf32>
    %102 = arith.subf %98, %101 : vector<4x4xf32>
    %103 = math.exp %102 : vector<4x4xf32>
    %cst_55 = arith.constant dense<0.000000e+00> : vector<4xf32>
    %104 = vector.multi_reduction <add>, %103, %cst_55 [1] : vector<4x4xf32> to vector<4xf32>
    %105 = vector.shape_cast %104 : vector<4xf32> to vector<4x1xf32>
    %106 = vector.broadcast %105 : vector<4x1xf32> to vector<4x4xf32>
    %107 = arith.divf %103, %106 : vector<4x4xf32>
    %cst_56 = arith.constant dense<0.000000e+00> : vector<4x8xf32>
    %108 = tpu.matmul %107, %95, %cst_56 {dimension_numbers = #tpu.dot_dimension_numbers<[1], [0], [0], [1], [0, 0, 1, 1], [], []>} : vector<4x4xf32>, vector<4x8xf32>, vector<4x8xf32> -> vector<4x8xf32>
    %109 = vector.extract_strided_slice %34 {offsets = [24, 0], sizes = [8, 32], strides = [1, 1]} : vector<32x32xf32> to vector<8x32xf32>
    %cst_57 = arith.constant dense<0.000000e+00> : vector<4x32xf32>
    %110 = tpu.matmul %108, %109, %cst_57 {dimension_numbers = #tpu.dot_dimension_numbers<[1], [0], [0], [1], [0, 0, 1, 1], [], []>} : vector<4x8xf32>, vector<8x32xf32>, vector<4x32xf32> -> vector<4x32xf32>
    %111 = arith.addf %92, %110 : vector<4x32xf32>
    %c0_58 = arith.constant 0 : index
    %c0_59 = arith.constant 0 : index
    %112 = vector.load %arg13[%c0_58, %c0_59] : memref<1x32xf32, #tpu.memory_space<vmem>>, vector<1x32xf32>
    %113 = vector.broadcast %112 : vector<1x32xf32> to vector<4x32xf32>
    %114 = arith.addf %111, %113 : vector<4x32xf32>
    %cst_60 = arith.constant 0.000000e+00 : f32
    %115 = vector.broadcast %cst_60 : f32 to vector<4x32xf32>
    %116 = arith.maximumf %114, %115 : vector<4x32xf32>
    %c0_61 = arith.constant 0 : index
    %c0_62 = arith.constant 0 : index
    %117 = vector.load %arg14[%c0_61, %c0_62] : memref<32x32xf32, #tpu.memory_space<vmem>>, vector<32x32xf32>
    %cst_63 = arith.constant dense<0.000000e+00> : vector<4x32xf32>
    %118 = tpu.matmul %116, %117, %cst_63 {dimension_numbers = #tpu.dot_dimension_numbers<[1], [0], [0], [1], [0, 0, 1, 1], [], []>} : vector<4x32xf32>, vector<32x32xf32>, vector<4x32xf32> -> vector<4x32xf32>
    %c0_64 = arith.constant 0 : index
    %c0_65 = arith.constant 0 : index
    %119 = vector.load %arg15[%c0_64, %c0_65] : memref<1x32xf32, #tpu.memory_space<vmem>>, vector<1x32xf32>
    %120 = vector.broadcast %119 : vector<1x32xf32> to vector<4x32xf32>
    %121 = arith.addf %118, %120 : vector<4x32xf32>
    %c0_66 = arith.constant 0 : index
    %c0_67 = arith.constant 0 : index
    %c0_68 = arith.constant 0 : index
    %122 = vector.load %arg16[%c0_66, %c0_67, %c0_68] : memref<1x4x32xf32, #tpu.memory_space<vmem>>, vector<1x4x32xf32>
    %123 = vector.shape_cast %122 : vector<1x4x32xf32> to vector<4x32xf32>
    %124 = vector.shape_cast %121 : vector<4x32xf32> to vector<1x4x32xf32>
    tpu.vector_store %arg16[%c0_66, %c0_67, %c0_68], %124 {strides = array<i32>} : memref<1x4x32xf32, #tpu.memory_space<vmem>>, vector<1x4x32xf32>,
    return
  }
  func.func @transform_0(%arg0: i32) -> (i32, i32, i32) {
    %c0_i32 = arith.constant 0 : i32
    %c0_i32_0 = arith.constant 0 : i32
    %c0_i32_1 = arith.constant 0 : i32
    return %arg0, %c0_i32, %c0_i32_0 : i32, i32, i32
  }
  func.func @transform_1(%arg0: i32) -> (i32, i32, i32) {
    %c0_i32 = arith.constant 0 : i32
    %c0_i32_0 = arith.constant 0 : i32
    %c0_i32_1 = arith.constant 0 : i32
    return %arg0, %c0_i32, %c0_i32_0 : i32, i32, i32
  }
  func.func @transform_2(%arg0: i32) -> (i32, i32) {
    %c0_i32 = arith.constant 0 : i32
    %c0_i32_0 = arith.constant 0 : i32
    %c0_i32_1 = arith.constant 0 : i32
    return %c0_i32, %c0_i32_0 : i32, i32
  }
  func.func @transform_3(%arg0: i32) -> (i32, i32) {
    %c0_i32 = arith.constant 0 : i32
    %c0_i32_0 = arith.constant 0 : i32
    %c0_i32_1 = arith.constant 0 : i32
    return %c0_i32, %c0_i32_0 : i32, i32
  }
  func.func @transform_4(%arg0: i32) -> (i32, i32) {
    %c0_i32 = arith.constant 0 : i32
    %c0_i32_0 = arith.constant 0 : i32
    %c0_i32_1 = arith.constant 0 : i32
    return %c0_i32, %c0_i32_0 : i32, i32
  }
  func.func @transform_5(%arg0: i32) -> (i32, i32) {
    %c0_i32 = arith.constant 0 : i32
    %c0_i32_0 = arith.constant 0 : i32
    %c0_i32_1 = arith.constant 0 : i32
    return %c0_i32, %c0_i32_0 : i32, i32
  }
  func.func @transform_6(%arg0: i32) -> (i32, i32) {
    %c0_i32 = arith.constant 0 : i32
    %c0_i32_0 = arith.constant 0 : i32
    %c0_i32_1 = arith.constant 0 : i32
    return %c0_i32, %c0_i32_0 : i32, i32
  }
  func.func @transform_7(%arg0: i32) -> (i32, i32) {
    %c0_i32 = arith.constant 0 : i32
    %c0_i32_0 = arith.constant 0 : i32
    %c0_i32_1 = arith.constant 0 : i32
    return %c0_i32, %c0_i32_0 : i32, i32
  }
  func.func @transform_8(%arg0: i32) -> (i32, i32) {
    %c0_i32 = arith.constant 0 : i32
    %c0_i32_0 = arith.constant 0 : i32
    %c0_i32_1 = arith.constant 0 : i32
    return %c0_i32, %c0_i32_0 : i32, i32
  }
  func.func @transform_9(%arg0: i32) -> (i32, i32) {
    %c0_i32 = arith.constant 0 : i32
    %c0_i32_0 = arith.constant 0 : i32
    %c0_i32_1 = arith.constant 0 : i32
    return %c0_i32, %c0_i32_0 : i32, i32
  }
  func.func @transform_10(%arg0: i32) -> (i32, i32) {
    %c0_i32 = arith.constant 0 : i32
    %c0_i32_0 = arith.constant 0 : i32
    %c0_i32_1 = arith.constant 0 : i32
    return %c0_i32, %c0_i32_0 : i32, i32
  }
  func.func @transform_11(%arg0: i32) -> (i32, i32) {
    %c0_i32 = arith.constant 0 : i32
    %c0_i32_0 = arith.constant 0 : i32
    %c0_i32_1 = arith.constant 0 : i32
    return %c0_i32, %c0_i32_0 : i32, i32
  }
  func.func @transform_12(%arg0: i32) -> (i32, i32) {
    %c0_i32 = arith.constant 0 : i32
    %c0_i32_0 = arith.constant 0 : i32
    %c0_i32_1 = arith.constant 0 : i32
    return %c0_i32, %c0_i32_0 : i32, i32
  }
  func.func @transform_13(%arg0: i32) -> (i32, i32) {
    %c0_i32 = arith.constant 0 : i32
    %c0_i32_0 = arith.constant 0 : i32
    %c0_i32_1 = arith.constant 0 : i32
    return %c0_i32, %c0_i32_0 : i32, i32
  }
  func.func @transform_14(%arg0: i32) -> (i32, i32) {
    %c0_i32 = arith.constant 0 : i32
    %c0_i32_0 = arith.constant 0 : i32
    %c0_i32_1 = arith.constant 0 : i32
    return %c0_i32, %c0_i32_0 : i32, i32
  }
  func.func @transform_15(%arg0: i32) -> (i32, i32, i32) {
    %c0_i32 = arith.constant 0 : i32
    %c0_i32_0 = arith.constant 0 : i32
    %c0_i32_1 = arith.constant 0 : i32
    return %arg0, %c0_i32, %c0_i32_0 : i32, i32, i32
  }
}

module attributes {stable_mosaic.version = 11 : i64} {
  func.func @_spatial_attn_kernel(%arg0: i32, %arg1: memref<1x8x32xf32, #tpu.memory_space<vmem>>, %arg2: memref<1x8x16xf32, #tpu.memory_space<vmem>>, %arg3: memref<32x48xf32, #tpu.memory_space<vmem>>, %arg4: memref<16x48xf32, #tpu.memory_space<vmem>>, %arg5: memref<1x48xf32, #tpu.memory_space<vmem>>, %arg6: memref<32x48xf32, #tpu.memory_space<vmem>>, %arg7: memref<16x48xf32, #tpu.memory_space<vmem>>, %arg8: memref<1x48xf32, #tpu.memory_space<vmem>>, %arg9: memref<48x48xf32, #tpu.memory_space<vmem>>, %arg10: memref<1x48xf32, #tpu.memory_space<vmem>>, %arg11: memref<48x32xf32, #tpu.memory_space<vmem>>, %arg12: memref<1x32xf32, #tpu.memory_space<vmem>>, %arg13: memref<1x8x32xf32, #tpu.memory_space<vmem>>) attributes {dimension_semantics = [#tpu.dimension_semantics<parallel>], iteration_bounds = array<i64: 8>, scalar_prefetch = 0 : i64, scratch_operands = 0 : i64, tpu.core_type = #tpu.core_type<tc>, window_params = [{transform_indices = @transform_0, window_bounds = array<i64: 1, 8, 32>}, {transform_indices = @transform_1, window_bounds = array<i64: 1, 8, 16>}, {pipeline_mode = #tpu.pipeline_mode<synchronous>, transform_indices = @transform_2, window_bounds = array<i64: 32, 48>}, {pipeline_mode = #tpu.pipeline_mode<synchronous>, transform_indices = @transform_3, window_bounds = array<i64: 16, 48>}, {pipeline_mode = #tpu.pipeline_mode<synchronous>, transform_indices = @transform_4, window_bounds = array<i64: 1, 48>}, {pipeline_mode = #tpu.pipeline_mode<synchronous>, transform_indices = @transform_5, window_bounds = array<i64: 32, 48>}, {pipeline_mode = #tpu.pipeline_mode<synchronous>, transform_indices = @transform_6, window_bounds = array<i64: 16, 48>}, {pipeline_mode = #tpu.pipeline_mode<synchronous>, transform_indices = @transform_7, window_bounds = array<i64: 1, 48>}, {pipeline_mode = #tpu.pipeline_mode<synchronous>, transform_indices = @transform_8, window_bounds = array<i64: 48, 48>}, {pipeline_mode = #tpu.pipeline_mode<synchronous>, transform_indices = @transform_9, window_bounds = array<i64: 1, 48>}, {pipeline_mode = #tpu.pipeline_mode<synchronous>, transform_indices = @transform_10, window_bounds = array<i64: 48, 32>}, {pipeline_mode = #tpu.pipeline_mode<synchronous>, transform_indices = @transform_11, window_bounds = array<i64: 1, 32>}, {transform_indices = @transform_12, window_bounds = array<i64: 1, 8, 32>}]} {
    %c0 = arith.constant 0 : index
    %c0_0 = arith.constant 0 : index
    %c0_1 = arith.constant 0 : index
    %0 = vector.load %arg1[%c0, %c0_0, %c0_1] : memref<1x8x32xf32, #tpu.memory_space<vmem>>, vector<1x8x32xf32>
    %1 = vector.shape_cast %0 : vector<1x8x32xf32> to vector<8x32xf32>
    %c0_2 = arith.constant 0 : index
    %c0_3 = arith.constant 0 : index
    %c0_4 = arith.constant 0 : index
    %2 = vector.load %arg2[%c0_2, %c0_3, %c0_4] : memref<1x8x16xf32, #tpu.memory_space<vmem>>, vector<1x8x16xf32>
    %3 = vector.shape_cast %2 : vector<1x8x16xf32> to vector<8x16xf32>
    %c0_5 = arith.constant 0 : index
    %c0_6 = arith.constant 0 : index
    %4 = vector.load %arg3[%c0_5, %c0_6] : memref<32x48xf32, #tpu.memory_space<vmem>>, vector<32x48xf32>
    %cst = arith.constant dense<0.000000e+00> : vector<8x48xf32>
    %5 = tpu.matmul %1, %4, %cst {dimension_numbers = #tpu.dot_dimension_numbers<[1], [0], [0], [1], [0, 0, 1, 1], [], []>} : vector<8x32xf32>, vector<32x48xf32>, vector<8x48xf32> -> vector<8x48xf32>
    %c0_7 = arith.constant 0 : index
    %c0_8 = arith.constant 0 : index
    %6 = vector.load %arg4[%c0_7, %c0_8] : memref<16x48xf32, #tpu.memory_space<vmem>>, vector<16x48xf32>
    %cst_9 = arith.constant dense<0.000000e+00> : vector<8x48xf32>
    %7 = tpu.matmul %3, %6, %cst_9 {dimension_numbers = #tpu.dot_dimension_numbers<[1], [0], [0], [1], [0, 0, 1, 1], [], []>} : vector<8x16xf32>, vector<16x48xf32>, vector<8x48xf32> -> vector<8x48xf32>
    %8 = arith.addf %5, %7 : vector<8x48xf32>
    %c0_10 = arith.constant 0 : index
    %c0_11 = arith.constant 0 : index
    %9 = vector.load %arg5[%c0_10, %c0_11] : memref<1x48xf32, #tpu.memory_space<vmem>>, vector<1x48xf32>
    %10 = vector.broadcast %9 : vector<1x48xf32> to vector<8x48xf32>
    %11 = arith.addf %8, %10 : vector<8x48xf32>
    %c0_12 = arith.constant 0 : index
    %c0_13 = arith.constant 0 : index
    %12 = vector.load %arg6[%c0_12, %c0_13] : memref<32x48xf32, #tpu.memory_space<vmem>>, vector<32x48xf32>
    %cst_14 = arith.constant dense<0.000000e+00> : vector<8x48xf32>
    %13 = tpu.matmul %1, %12, %cst_14 {dimension_numbers = #tpu.dot_dimension_numbers<[1], [0], [0], [1], [0, 0, 1, 1], [], []>} : vector<8x32xf32>, vector<32x48xf32>, vector<8x48xf32> -> vector<8x48xf32>
    %c0_15 = arith.constant 0 : index
    %c0_16 = arith.constant 0 : index
    %14 = vector.load %arg7[%c0_15, %c0_16] : memref<16x48xf32, #tpu.memory_space<vmem>>, vector<16x48xf32>
    %cst_17 = arith.constant dense<0.000000e+00> : vector<8x48xf32>
    %15 = tpu.matmul %3, %14, %cst_17 {dimension_numbers = #tpu.dot_dimension_numbers<[1], [0], [0], [1], [0, 0, 1, 1], [], []>} : vector<8x16xf32>, vector<16x48xf32>, vector<8x48xf32> -> vector<8x48xf32>
    %16 = arith.addf %13, %15 : vector<8x48xf32>
    %c0_18 = arith.constant 0 : index
    %c0_19 = arith.constant 0 : index
    %17 = vector.load %arg8[%c0_18, %c0_19] : memref<1x48xf32, #tpu.memory_space<vmem>>, vector<1x48xf32>
    %18 = vector.broadcast %17 : vector<1x48xf32> to vector<8x48xf32>
    %19 = arith.addf %16, %18 : vector<8x48xf32>
    %c0_20 = arith.constant 0 : index
    %c0_21 = arith.constant 0 : index
    %20 = vector.load %arg9[%c0_20, %c0_21] : memref<48x48xf32, #tpu.memory_space<vmem>>, vector<48x48xf32>
    %cst_22 = arith.constant 0.000000e+00 : f32
    %21 = vector.broadcast %cst_22 : f32 to vector<8x48xf32>
    %22 = vector.extract_strided_slice %11 {offsets = [0, 0], sizes = [8, 12], strides = [1, 1]} : vector<8x48xf32> to vector<8x12xf32>
    %23 = vector.extract_strided_slice %19 {offsets = [0, 0], sizes = [8, 12], strides = [1, 1]} : vector<8x48xf32> to vector<8x12xf32>
    %cst_23 = arith.constant dense<0xFF800000> : vector<8xf32>
    %24 = vector.multi_reduction <maximumf>, %22, %cst_23 [1] : vector<8x12xf32> to vector<8xf32>
    %25 = vector.shape_cast %24 : vector<8xf32> to vector<8x1xf32>
    %26 = vector.broadcast %25 : vector<8x1xf32> to vector<8x12xf32>
    %27 = arith.subf %22, %26 : vector<8x12xf32>
    %28 = math.exp %27 : vector<8x12xf32>
    %cst_24 = arith.constant dense<0.000000e+00> : vector<8xf32>
    %29 = vector.multi_reduction <add>, %28, %cst_24 [1] : vector<8x12xf32> to vector<8xf32>
    %30 = vector.shape_cast %29 : vector<8xf32> to vector<8x1xf32>
    %31 = vector.broadcast %30 : vector<8x1xf32> to vector<8x12xf32>
    %32 = arith.divf %28, %31 : vector<8x12xf32>
    %cst_25 = arith.constant 0.732997238 : f32
    %33 = vector.broadcast %cst_25 : f32 to vector<8x12xf32>
    %34 = arith.mulf %32, %33 : vector<8x12xf32>
    %cst_26 = arith.constant dense<0xFF800000> : vector<12xf32>
    %35 = vector.multi_reduction <maximumf>, %34, %cst_26 [0] : vector<8x12xf32> to vector<12xf32>
    %36 = vector.shape_cast %35 : vector<12xf32> to vector<1x12xf32>
    %37 = vector.broadcast %36 : vector<1x12xf32> to vector<8x12xf32>
    %38 = arith.subf %34, %37 : vector<8x12xf32>
    %39 = math.exp %38 : vector<8x12xf32>
    %cst_27 = arith.constant dense<0.000000e+00> : vector<12xf32>
    %40 = vector.multi_reduction <add>, %39, %cst_27 [0] : vector<8x12xf32> to vector<12xf32>
    %41 = vector.shape_cast %40 : vector<12xf32> to vector<1x12xf32>
    %42 = vector.broadcast %41 : vector<1x12xf32> to vector<8x12xf32>
    %43 = arith.divf %39, %42 : vector<8x12xf32>
    %cst_28 = arith.constant 0.732997238 : f32
    %44 = vector.broadcast %cst_28 : f32 to vector<8x12xf32>
    %45 = arith.mulf %43, %44 : vector<8x12xf32>
    "tpu.trace_start"() <{level = 10 : i32, message = "nd,ne->de"}> : () -> ()
    %cst_29 = arith.constant dense<0.000000e+00> : vector<12x12xf32>
    %46 = tpu.matmul %45, %23, %cst_29 {dimension_numbers = #tpu.dot_dimension_numbers<[0], [0], [1], [1], [0, 1, 1, 1], [], []>} : vector<8x12xf32>, vector<8x12xf32>, vector<12x12xf32> -> vector<12x12xf32>
    "tpu.trace_stop"() : () -> ()
    %cst_30 = arith.constant dense<0.000000e+00> : vector<8x12xf32>
    %47 = tpu.matmul %34, %46, %cst_30 {dimension_numbers = #tpu.dot_dimension_numbers<[1], [0], [0], [1], [0, 0, 1, 1], [], []>} : vector<8x12xf32>, vector<12x12xf32>, vector<8x12xf32> -> vector<8x12xf32>
    %48 = vector.extract_strided_slice %20 {offsets = [0, 0], sizes = [12, 48], strides = [1, 1]} : vector<48x48xf32> to vector<12x48xf32>
    %cst_31 = arith.constant dense<0.000000e+00> : vector<8x48xf32>
    %49 = tpu.matmul %47, %48, %cst_31 {dimension_numbers = #tpu.dot_dimension_numbers<[1], [0], [0], [1], [0, 0, 1, 1], [], []>} : vector<8x12xf32>, vector<12x48xf32>, vector<8x48xf32> -> vector<8x48xf32>
    %50 = arith.addf %21, %49 : vector<8x48xf32>
    %51 = vector.extract_strided_slice %11 {offsets = [0, 12], sizes = [8, 12], strides = [1, 1]} : vector<8x48xf32> to vector<8x12xf32>
    %52 = vector.extract_strided_slice %19 {offsets = [0, 12], sizes = [8, 12], strides = [1, 1]} : vector<8x48xf32> to vector<8x12xf32>
    %cst_32 = arith.constant dense<0xFF800000> : vector<8xf32>
    %53 = vector.multi_reduction <maximumf>, %51, %cst_32 [1] : vector<8x12xf32> to vector<8xf32>
    %54 = vector.shape_cast %53 : vector<8xf32> to vector<8x1xf32>
    %55 = vector.broadcast %54 : vector<8x1xf32> to vector<8x12xf32>
    %56 = arith.subf %51, %55 : vector<8x12xf32>
    %57 = math.exp %56 : vector<8x12xf32>
    %cst_33 = arith.constant dense<0.000000e+00> : vector<8xf32>
    %58 = vector.multi_reduction <add>, %57, %cst_33 [1] : vector<8x12xf32> to vector<8xf32>
    %59 = vector.shape_cast %58 : vector<8xf32> to vector<8x1xf32>
    %60 = vector.broadcast %59 : vector<8x1xf32> to vector<8x12xf32>
    %61 = arith.divf %57, %60 : vector<8x12xf32>
    %cst_34 = arith.constant 0.732997238 : f32
    %62 = vector.broadcast %cst_34 : f32 to vector<8x12xf32>
    %63 = arith.mulf %61, %62 : vector<8x12xf32>
    %cst_35 = arith.constant dense<0xFF800000> : vector<12xf32>
    %64 = vector.multi_reduction <maximumf>, %63, %cst_35 [0] : vector<8x12xf32> to vector<12xf32>
    %65 = vector.shape_cast %64 : vector<12xf32> to vector<1x12xf32>
    %66 = vector.broadcast %65 : vector<1x12xf32> to vector<8x12xf32>
    %67 = arith.subf %63, %66 : vector<8x12xf32>
    %68 = math.exp %67 : vector<8x12xf32>
    %cst_36 = arith.constant dense<0.000000e+00> : vector<12xf32>
    %69 = vector.multi_reduction <add>, %68, %cst_36 [0] : vector<8x12xf32> to vector<12xf32>
    %70 = vector.shape_cast %69 : vector<12xf32> to vector<1x12xf32>
    %71 = vector.broadcast %70 : vector<1x12xf32> to vector<8x12xf32>
    %72 = arith.divf %68, %71 : vector<8x12xf32>
    %cst_37 = arith.constant 0.732997238 : f32
    %73 = vector.broadcast %cst_37 : f32 to vector<8x12xf32>
    %74 = arith.mulf %72, %73 : vector<8x12xf32>
    "tpu.trace_start"() <{level = 10 : i32, message = "nd,ne->de"}> : () -> ()
    %cst_38 = arith.constant dense<0.000000e+00> : vector<12x12xf32>
    %75 = tpu.matmul %74, %52, %cst_38 {dimension_numbers = #tpu.dot_dimension_numbers<[0], [0], [1], [1], [0, 1, 1, 1], [], []>} : vector<8x12xf32>, vector<8x12xf32>, vector<12x12xf32> -> vector<12x12xf32>
    "tpu.trace_stop"() : () -> ()
    %cst_39 = arith.constant dense<0.000000e+00> : vector<8x12xf32>
    %76 = tpu.matmul %63, %75, %cst_39 {dimension_numbers = #tpu.dot_dimension_numbers<[1], [0], [0], [1], [0, 0, 1, 1], [], []>} : vector<8x12xf32>, vector<12x12xf32>, vector<8x12xf32> -> vector<8x12xf32>
    %77 = vector.extract_strided_slice %20 {offsets = [12, 0], sizes = [12, 48], strides = [1, 1]} : vector<48x48xf32> to vector<12x48xf32>
    %cst_40 = arith.constant dense<0.000000e+00> : vector<8x48xf32>
    %78 = tpu.matmul %76, %77, %cst_40 {dimension_numbers = #tpu.dot_dimension_numbers<[1], [0], [0], [1], [0, 0, 1, 1], [], []>} : vector<8x12xf32>, vector<12x48xf32>, vector<8x48xf32> -> vector<8x48xf32>
    %79 = arith.addf %50, %78 : vector<8x48xf32>
    %80 = vector.extract_strided_slice %11 {offsets = [0, 24], sizes = [8, 12], strides = [1, 1]} : vector<8x48xf32> to vector<8x12xf32>
    %81 = vector.extract_strided_slice %19 {offsets = [0, 24], sizes = [8, 12], strides = [1, 1]} : vector<8x48xf32> to vector<8x12xf32>
    %cst_41 = arith.constant dense<0xFF800000> : vector<8xf32>
    %82 = vector.multi_reduction <maximumf>, %80, %cst_41 [1] : vector<8x12xf32> to vector<8xf32>
    %83 = vector.shape_cast %82 : vector<8xf32> to vector<8x1xf32>
    %84 = vector.broadcast %83 : vector<8x1xf32> to vector<8x12xf32>
    %85 = arith.subf %80, %84 : vector<8x12xf32>
    %86 = math.exp %85 : vector<8x12xf32>
    %cst_42 = arith.constant dense<0.000000e+00> : vector<8xf32>
    %87 = vector.multi_reduction <add>, %86, %cst_42 [1] : vector<8x12xf32> to vector<8xf32>
    %88 = vector.shape_cast %87 : vector<8xf32> to vector<8x1xf32>
    %89 = vector.broadcast %88 : vector<8x1xf32> to vector<8x12xf32>
    %90 = arith.divf %86, %89 : vector<8x12xf32>
    %cst_43 = arith.constant 0.732997238 : f32
    %91 = vector.broadcast %cst_43 : f32 to vector<8x12xf32>
    %92 = arith.mulf %90, %91 : vector<8x12xf32>
    %cst_44 = arith.constant dense<0xFF800000> : vector<12xf32>
    %93 = vector.multi_reduction <maximumf>, %92, %cst_44 [0] : vector<8x12xf32> to vector<12xf32>
    %94 = vector.shape_cast %93 : vector<12xf32> to vector<1x12xf32>
    %95 = vector.broadcast %94 : vector<1x12xf32> to vector<8x12xf32>
    %96 = arith.subf %92, %95 : vector<8x12xf32>
    %97 = math.exp %96 : vector<8x12xf32>
    %cst_45 = arith.constant dense<0.000000e+00> : vector<12xf32>
    %98 = vector.multi_reduction <add>, %97, %cst_45 [0] : vector<8x12xf32> to vector<12xf32>
    %99 = vector.shape_cast %98 : vector<12xf32> to vector<1x12xf32>
    %100 = vector.broadcast %99 : vector<1x12xf32> to vector<8x12xf32>
    %101 = arith.divf %97, %100 : vector<8x12xf32>
    %cst_46 = arith.constant 0.732997238 : f32
    %102 = vector.broadcast %cst_46 : f32 to vector<8x12xf32>
    %103 = arith.mulf %101, %102 : vector<8x12xf32>
    "tpu.trace_start"() <{level = 10 : i32, message = "nd,ne->de"}> : () -> ()
    %cst_47 = arith.constant dense<0.000000e+00> : vector<12x12xf32>
    %104 = tpu.matmul %103, %81, %cst_47 {dimension_numbers = #tpu.dot_dimension_numbers<[0], [0], [1], [1], [0, 1, 1, 1], [], []>} : vector<8x12xf32>, vector<8x12xf32>, vector<12x12xf32> -> vector<12x12xf32>
    "tpu.trace_stop"() : () -> ()
    %cst_48 = arith.constant dense<0.000000e+00> : vector<8x12xf32>
    %105 = tpu.matmul %92, %104, %cst_48 {dimension_numbers = #tpu.dot_dimension_numbers<[1], [0], [0], [1], [0, 0, 1, 1], [], []>} : vector<8x12xf32>, vector<12x12xf32>, vector<8x12xf32> -> vector<8x12xf32>
    %106 = vector.extract_strided_slice %20 {offsets = [24, 0], sizes = [12, 48], strides = [1, 1]} : vector<48x48xf32> to vector<12x48xf32>
    %cst_49 = arith.constant dense<0.000000e+00> : vector<8x48xf32>
    %107 = tpu.matmul %105, %106, %cst_49 {dimension_numbers = #tpu.dot_dimension_numbers<[1], [0], [0], [1], [0, 0, 1, 1], [], []>} : vector<8x12xf32>, vector<12x48xf32>, vector<8x48xf32> -> vector<8x48xf32>
    %108 = arith.addf %79, %107 : vector<8x48xf32>
    %109 = vector.extract_strided_slice %11 {offsets = [0, 36], sizes = [8, 12], strides = [1, 1]} : vector<8x48xf32> to vector<8x12xf32>
    %110 = vector.extract_strided_slice %19 {offsets = [0, 36], sizes = [8, 12], strides = [1, 1]} : vector<8x48xf32> to vector<8x12xf32>
    %cst_50 = arith.constant dense<0xFF800000> : vector<8xf32>
    %111 = vector.multi_reduction <maximumf>, %109, %cst_50 [1] : vector<8x12xf32> to vector<8xf32>
    %112 = vector.shape_cast %111 : vector<8xf32> to vector<8x1xf32>
    %113 = vector.broadcast %112 : vector<8x1xf32> to vector<8x12xf32>
    %114 = arith.subf %109, %113 : vector<8x12xf32>
    %115 = math.exp %114 : vector<8x12xf32>
    %cst_51 = arith.constant dense<0.000000e+00> : vector<8xf32>
    %116 = vector.multi_reduction <add>, %115, %cst_51 [1] : vector<8x12xf32> to vector<8xf32>
    %117 = vector.shape_cast %116 : vector<8xf32> to vector<8x1xf32>
    %118 = vector.broadcast %117 : vector<8x1xf32> to vector<8x12xf32>
    %119 = arith.divf %115, %118 : vector<8x12xf32>
    %cst_52 = arith.constant 0.732997238 : f32
    %120 = vector.broadcast %cst_52 : f32 to vector<8x12xf32>
    %121 = arith.mulf %119, %120 : vector<8x12xf32>
    %cst_53 = arith.constant dense<0xFF800000> : vector<12xf32>
    %122 = vector.multi_reduction <maximumf>, %121, %cst_53 [0] : vector<8x12xf32> to vector<12xf32>
    %123 = vector.shape_cast %122 : vector<12xf32> to vector<1x12xf32>
    %124 = vector.broadcast %123 : vector<1x12xf32> to vector<8x12xf32>
    %125 = arith.subf %121, %124 : vector<8x12xf32>
    %126 = math.exp %125 : vector<8x12xf32>
    %cst_54 = arith.constant dense<0.000000e+00> : vector<12xf32>
    %127 = vector.multi_reduction <add>, %126, %cst_54 [0] : vector<8x12xf32> to vector<12xf32>
    %128 = vector.shape_cast %127 : vector<12xf32> to vector<1x12xf32>
    %129 = vector.broadcast %128 : vector<1x12xf32> to vector<8x12xf32>
    %130 = arith.divf %126, %129 : vector<8x12xf32>
    %cst_55 = arith.constant 0.732997238 : f32
    %131 = vector.broadcast %cst_55 : f32 to vector<8x12xf32>
    %132 = arith.mulf %130, %131 : vector<8x12xf32>
    "tpu.trace_start"() <{level = 10 : i32, message = "nd,ne->de"}> : () -> ()
    %cst_56 = arith.constant dense<0.000000e+00> : vector<12x12xf32>
    %133 = tpu.matmul %132, %110, %cst_56 {dimension_numbers = #tpu.dot_dimension_numbers<[0], [0], [1], [1], [0, 1, 1, 1], [], []>} : vector<8x12xf32>, vector<8x12xf32>, vector<12x12xf32> -> vector<12x12xf32>
    "tpu.trace_stop"() : () -> ()
    %cst_57 = arith.constant dense<0.000000e+00> : vector<8x12xf32>
    %134 = tpu.matmul %121, %133, %cst_57 {dimension_numbers = #tpu.dot_dimension_numbers<[1], [0], [0], [1], [0, 0, 1, 1], [], []>} : vector<8x12xf32>, vector<12x12xf32>, vector<8x12xf32> -> vector<8x12xf32>
    %135 = vector.extract_strided_slice %20 {offsets = [36, 0], sizes = [12, 48], strides = [1, 1]} : vector<48x48xf32> to vector<12x48xf32>
    %cst_58 = arith.constant dense<0.000000e+00> : vector<8x48xf32>
    %136 = tpu.matmul %134, %135, %cst_58 {dimension_numbers = #tpu.dot_dimension_numbers<[1], [0], [0], [1], [0, 0, 1, 1], [], []>} : vector<8x12xf32>, vector<12x48xf32>, vector<8x48xf32> -> vector<8x48xf32>
    %137 = arith.addf %108, %136 : vector<8x48xf32>
    %c0_59 = arith.constant 0 : index
    %c0_60 = arith.constant 0 : index
    %138 = vector.load %arg10[%c0_59, %c0_60] : memref<1x48xf32, #tpu.memory_space<vmem>>, vector<1x48xf32>
    %139 = vector.broadcast %138 : vector<1x48xf32> to vector<8x48xf32>
    %140 = arith.addf %137, %139 : vector<8x48xf32>
    %c0_61 = arith.constant 0 : index
    %c0_62 = arith.constant 0 : index
    %141 = vector.load %arg11[%c0_61, %c0_62] : memref<48x32xf32, #tpu.memory_space<vmem>>, vector<48x32xf32>
    %cst_63 = arith.constant dense<0.000000e+00> : vector<8x32xf32>
    %142 = tpu.matmul %140, %141, %cst_63 {dimension_numbers = #tpu.dot_dimension_numbers<[1], [0], [0], [1], [0, 0, 1, 1], [], []>} : vector<8x48xf32>, vector<48x32xf32>, vector<8x32xf32> -> vector<8x32xf32>
    %c0_64 = arith.constant 0 : index
    %c0_65 = arith.constant 0 : index
    %143 = vector.load %arg12[%c0_64, %c0_65] : memref<1x32xf32, #tpu.memory_space<vmem>>, vector<1x32xf32>
    %144 = vector.broadcast %143 : vector<1x32xf32> to vector<8x32xf32>
    %145 = arith.addf %142, %144 : vector<8x32xf32>
    %cst_66 = arith.constant 0.000000e+00 : f32
    %146 = vector.broadcast %cst_66 : f32 to vector<8x32xf32>
    %147 = arith.maximumf %145, %146 : vector<8x32xf32>
    %c0_67 = arith.constant 0 : index
    %c0_68 = arith.constant 0 : index
    %c0_69 = arith.constant 0 : index
    %148 = vector.load %arg13[%c0_67, %c0_68, %c0_69] : memref<1x8x32xf32, #tpu.memory_space<vmem>>, vector<1x8x32xf32>
    %149 = vector.shape_cast %148 : vector<1x8x32xf32> to vector<8x32xf32>
    %150 = vector.shape_cast %147 : vector<8x32xf32> to vector<1x8x32xf32>
    tpu.vector_store %arg13[%c0_67, %c0_68, %c0_69], %150 {strides = array<i32>} : memref<1x8x32xf32, #tpu.memory_space<vmem>>, vector<1x8x32xf32>,
    return
  }
  func.func @transform_0(%arg0: i32) -> (i32, i32, i32) {
    %c0_i32 = arith.constant 0 : i32
    %c0_i32_0 = arith.constant 0 : i32
    %c0_i32_1 = arith.constant 0 : i32
    return %arg0, %c0_i32, %c0_i32_0 : i32, i32, i32
  }
  func.func @transform_1(%arg0: i32) -> (i32, i32, i32) {
    %c0_i32 = arith.constant 0 : i32
    %c0_i32_0 = arith.constant 0 : i32
    %c0_i32_1 = arith.constant 0 : i32
    return %arg0, %c0_i32, %c0_i32_0 : i32, i32, i32
  }
  func.func @transform_2(%arg0: i32) -> (i32, i32) {
    %c0_i32 = arith.constant 0 : i32
    %c0_i32_0 = arith.constant 0 : i32
    %c0_i32_1 = arith.constant 0 : i32
    return %c0_i32, %c0_i32_0 : i32, i32
  }
  func.func @transform_3(%arg0: i32) -> (i32, i32) {
    %c0_i32 = arith.constant 0 : i32
    %c0_i32_0 = arith.constant 0 : i32
    %c0_i32_1 = arith.constant 0 : i32
    return %c0_i32, %c0_i32_0 : i32, i32
  }
  func.func @transform_4(%arg0: i32) -> (i32, i32) {
    %c0_i32 = arith.constant 0 : i32
    %c0_i32_0 = arith.constant 0 : i32
    %c0_i32_1 = arith.constant 0 : i32
    return %c0_i32, %c0_i32_0 : i32, i32
  }
  func.func @transform_5(%arg0: i32) -> (i32, i32) {
    %c0_i32 = arith.constant 0 : i32
    %c0_i32_0 = arith.constant 0 : i32
    %c0_i32_1 = arith.constant 0 : i32
    return %c0_i32, %c0_i32_0 : i32, i32
  }
  func.func @transform_6(%arg0: i32) -> (i32, i32) {
    %c0_i32 = arith.constant 0 : i32
    %c0_i32_0 = arith.constant 0 : i32
    %c0_i32_1 = arith.constant 0 : i32
    return %c0_i32, %c0_i32_0 : i32, i32
  }
  func.func @transform_7(%arg0: i32) -> (i32, i32) {
    %c0_i32 = arith.constant 0 : i32
    %c0_i32_0 = arith.constant 0 : i32
    %c0_i32_1 = arith.constant 0 : i32
    return %c0_i32, %c0_i32_0 : i32, i32
  }
  func.func @transform_8(%arg0: i32) -> (i32, i32) {
    %c0_i32 = arith.constant 0 : i32
    %c0_i32_0 = arith.constant 0 : i32
    %c0_i32_1 = arith.constant 0 : i32
    return %c0_i32, %c0_i32_0 : i32, i32
  }
  func.func @transform_9(%arg0: i32) -> (i32, i32) {
    %c0_i32 = arith.constant 0 : i32
    %c0_i32_0 = arith.constant 0 : i32
    %c0_i32_1 = arith.constant 0 : i32
    return %c0_i32, %c0_i32_0 : i32, i32
  }
  func.func @transform_10(%arg0: i32) -> (i32, i32) {
    %c0_i32 = arith.constant 0 : i32
    %c0_i32_0 = arith.constant 0 : i32
    %c0_i32_1 = arith.constant 0 : i32
    return %c0_i32, %c0_i32_0 : i32, i32
  }
  func.func @transform_11(%arg0: i32) -> (i32, i32) {
    %c0_i32 = arith.constant 0 : i32
    %c0_i32_0 = arith.constant 0 : i32
    %c0_i32_1 = arith.constant 0 : i32
    return %c0_i32, %c0_i32_0 : i32, i32
  }
  func.func @transform_12(%arg0: i32) -> (i32, i32, i32) {
    %c0_i32 = arith.constant 0 : i32
    %c0_i32_0 = arith.constant 0 : i32
    %c0_i32_1 = arith.constant 0 : i32
    return %arg0, %c0_i32, %c0_i32_0 : i32, i32, i32
  }
}

module attributes {stable_mosaic.version = 11 : i64} {
  func.func @_fusion_kernel(%arg0: i32, %arg1: memref<64x32xf32, #tpu.memory_space<vmem>>, %arg2: memref<64x32xf32, #tpu.memory_space<vmem>>, %arg3: memref<64x32xf32, #tpu.memory_space<vmem>>, %arg4: memref<32x32xf32, #tpu.memory_space<vmem>>, %arg5: memref<32x32xf32, #tpu.memory_space<vmem>>, %arg6: memref<1x32xf32, #tpu.memory_space<vmem>>, %arg7: memref<32x32xf32, #tpu.memory_space<vmem>>, %arg8: memref<1x32xf32, #tpu.memory_space<vmem>>, %arg9: memref<32x32xf32, #tpu.memory_space<vmem>>, %arg10: memref<1x32xf32, #tpu.memory_space<vmem>>, %arg11: memref<64x32xf32, #tpu.memory_space<vmem>>) attributes {dimension_semantics = [#tpu.dimension_semantics<arbitrary>], iteration_bounds = array<i64: 1>, scalar_prefetch = 0 : i64, scratch_operands = 0 : i64, tpu.core_type = #tpu.core_type<tc>, window_params = [{pipeline_mode = #tpu.pipeline_mode<synchronous>, transform_indices = @transform_0, window_bounds = array<i64: 64, 32>}, {pipeline_mode = #tpu.pipeline_mode<synchronous>, transform_indices = @transform_1, window_bounds = array<i64: 64, 32>}, {pipeline_mode = #tpu.pipeline_mode<synchronous>, transform_indices = @transform_2, window_bounds = array<i64: 64, 32>}, {pipeline_mode = #tpu.pipeline_mode<synchronous>, transform_indices = @transform_3, window_bounds = array<i64: 32, 32>}, {pipeline_mode = #tpu.pipeline_mode<synchronous>, transform_indices = @transform_4, window_bounds = array<i64: 32, 32>}, {pipeline_mode = #tpu.pipeline_mode<synchronous>, transform_indices = @transform_5, window_bounds = array<i64: 1, 32>}, {pipeline_mode = #tpu.pipeline_mode<synchronous>, transform_indices = @transform_6, window_bounds = array<i64: 32, 32>}, {pipeline_mode = #tpu.pipeline_mode<synchronous>, transform_indices = @transform_7, window_bounds = array<i64: 1, 32>}, {pipeline_mode = #tpu.pipeline_mode<synchronous>, transform_indices = @transform_8, window_bounds = array<i64: 32, 32>}, {pipeline_mode = #tpu.pipeline_mode<synchronous>, transform_indices = @transform_9, window_bounds = array<i64: 1, 32>}, {pipeline_mode = #tpu.pipeline_mode<synchronous>, transform_indices = @transform_10, window_bounds = array<i64: 64, 32>}]} {
    %c0 = arith.constant 0 : index
    %c0_0 = arith.constant 0 : index
    %0 = vector.load %arg1[%c0, %c0_0] : memref<64x32xf32, #tpu.memory_space<vmem>>, vector<64x32xf32>
    %c0_1 = arith.constant 0 : index
    %c0_2 = arith.constant 0 : index
    %1 = vector.load %arg2[%c0_1, %c0_2] : memref<64x32xf32, #tpu.memory_space<vmem>>, vector<64x32xf32>
    %c0_3 = arith.constant 0 : index
    %c0_4 = arith.constant 0 : index
    %2 = vector.load %arg4[%c0_3, %c0_4] : memref<32x32xf32, #tpu.memory_space<vmem>>, vector<32x32xf32>
    %cst = arith.constant dense<0.000000e+00> : vector<64x32xf32>
    %3 = tpu.matmul %0, %2, %cst {dimension_numbers = #tpu.dot_dimension_numbers<[1], [0], [0], [1], [0, 0, 1, 1], [], []>} : vector<64x32xf32>, vector<32x32xf32>, vector<64x32xf32> -> vector<64x32xf32>
    %c0_5 = arith.constant 0 : index
    %c0_6 = arith.constant 0 : index
    %4 = vector.load %arg5[%c0_5, %c0_6] : memref<32x32xf32, #tpu.memory_space<vmem>>, vector<32x32xf32>
    %cst_7 = arith.constant dense<0.000000e+00> : vector<64x32xf32>
    %5 = tpu.matmul %1, %4, %cst_7 {dimension_numbers = #tpu.dot_dimension_numbers<[1], [0], [0], [1], [0, 0, 1, 1], [], []>} : vector<64x32xf32>, vector<32x32xf32>, vector<64x32xf32> -> vector<64x32xf32>
    %c0_8 = arith.constant 0 : index
    %c0_9 = arith.constant 0 : index
    %6 = vector.load %arg6[%c0_8, %c0_9] : memref<1x32xf32, #tpu.memory_space<vmem>>, vector<1x32xf32>
    %7 = vector.broadcast %6 : vector<1x32xf32> to vector<64x32xf32>
    %8 = arith.addf %5, %7 : vector<64x32xf32>
    %9 = arith.addf %3, %8 : vector<64x32xf32>
    %10 = arith.negf %9 : vector<64x32xf32>
    %11 = math.exp %10 : vector<64x32xf32>
    %cst_10 = arith.constant 1.000000e+00 : f32
    %12 = vector.broadcast %cst_10 : f32 to vector<64x32xf32>
    %13 = arith.addf %12, %11 : vector<64x32xf32>
    %14 = arith.divf %12, %13 : vector<64x32xf32>
    %15 = arith.mulf %14, %0 : vector<64x32xf32>
    %cst_11 = arith.constant 1.000000e+00 : f32
    %16 = vector.broadcast %cst_11 : f32 to vector<64x32xf32>
    %17 = arith.subf %16, %14 : vector<64x32xf32>
    %18 = arith.mulf %17, %1 : vector<64x32xf32>
    %19 = arith.addf %15, %18 : vector<64x32xf32>
    %c0_12 = arith.constant 0 : index
    %c0_13 = arith.constant 0 : index
    %20 = vector.load %arg7[%c0_12, %c0_13] : memref<32x32xf32, #tpu.memory_space<vmem>>, vector<32x32xf32>
    %cst_14 = arith.constant dense<0.000000e+00> : vector<64x32xf32>
    %21 = tpu.matmul %19, %20, %cst_14 {dimension_numbers = #tpu.dot_dimension_numbers<[1], [0], [0], [1], [0, 0, 1, 1], [], []>} : vector<64x32xf32>, vector<32x32xf32>, vector<64x32xf32> -> vector<64x32xf32>
    %c0_15 = arith.constant 0 : index
    %c0_16 = arith.constant 0 : index
    %22 = vector.load %arg8[%c0_15, %c0_16] : memref<1x32xf32, #tpu.memory_space<vmem>>, vector<1x32xf32>
    %23 = vector.broadcast %22 : vector<1x32xf32> to vector<64x32xf32>
    %24 = arith.addf %21, %23 : vector<64x32xf32>
    %cst_17 = arith.constant 0.000000e+00 : f32
    %25 = vector.broadcast %cst_17 : f32 to vector<64x32xf32>
    %26 = arith.maximumf %24, %25 : vector<64x32xf32>
    %c0_18 = arith.constant 0 : index
    %c0_19 = arith.constant 0 : index
    %27 = vector.load %arg9[%c0_18, %c0_19] : memref<32x32xf32, #tpu.memory_space<vmem>>, vector<32x32xf32>
    %cst_20 = arith.constant dense<0.000000e+00> : vector<64x32xf32>
    %28 = tpu.matmul %26, %27, %cst_20 {dimension_numbers = #tpu.dot_dimension_numbers<[1], [0], [0], [1], [0, 0, 1, 1], [], []>} : vector<64x32xf32>, vector<32x32xf32>, vector<64x32xf32> -> vector<64x32xf32>
    %c0_21 = arith.constant 0 : index
    %c0_22 = arith.constant 0 : index
    %29 = vector.load %arg10[%c0_21, %c0_22] : memref<1x32xf32, #tpu.memory_space<vmem>>, vector<1x32xf32>
    %30 = vector.broadcast %29 : vector<1x32xf32> to vector<64x32xf32>
    %31 = arith.addf %28, %30 : vector<64x32xf32>
    %c0_23 = arith.constant 0 : index
    %c0_24 = arith.constant 0 : index
    %32 = vector.load %arg3[%c0_23, %c0_24] : memref<64x32xf32, #tpu.memory_space<vmem>>, vector<64x32xf32>
    %33 = arith.addf %32, %31 : vector<64x32xf32>
    %c0_25 = arith.constant 0 : index
    %c0_26 = arith.constant 0 : index
    %34 = vector.load %arg11[%c0_25, %c0_26] : memref<64x32xf32, #tpu.memory_space<vmem>>, vector<64x32xf32>
    tpu.vector_store %arg11[%c0_25, %c0_26], %33 {strides = array<i32>} : memref<64x32xf32, #tpu.memory_space<vmem>>, vector<64x32xf32>,
    return
  }
  func.func @transform_0(%arg0: i32) -> (i32, i32) {
    %c0_i32 = arith.constant 0 : i32
    %c0_i32_0 = arith.constant 0 : i32
    %c0_i32_1 = arith.constant 0 : i32
    return %c0_i32, %c0_i32_0 : i32, i32
  }
  func.func @transform_1(%arg0: i32) -> (i32, i32) {
    %c0_i32 = arith.constant 0 : i32
    %c0_i32_0 = arith.constant 0 : i32
    %c0_i32_1 = arith.constant 0 : i32
    return %c0_i32, %c0_i32_0 : i32, i32
  }
  func.func @transform_2(%arg0: i32) -> (i32, i32) {
    %c0_i32 = arith.constant 0 : i32
    %c0_i32_0 = arith.constant 0 : i32
    %c0_i32_1 = arith.constant 0 : i32
    return %c0_i32, %c0_i32_0 : i32, i32
  }
  func.func @transform_3(%arg0: i32) -> (i32, i32) {
    %c0_i32 = arith.constant 0 : i32
    %c0_i32_0 = arith.constant 0 : i32
    %c0_i32_1 = arith.constant 0 : i32
    return %c0_i32, %c0_i32_0 : i32, i32
  }
  func.func @transform_4(%arg0: i32) -> (i32, i32) {
    %c0_i32 = arith.constant 0 : i32
    %c0_i32_0 = arith.constant 0 : i32
    %c0_i32_1 = arith.constant 0 : i32
    return %c0_i32, %c0_i32_0 : i32, i32
  }
  func.func @transform_5(%arg0: i32) -> (i32, i32) {
    %c0_i32 = arith.constant 0 : i32
    %c0_i32_0 = arith.constant 0 : i32
    %c0_i32_1 = arith.constant 0 : i32
    return %c0_i32, %c0_i32_0 : i32, i32
  }
  func.func @transform_6(%arg0: i32) -> (i32, i32) {
    %c0_i32 = arith.constant 0 : i32
    %c0_i32_0 = arith.constant 0 : i32
    %c0_i32_1 = arith.constant 0 : i32
    return %c0_i32, %c0_i32_0 : i32, i32
  }
  func.func @transform_7(%arg0: i32) -> (i32, i32) {
    %c0_i32 = arith.constant 0 : i32
    %c0_i32_0 = arith.constant 0 : i32
    %c0_i32_1 = arith.constant 0 : i32
    return %c0_i32, %c0_i32_0 : i32, i32
  }
  func.func @transform_8(%arg0: i32) -> (i32, i32) {
    %c0_i32 = arith.constant 0 : i32
    %c0_i32_0 = arith.constant 0 : i32
    %c0_i32_1 = arith.constant 0 : i32
    return %c0_i32, %c0_i32_0 : i32, i32
  }
  func.func @transform_9(%arg0: i32) -> (i32, i32) {
    %c0_i32 = arith.constant 0 : i32
    %c0_i32_0 = arith.constant 0 : i32
    %c0_i32_1 = arith.constant 0 : i32
    return %c0_i32, %c0_i32_0 : i32, i32
  }
  func.func @transform_10(%arg0: i32) -> (i32, i32) {
    %c0_i32 = arith.constant 0 : i32
    %c0_i32_0 = arith.constant 0 : i32
    %c0_i32_1 = arith.constant 0 : i32
    return %c0_i32, %c0_i32_0 : i32, i32
  }
}

module attributes {stable_mosaic.version = 11 : i64} {
  func.func @_transform_attn_kernel(%arg0: i32, %arg1: memref<1x4x32xf32, #tpu.memory_space<vmem>>, %arg2: memref<1x4x16xf32, #tpu.memory_space<vmem>>, %arg3: memref<1x4x16xf32, #tpu.memory_space<vmem>>, %arg4: memref<16x32xf32, #tpu.memory_space<vmem>>, %arg5: memref<1x32xf32, #tpu.memory_space<vmem>>, %arg6: memref<16x32xf32, #tpu.memory_space<vmem>>, %arg7: memref<1x32xf32, #tpu.memory_space<vmem>>, %arg8: memref<32x32xf32, #tpu.memory_space<vmem>>, %arg9: memref<1x32xf32, #tpu.memory_space<vmem>>, %arg10: memref<32x32xf32, #tpu.memory_space<vmem>>, %arg11: memref<1x32xf32, #tpu.memory_space<vmem>>, %arg12: memref<32x32xf32, #tpu.memory_space<vmem>>, %arg13: memref<1x32xf32, #tpu.memory_space<vmem>>, %arg14: memref<1x4x32xf32, #tpu.memory_space<vmem>>) attributes {dimension_semantics = [#tpu.dimension_semantics<parallel>], iteration_bounds = array<i64: 16>, scalar_prefetch = 0 : i64, scratch_operands = 0 : i64, tpu.core_type = #tpu.core_type<tc>, window_params = [{transform_indices = @transform_0, window_bounds = array<i64: 1, 4, 32>}, {transform_indices = @transform_1, window_bounds = array<i64: 1, 4, 16>}, {transform_indices = @transform_2, window_bounds = array<i64: 1, 4, 16>}, {pipeline_mode = #tpu.pipeline_mode<synchronous>, transform_indices = @transform_3, window_bounds = array<i64: 16, 32>}, {pipeline_mode = #tpu.pipeline_mode<synchronous>, transform_indices = @transform_4, window_bounds = array<i64: 1, 32>}, {pipeline_mode = #tpu.pipeline_mode<synchronous>, transform_indices = @transform_5, window_bounds = array<i64: 16, 32>}, {pipeline_mode = #tpu.pipeline_mode<synchronous>, transform_indices = @transform_6, window_bounds = array<i64: 1, 32>}, {pipeline_mode = #tpu.pipeline_mode<synchronous>, transform_indices = @transform_7, window_bounds = array<i64: 32, 32>}, {pipeline_mode = #tpu.pipeline_mode<synchronous>, transform_indices = @transform_8, window_bounds = array<i64: 1, 32>}, {pipeline_mode = #tpu.pipeline_mode<synchronous>, transform_indices = @transform_9, window_bounds = array<i64: 32, 32>}, {pipeline_mode = #tpu.pipeline_mode<synchronous>, transform_indices = @transform_10, window_bounds = array<i64: 1, 32>}, {pipeline_mode = #tpu.pipeline_mode<synchronous>, transform_indices = @transform_11, window_bounds = array<i64: 32, 32>}, {pipeline_mode = #tpu.pipeline_mode<synchronous>, transform_indices = @transform_12, window_bounds = array<i64: 1, 32>}, {transform_indices = @transform_13, window_bounds = array<i64: 1, 4, 32>}]} {
    %c0 = arith.constant 0 : index
    %c0_0 = arith.constant 0 : index
    %c0_1 = arith.constant 0 : index
    %0 = vector.load %arg1[%c0, %c0_0, %c0_1] : memref<1x4x32xf32, #tpu.memory_space<vmem>>, vector<1x4x32xf32>
    %1 = vector.shape_cast %0 : vector<1x4x32xf32> to vector<4x32xf32>
    %c0_2 = arith.constant 0 : index
    %c0_3 = arith.constant 0 : index
    %c0_4 = arith.constant 0 : index
    %2 = vector.load %arg2[%c0_2, %c0_3, %c0_4] : memref<1x4x16xf32, #tpu.memory_space<vmem>>, vector<1x4x16xf32>
    %3 = vector.shape_cast %2 : vector<1x4x16xf32> to vector<4x16xf32>
    %c0_5 = arith.constant 0 : index
    %c0_6 = arith.constant 0 : index
    %c0_7 = arith.constant 0 : index
    %4 = vector.load %arg3[%c0_5, %c0_6, %c0_7] : memref<1x4x16xf32, #tpu.memory_space<vmem>>, vector<1x4x16xf32>
    %5 = vector.shape_cast %4 : vector<1x4x16xf32> to vector<4x16xf32>
    %c0_8 = arith.constant 0 : index
    %c0_9 = arith.constant 0 : index
    %6 = vector.load %arg4[%c0_8, %c0_9] : memref<16x32xf32, #tpu.memory_space<vmem>>, vector<16x32xf32>
    %cst = arith.constant dense<0.000000e+00> : vector<4x32xf32>
    %7 = tpu.matmul %5, %6, %cst {dimension_numbers = #tpu.dot_dimension_numbers<[1], [0], [0], [1], [0, 0, 1, 1], [], []>} : vector<4x16xf32>, vector<16x32xf32>, vector<4x32xf32> -> vector<4x32xf32>
    %c0_10 = arith.constant 0 : index
    %c0_11 = arith.constant 0 : index
    %8 = vector.load %arg5[%c0_10, %c0_11] : memref<1x32xf32, #tpu.memory_space<vmem>>, vector<1x32xf32>
    %9 = vector.broadcast %8 : vector<1x32xf32> to vector<4x32xf32>
    %10 = arith.addf %7, %9 : vector<4x32xf32>
    %cst_12 = arith.constant 0.000000e+00 : f32
    %11 = vector.broadcast %cst_12 : f32 to vector<4x32xf32>
    %12 = arith.maximumf %10, %11 : vector<4x32xf32>
    %c0_13 = arith.constant 0 : index
    %c0_14 = arith.constant 0 : index
    %13 = vector.load %arg6[%c0_13, %c0_14] : memref<16x32xf32, #tpu.memory_space<vmem>>, vector<16x32xf32>
    %cst_15 = arith.constant dense<0.000000e+00> : vector<4x32xf32>
    %14 = tpu.matmul %3, %13, %cst_15 {dimension_numbers = #tpu.dot_dimension_numbers<[1], [0], [0], [1], [0, 0, 1, 1], [], []>} : vector<4x16xf32>, vector<16x32xf32>, vector<4x32xf32> -> vector<4x32xf32>
    %c0_16 = arith.constant 0 : index
    %c0_17 = arith.constant 0 : index
    %15 = vector.load %arg7[%c0_16, %c0_17] : memref<1x32xf32, #tpu.memory_space<vmem>>, vector<1x32xf32>
    %16 = vector.broadcast %15 : vector<1x32xf32> to vector<4x32xf32>
    %17 = arith.addf %14, %16 : vector<4x32xf32>
    %cst_18 = arith.constant 0.000000e+00 : f32
    %18 = vector.broadcast %cst_18 : f32 to vector<4x32xf32>
    %19 = arith.maximumf %17, %18 : vector<4x32xf32>
    %c0_19 = arith.constant 0 : index
    %c0_20 = arith.constant 0 : index
    %20 = vector.load %arg8[%c0_19, %c0_20] : memref<32x32xf32, #tpu.memory_space<vmem>>, vector<32x32xf32>
    %cst_21 = arith.constant dense<0.000000e+00> : vector<4x32xf32>
    %21 = tpu.matmul %1, %20, %cst_21 {dimension_numbers = #tpu.dot_dimension_numbers<[1], [0], [0], [1], [0, 0, 1, 1], [], []>} : vector<4x32xf32>, vector<32x32xf32>, vector<4x32xf32> -> vector<4x32xf32>
    %c0_22 = arith.constant 0 : index
    %c0_23 = arith.constant 0 : index
    %22 = vector.load %arg9[%c0_22, %c0_23] : memref<1x32xf32, #tpu.memory_space<vmem>>, vector<1x32xf32>
    %23 = vector.broadcast %22 : vector<1x32xf32> to vector<4x32xf32>
    %24 = arith.addf %21, %23 : vector<4x32xf32>
    %cst_24 = arith.constant 0.000000e+00 : f32
    %25 = vector.broadcast %cst_24 : f32 to vector<4x32xf32>
    %26 = arith.maximumf %24, %25 : vector<4x32xf32>
    %c0_25 = arith.constant 0 : index
    %c0_26 = arith.constant 0 : index
    %27 = vector.load %arg10[%c0_25, %c0_26] : memref<32x32xf32, #tpu.memory_space<vmem>>, vector<32x32xf32>
    %cst_27 = arith.constant 0.000000e+00 : f32
    %28 = vector.broadcast %cst_27 : f32 to vector<4x32xf32>
    %29 = vector.extract_strided_slice %12 {offsets = [0, 0], sizes = [4, 8], strides = [1, 1]} : vector<4x32xf32> to vector<4x8xf32>
    %30 = vector.extract_strided_slice %19 {offsets = [0, 0], sizes = [4, 8], strides = [1, 1]} : vector<4x32xf32> to vector<4x8xf32>
    %31 = vector.extract_strided_slice %26 {offsets = [0, 0], sizes = [4, 8], strides = [1, 1]} : vector<4x32xf32> to vector<4x8xf32>
    "tpu.trace_start"() <{level = 10 : i32, message = "td,sd->ts"}> : () -> ()
    %cst_28 = arith.constant dense<0.000000e+00> : vector<4x4xf32>
    %32 = tpu.matmul %29, %30, %cst_28 {dimension_numbers = #tpu.dot_dimension_numbers<[1], [1], [0], [0], [0, 0, 1, 0], [], []>} : vector<4x8xf32>, vector<4x8xf32>, vector<4x4xf32> -> vector<4x4xf32>
    "tpu.trace_stop"() : () -> ()
    %cst_29 = arith.constant 0.353553385 : f32
    %33 = vector.broadcast %cst_29 : f32 to vector<4x4xf32>
    %34 = arith.mulf %32, %33 : vector<4x4xf32>
    %cst_30 = arith.constant dense<0xFF800000> : vector<4xf32>
    %35 = vector.multi_reduction <maximumf>, %34, %cst_30 [1] : vector<4x4xf32> to vector<4xf32>
    %36 = vector.shape_cast %35 : vector<4xf32> to vector<4x1xf32>
    %37 = vector.broadcast %36 : vector<4x1xf32> to vector<4x4xf32>
    %38 = arith.subf %34, %37 : vector<4x4xf32>
    %39 = math.exp %38 : vector<4x4xf32>
    %cst_31 = arith.constant dense<0.000000e+00> : vector<4xf32>
    %40 = vector.multi_reduction <add>, %39, %cst_31 [1] : vector<4x4xf32> to vector<4xf32>
    %41 = vector.shape_cast %40 : vector<4xf32> to vector<4x1xf32>
    %42 = vector.broadcast %41 : vector<4x1xf32> to vector<4x4xf32>
    %43 = arith.divf %39, %42 : vector<4x4xf32>
    %cst_32 = arith.constant dense<0.000000e+00> : vector<4x8xf32>
    %44 = tpu.matmul %43, %31, %cst_32 {dimension_numbers = #tpu.dot_dimension_numbers<[1], [0], [0], [1], [0, 0, 1, 1], [], []>} : vector<4x4xf32>, vector<4x8xf32>, vector<4x8xf32> -> vector<4x8xf32>
    %45 = vector.extract_strided_slice %27 {offsets = [0, 0], sizes = [8, 32], strides = [1, 1]} : vector<32x32xf32> to vector<8x32xf32>
    %cst_33 = arith.constant dense<0.000000e+00> : vector<4x32xf32>
    %46 = tpu.matmul %44, %45, %cst_33 {dimension_numbers = #tpu.dot_dimension_numbers<[1], [0], [0], [1], [0, 0, 1, 1], [], []>} : vector<4x8xf32>, vector<8x32xf32>, vector<4x32xf32> -> vector<4x32xf32>
    %47 = arith.addf %28, %46 : vector<4x32xf32>
    %48 = vector.extract_strided_slice %12 {offsets = [0, 8], sizes = [4, 8], strides = [1, 1]} : vector<4x32xf32> to vector<4x8xf32>
    %49 = vector.extract_strided_slice %19 {offsets = [0, 8], sizes = [4, 8], strides = [1, 1]} : vector<4x32xf32> to vector<4x8xf32>
    %50 = vector.extract_strided_slice %26 {offsets = [0, 8], sizes = [4, 8], strides = [1, 1]} : vector<4x32xf32> to vector<4x8xf32>
    "tpu.trace_start"() <{level = 10 : i32, message = "td,sd->ts"}> : () -> ()
    %cst_34 = arith.constant dense<0.000000e+00> : vector<4x4xf32>
    %51 = tpu.matmul %48, %49, %cst_34 {dimension_numbers = #tpu.dot_dimension_numbers<[1], [1], [0], [0], [0, 0, 1, 0], [], []>} : vector<4x8xf32>, vector<4x8xf32>, vector<4x4xf32> -> vector<4x4xf32>
    "tpu.trace_stop"() : () -> ()
    %cst_35 = arith.constant 0.353553385 : f32
    %52 = vector.broadcast %cst_35 : f32 to vector<4x4xf32>
    %53 = arith.mulf %51, %52 : vector<4x4xf32>
    %cst_36 = arith.constant dense<0xFF800000> : vector<4xf32>
    %54 = vector.multi_reduction <maximumf>, %53, %cst_36 [1] : vector<4x4xf32> to vector<4xf32>
    %55 = vector.shape_cast %54 : vector<4xf32> to vector<4x1xf32>
    %56 = vector.broadcast %55 : vector<4x1xf32> to vector<4x4xf32>
    %57 = arith.subf %53, %56 : vector<4x4xf32>
    %58 = math.exp %57 : vector<4x4xf32>
    %cst_37 = arith.constant dense<0.000000e+00> : vector<4xf32>
    %59 = vector.multi_reduction <add>, %58, %cst_37 [1] : vector<4x4xf32> to vector<4xf32>
    %60 = vector.shape_cast %59 : vector<4xf32> to vector<4x1xf32>
    %61 = vector.broadcast %60 : vector<4x1xf32> to vector<4x4xf32>
    %62 = arith.divf %58, %61 : vector<4x4xf32>
    %cst_38 = arith.constant dense<0.000000e+00> : vector<4x8xf32>
    %63 = tpu.matmul %62, %50, %cst_38 {dimension_numbers = #tpu.dot_dimension_numbers<[1], [0], [0], [1], [0, 0, 1, 1], [], []>} : vector<4x4xf32>, vector<4x8xf32>, vector<4x8xf32> -> vector<4x8xf32>
    %64 = vector.extract_strided_slice %27 {offsets = [8, 0], sizes = [8, 32], strides = [1, 1]} : vector<32x32xf32> to vector<8x32xf32>
    %cst_39 = arith.constant dense<0.000000e+00> : vector<4x32xf32>
    %65 = tpu.matmul %63, %64, %cst_39 {dimension_numbers = #tpu.dot_dimension_numbers<[1], [0], [0], [1], [0, 0, 1, 1], [], []>} : vector<4x8xf32>, vector<8x32xf32>, vector<4x32xf32> -> vector<4x32xf32>
    %66 = arith.addf %47, %65 : vector<4x32xf32>
    %67 = vector.extract_strided_slice %12 {offsets = [0, 16], sizes = [4, 8], strides = [1, 1]} : vector<4x32xf32> to vector<4x8xf32>
    %68 = vector.extract_strided_slice %19 {offsets = [0, 16], sizes = [4, 8], strides = [1, 1]} : vector<4x32xf32> to vector<4x8xf32>
    %69 = vector.extract_strided_slice %26 {offsets = [0, 16], sizes = [4, 8], strides = [1, 1]} : vector<4x32xf32> to vector<4x8xf32>
    "tpu.trace_start"() <{level = 10 : i32, message = "td,sd->ts"}> : () -> ()
    %cst_40 = arith.constant dense<0.000000e+00> : vector<4x4xf32>
    %70 = tpu.matmul %67, %68, %cst_40 {dimension_numbers = #tpu.dot_dimension_numbers<[1], [1], [0], [0], [0, 0, 1, 0], [], []>} : vector<4x8xf32>, vector<4x8xf32>, vector<4x4xf32> -> vector<4x4xf32>
    "tpu.trace_stop"() : () -> ()
    %cst_41 = arith.constant 0.353553385 : f32
    %71 = vector.broadcast %cst_41 : f32 to vector<4x4xf32>
    %72 = arith.mulf %70, %71 : vector<4x4xf32>
    %cst_42 = arith.constant dense<0xFF800000> : vector<4xf32>
    %73 = vector.multi_reduction <maximumf>, %72, %cst_42 [1] : vector<4x4xf32> to vector<4xf32>
    %74 = vector.shape_cast %73 : vector<4xf32> to vector<4x1xf32>
    %75 = vector.broadcast %74 : vector<4x1xf32> to vector<4x4xf32>
    %76 = arith.subf %72, %75 : vector<4x4xf32>
    %77 = math.exp %76 : vector<4x4xf32>
    %cst_43 = arith.constant dense<0.000000e+00> : vector<4xf32>
    %78 = vector.multi_reduction <add>, %77, %cst_43 [1] : vector<4x4xf32> to vector<4xf32>
    %79 = vector.shape_cast %78 : vector<4xf32> to vector<4x1xf32>
    %80 = vector.broadcast %79 : vector<4x1xf32> to vector<4x4xf32>
    %81 = arith.divf %77, %80 : vector<4x4xf32>
    %cst_44 = arith.constant dense<0.000000e+00> : vector<4x8xf32>
    %82 = tpu.matmul %81, %69, %cst_44 {dimension_numbers = #tpu.dot_dimension_numbers<[1], [0], [0], [1], [0, 0, 1, 1], [], []>} : vector<4x4xf32>, vector<4x8xf32>, vector<4x8xf32> -> vector<4x8xf32>
    %83 = vector.extract_strided_slice %27 {offsets = [16, 0], sizes = [8, 32], strides = [1, 1]} : vector<32x32xf32> to vector<8x32xf32>
    %cst_45 = arith.constant dense<0.000000e+00> : vector<4x32xf32>
    %84 = tpu.matmul %82, %83, %cst_45 {dimension_numbers = #tpu.dot_dimension_numbers<[1], [0], [0], [1], [0, 0, 1, 1], [], []>} : vector<4x8xf32>, vector<8x32xf32>, vector<4x32xf32> -> vector<4x32xf32>
    %85 = arith.addf %66, %84 : vector<4x32xf32>
    %86 = vector.extract_strided_slice %12 {offsets = [0, 24], sizes = [4, 8], strides = [1, 1]} : vector<4x32xf32> to vector<4x8xf32>
    %87 = vector.extract_strided_slice %19 {offsets = [0, 24], sizes = [4, 8], strides = [1, 1]} : vector<4x32xf32> to vector<4x8xf32>
    %88 = vector.extract_strided_slice %26 {offsets = [0, 24], sizes = [4, 8], strides = [1, 1]} : vector<4x32xf32> to vector<4x8xf32>
    "tpu.trace_start"() <{level = 10 : i32, message = "td,sd->ts"}> : () -> ()
    %cst_46 = arith.constant dense<0.000000e+00> : vector<4x4xf32>
    %89 = tpu.matmul %86, %87, %cst_46 {dimension_numbers = #tpu.dot_dimension_numbers<[1], [1], [0], [0], [0, 0, 1, 0], [], []>} : vector<4x8xf32>, vector<4x8xf32>, vector<4x4xf32> -> vector<4x4xf32>
    "tpu.trace_stop"() : () -> ()
    %cst_47 = arith.constant 0.353553385 : f32
    %90 = vector.broadcast %cst_47 : f32 to vector<4x4xf32>
    %91 = arith.mulf %89, %90 : vector<4x4xf32>
    %cst_48 = arith.constant dense<0xFF800000> : vector<4xf32>
    %92 = vector.multi_reduction <maximumf>, %91, %cst_48 [1] : vector<4x4xf32> to vector<4xf32>
    %93 = vector.shape_cast %92 : vector<4xf32> to vector<4x1xf32>
    %94 = vector.broadcast %93 : vector<4x1xf32> to vector<4x4xf32>
    %95 = arith.subf %91, %94 : vector<4x4xf32>
    %96 = math.exp %95 : vector<4x4xf32>
    %cst_49 = arith.constant dense<0.000000e+00> : vector<4xf32>
    %97 = vector.multi_reduction <add>, %96, %cst_49 [1] : vector<4x4xf32> to vector<4xf32>
    %98 = vector.shape_cast %97 : vector<4xf32> to vector<4x1xf32>
    %99 = vector.broadcast %98 : vector<4x1xf32> to vector<4x4xf32>
    %100 = arith.divf %96, %99 : vector<4x4xf32>
    %cst_50 = arith.constant dense<0.000000e+00> : vector<4x8xf32>
    %101 = tpu.matmul %100, %88, %cst_50 {dimension_numbers = #tpu.dot_dimension_numbers<[1], [0], [0], [1], [0, 0, 1, 1], [], []>} : vector<4x4xf32>, vector<4x8xf32>, vector<4x8xf32> -> vector<4x8xf32>
    %102 = vector.extract_strided_slice %27 {offsets = [24, 0], sizes = [8, 32], strides = [1, 1]} : vector<32x32xf32> to vector<8x32xf32>
    %cst_51 = arith.constant dense<0.000000e+00> : vector<4x32xf32>
    %103 = tpu.matmul %101, %102, %cst_51 {dimension_numbers = #tpu.dot_dimension_numbers<[1], [0], [0], [1], [0, 0, 1, 1], [], []>} : vector<4x8xf32>, vector<8x32xf32>, vector<4x32xf32> -> vector<4x32xf32>
    %104 = arith.addf %85, %103 : vector<4x32xf32>
    %c0_52 = arith.constant 0 : index
    %c0_53 = arith.constant 0 : index
    %105 = vector.load %arg11[%c0_52, %c0_53] : memref<1x32xf32, #tpu.memory_space<vmem>>, vector<1x32xf32>
    %106 = vector.broadcast %105 : vector<1x32xf32> to vector<4x32xf32>
    %107 = arith.addf %104, %106 : vector<4x32xf32>
    %cst_54 = arith.constant 0.000000e+00 : f32
    %108 = vector.broadcast %cst_54 : f32 to vector<4x32xf32>
    %109 = arith.maximumf %107, %108 : vector<4x32xf32>
    %c0_55 = arith.constant 0 : index
    %c0_56 = arith.constant 0 : index
    %110 = vector.load %arg12[%c0_55, %c0_56] : memref<32x32xf32, #tpu.memory_space<vmem>>, vector<32x32xf32>
    %cst_57 = arith.constant dense<0.000000e+00> : vector<4x32xf32>
    %111 = tpu.matmul %109, %110, %cst_57 {dimension_numbers = #tpu.dot_dimension_numbers<[1], [0], [0], [1], [0, 0, 1, 1], [], []>} : vector<4x32xf32>, vector<32x32xf32>, vector<4x32xf32> -> vector<4x32xf32>
    %c0_58 = arith.constant 0 : index
    %c0_59 = arith.constant 0 : index
    %112 = vector.load %arg13[%c0_58, %c0_59] : memref<1x32xf32, #tpu.memory_space<vmem>>, vector<1x32xf32>
    %113 = vector.broadcast %112 : vector<1x32xf32> to vector<4x32xf32>
    %114 = arith.addf %111, %113 : vector<4x32xf32>
    %c0_60 = arith.constant 0 : index
    %c0_61 = arith.constant 0 : index
    %c0_62 = arith.constant 0 : index
    %115 = vector.load %arg14[%c0_60, %c0_61, %c0_62] : memref<1x4x32xf32, #tpu.memory_space<vmem>>, vector<1x4x32xf32>
    %116 = vector.shape_cast %115 : vector<1x4x32xf32> to vector<4x32xf32>
    %117 = vector.shape_cast %114 : vector<4x32xf32> to vector<1x4x32xf32>
    tpu.vector_store %arg14[%c0_60, %c0_61, %c0_62], %117 {strides = array<i32>} : memref<1x4x32xf32, #tpu.memory_space<vmem>>, vector<1x4x32xf32>,
    return
  }
  func.func @transform_0(%arg0: i32) -> (i32, i32, i32) {
    %c0_i32 = arith.constant 0 : i32
    %c0_i32_0 = arith.constant 0 : i32
    %c0_i32_1 = arith.constant 0 : i32
    return %arg0, %c0_i32, %c0_i32_0 : i32, i32, i32
  }
  func.func @transform_1(%arg0: i32) -> (i32, i32, i32) {
    %c0_i32 = arith.constant 0 : i32
    %c0_i32_0 = arith.constant 0 : i32
    %c0_i32_1 = arith.constant 0 : i32
    return %arg0, %c0_i32, %c0_i32_0 : i32, i32, i32
  }
  func.func @transform_2(%arg0: i32) -> (i32, i32, i32) {
    %c0_i32 = arith.constant 0 : i32
    %c0_i32_0 = arith.constant 0 : i32
    %c0_i32_1 = arith.constant 0 : i32
    return %arg0, %c0_i32, %c0_i32_0 : i32, i32, i32
  }
  func.func @transform_3(%arg0: i32) -> (i32, i32) {
    %c0_i32 = arith.constant 0 : i32
    %c0_i32_0 = arith.constant 0 : i32
    %c0_i32_1 = arith.constant 0 : i32
    return %c0_i32, %c0_i32_0 : i32, i32
  }
  func.func @transform_4(%arg0: i32) -> (i32, i32) {
    %c0_i32 = arith.constant 0 : i32
    %c0_i32_0 = arith.constant 0 : i32
    %c0_i32_1 = arith.constant 0 : i32
    return %c0_i32, %c0_i32_0 : i32, i32
  }
  func.func @transform_5(%arg0: i32) -> (i32, i32) {
    %c0_i32 = arith.constant 0 : i32
    %c0_i32_0 = arith.constant 0 : i32
    %c0_i32_1 = arith.constant 0 : i32
    return %c0_i32, %c0_i32_0 : i32, i32
  }
  func.func @transform_6(%arg0: i32) -> (i32, i32) {
    %c0_i32 = arith.constant 0 : i32
    %c0_i32_0 = arith.constant 0 : i32
    %c0_i32_1 = arith.constant 0 : i32
    return %c0_i32, %c0_i32_0 : i32, i32
  }
  func.func @transform_7(%arg0: i32) -> (i32, i32) {
    %c0_i32 = arith.constant 0 : i32
    %c0_i32_0 = arith.constant 0 : i32
    %c0_i32_1 = arith.constant 0 : i32
    return %c0_i32, %c0_i32_0 : i32, i32
  }
  func.func @transform_8(%arg0: i32) -> (i32, i32) {
    %c0_i32 = arith.constant 0 : i32
    %c0_i32_0 = arith.constant 0 : i32
    %c0_i32_1 = arith.constant 0 : i32
    return %c0_i32, %c0_i32_0 : i32, i32
  }
  func.func @transform_9(%arg0: i32) -> (i32, i32) {
    %c0_i32 = arith.constant 0 : i32
    %c0_i32_0 = arith.constant 0 : i32
    %c0_i32_1 = arith.constant 0 : i32
    return %c0_i32, %c0_i32_0 : i32, i32
  }
  func.func @transform_10(%arg0: i32) -> (i32, i32) {
    %c0_i32 = arith.constant 0 : i32
    %c0_i32_0 = arith.constant 0 : i32
    %c0_i32_1 = arith.constant 0 : i32
    return %c0_i32, %c0_i32_0 : i32, i32
  }
  func.func @transform_11(%arg0: i32) -> (i32, i32) {
    %c0_i32 = arith.constant 0 : i32
    %c0_i32_0 = arith.constant 0 : i32
    %c0_i32_1 = arith.constant 0 : i32
    return %c0_i32, %c0_i32_0 : i32, i32
  }
  func.func @transform_12(%arg0: i32) -> (i32, i32) {
    %c0_i32 = arith.constant 0 : i32
    %c0_i32_0 = arith.constant 0 : i32
    %c0_i32_1 = arith.constant 0 : i32
    return %c0_i32, %c0_i32_0 : i32, i32
  }
  func.func @transform_13(%arg0: i32) -> (i32, i32, i32) {
    %c0_i32 = arith.constant 0 : i32
    %c0_i32_0 = arith.constant 0 : i32
    %c0_i32_1 = arith.constant 0 : i32
    return %arg0, %c0_i32, %c0_i32_0 : i32, i32, i32
  }
}

module attributes {stable_mosaic.version = 11 : i64} {
  func.func @_fc_kernel(%arg0: i32, %arg1: memref<64x32xf32, #tpu.memory_space<vmem>>, %arg2: memref<32x32xf32, #tpu.memory_space<vmem>>, %arg3: memref<1x32xf32, #tpu.memory_space<vmem>>, %arg4: memref<32x1xf32, #tpu.memory_space<vmem>>, %arg5: memref<1x1xf32, #tpu.memory_space<vmem>>, %arg6: memref<64x1xf32, #tpu.memory_space<vmem>>) attributes {dimension_semantics = [#tpu.dimension_semantics<arbitrary>], iteration_bounds = array<i64: 1>, scalar_prefetch = 0 : i64, scratch_operands = 0 : i64, tpu.core_type = #tpu.core_type<tc>, window_params = [{pipeline_mode = #tpu.pipeline_mode<synchronous>, transform_indices = @transform_0, window_bounds = array<i64: 64, 32>}, {pipeline_mode = #tpu.pipeline_mode<synchronous>, transform_indices = @transform_1, window_bounds = array<i64: 32, 32>}, {pipeline_mode = #tpu.pipeline_mode<synchronous>, transform_indices = @transform_2, window_bounds = array<i64: 1, 32>}, {pipeline_mode = #tpu.pipeline_mode<synchronous>, transform_indices = @transform_3, window_bounds = array<i64: 32, 1>}, {pipeline_mode = #tpu.pipeline_mode<synchronous>, transform_indices = @transform_4, window_bounds = array<i64: 1, 1>}, {pipeline_mode = #tpu.pipeline_mode<synchronous>, transform_indices = @transform_5, window_bounds = array<i64: 64, 1>}]} {
    %c0 = arith.constant 0 : index
    %c0_0 = arith.constant 0 : index
    %0 = vector.load %arg1[%c0, %c0_0] : memref<64x32xf32, #tpu.memory_space<vmem>>, vector<64x32xf32>
    %c0_1 = arith.constant 0 : index
    %c0_2 = arith.constant 0 : index
    %1 = vector.load %arg2[%c0_1, %c0_2] : memref<32x32xf32, #tpu.memory_space<vmem>>, vector<32x32xf32>
    %c0_3 = arith.constant 0 : index
    %c0_4 = arith.constant 0 : index
    %2 = vector.load %arg3[%c0_3, %c0_4] : memref<1x32xf32, #tpu.memory_space<vmem>>, vector<1x32xf32>
    %cst = arith.constant dense<0.000000e+00> : vector<64x32xf32>
    %3 = tpu.matmul %0, %1, %cst {dimension_numbers = #tpu.dot_dimension_numbers<[1], [0], [0], [1], [0, 0, 1, 1], [], []>} : vector<64x32xf32>, vector<32x32xf32>, vector<64x32xf32> -> vector<64x32xf32>
    %4 = vector.broadcast %2 : vector<1x32xf32> to vector<64x32xf32>
    %5 = arith.addf %3, %4 : vector<64x32xf32>
    %cst_5 = arith.constant 0.000000e+00 : f32
    %6 = vector.broadcast %cst_5 : f32 to vector<64x32xf32>
    %7 = arith.maximumf %5, %6 : vector<64x32xf32>
    %c0_6 = arith.constant 0 : index
    %c0_7 = arith.constant 0 : index
    %8 = vector.load %arg4[%c0_6, %c0_7] : memref<32x1xf32, #tpu.memory_space<vmem>>, vector<32x1xf32>
    %c0_8 = arith.constant 0 : index
    %c0_9 = arith.constant 0 : index
    %9 = vector.load %arg5[%c0_8, %c0_9] : memref<1x1xf32, #tpu.memory_space<vmem>>, vector<1x1xf32>
    %cst_10 = arith.constant dense<0.000000e+00> : vector<64x1xf32>
    %10 = tpu.matmul %7, %8, %cst_10 {dimension_numbers = #tpu.dot_dimension_numbers<[1], [0], [0], [1], [0, 0, 1, 1], [], []>} : vector<64x32xf32>, vector<32x1xf32>, vector<64x1xf32> -> vector<64x1xf32>
    %11 = vector.broadcast %9 : vector<1x1xf32> to vector<64x1xf32>
    %12 = arith.addf %10, %11 : vector<64x1xf32>
    %c0_11 = arith.constant 0 : index
    %c0_12 = arith.constant 0 : index
    %13 = vector.load %arg6[%c0_11, %c0_12] : memref<64x1xf32, #tpu.memory_space<vmem>>, vector<64x1xf32>
    tpu.vector_store %arg6[%c0_11, %c0_12], %12 {strides = array<i32>} : memref<64x1xf32, #tpu.memory_space<vmem>>, vector<64x1xf32>,
    return
  }
  func.func @transform_0(%arg0: i32) -> (i32, i32) {
    %c0_i32 = arith.constant 0 : i32
    %c0_i32_0 = arith.constant 0 : i32
    %c0_i32_1 = arith.constant 0 : i32
    return %c0_i32, %c0_i32_0 : i32, i32
  }
  func.func @transform_1(%arg0: i32) -> (i32, i32) {
    %c0_i32 = arith.constant 0 : i32
    %c0_i32_0 = arith.constant 0 : i32
    %c0_i32_1 = arith.constant 0 : i32
    return %c0_i32, %c0_i32_0 : i32, i32
  }
  func.func @transform_2(%arg0: i32) -> (i32, i32) {
    %c0_i32 = arith.constant 0 : i32
    %c0_i32_0 = arith.constant 0 : i32
    %c0_i32_1 = arith.constant 0 : i32
    return %c0_i32, %c0_i32_0 : i32, i32
  }
  func.func @transform_3(%arg0: i32) -> (i32, i32) {
    %c0_i32 = arith.constant 0 : i32
    %c0_i32_0 = arith.constant 0 : i32
    %c0_i32_1 = arith.constant 0 : i32
    return %c0_i32, %c0_i32_0 : i32, i32
  }
  func.func @transform_4(%arg0: i32) -> (i32, i32) {
    %c0_i32 = arith.constant 0 : i32
    %c0_i32_0 = arith.constant 0 : i32
    %c0_i32_1 = arith.constant 0 : i32
    return %c0_i32, %c0_i32_0 : i32, i32
  }
  func.func @transform_5(%arg0: i32) -> (i32, i32) {
    %c0_i32 = arith.constant 0 : i32
    %c0_i32_0 = arith.constant 0 : i32
    %c0_i32_1 = arith.constant 0 : i32
    return %c0_i32, %c0_i32_0 : i32, i32
  }
}

</mosaic_0001>

<bundles_post_ra>
// kernel: gman_forward.11
= control target key start
LH: loop header
LB: loop body
LE: loop exit
PB: predicated region body
PF: predicated region fallthrough
CT: control target
= control target key end

     0   :  { %v477_v0 = vmov 0.0|0.0   ;;  %vm478_vm0 = vmmov 0   ;;  %v479_v3 = vmov 0.0   ;;  %vm223_vm1 = vcmask 1043456   ;;  %s602_s2 = inlined_call_operand.vmem [shape: f32[16,16], index: 2, kind: input, shape index: {}]   ;;  %s603_s6 = inlined_call_operand.vmem [shape: f32[12,16], index: 6, kind: input, shape index: {}]   ;;  %s604_s0 = inlined_call_operand.vmem [shape: f32[8,16], index: 0, kind: input, shape index: {}]   ;;  %s605_s1 = inlined_call_operand.vmem [shape: f32[16,12], index: 1, kind: input, shape index: {}]   ;;  %s606_s4 = inlined_call_operand.vmem [shape: f32[16,16], index: 4, kind: input, shape index: {}]   ;;  %s607_s8 = inlined_call_operand.vmem [shape: f32[16,16], index: 8, kind: input, shape index: {}]   ;;  %s608_s3 = inlined_call_operand.vmem [shape: f32[1,16], index: 3, kind: input, shape index: {}]   ;;  %s609_s7 = inlined_call_operand.vmem [shape: f32[1,16], index: 7, kind: input, shape index: {}]   ;;  %s610_s5 = inlined_call_operand.vmem [shape: f32[1,16], index: 5, kind: input, shape index: {}]   ;;  %s611_s10 = inlined_call_operand.vmem [shape: f32[8,16], index: 10, kind: output, shape index: {0}]   ;;  %s612_s9 = inlined_call_operand.vmem [shape: f32[1,16], index: 9, kind: input, shape index: {}]   ;;  %s613_s11 = inlined_call_operand.vmem [shape: f32[16,16], index: 11, kind: output, shape index: {1}]  }
   0x1   :  { %457 = vmatprep.subr.bf16.mxu0 %v477_v0  ;;  %v38_v1 = vld [vmem:[%s602_s2] sm:$0xff]  ;;  %v39_v2 = vld [vmem:[%s602_s2 + $0x8] sm:$0xff]  ;;  %433 = vmatprep.mubr.msk.f32.mxu0 %vm478_vm0, %v479_v3  ;;  %vm480_vm2 = vmmov 1   ;;  %vm47_vm4 = vcmask 130048   ;;  %vm216_vm5 = vcmask 97280  }
   0x2   :  { %v458_v4 = vpack.c.bf16 %v39_v2, %v38_v1  ;;  %v207_v5 = vld [vmem:[%s603_s6] sm:$0xff]  ;;  %v208_v6 = vld [vmem:[%s603_s6 + $0x8] sm:$0xf]  ;;  %vm464_vm3 = vmpackc.low %vm223_vm1, %vm480_vm2  ;;  %460 = vmatprep.subr.bf16.mxu1 %v477_v0  ;;  %440 = vmatprep.mubr.msk.f32.mxu1 %vm478_vm0, %v479_v3 }
   0x3   :  { %v463_v7 = vpack.c.bf16 %v208_v6, %v207_v5  ;;  %v37_v8 = vld [vmem:[%s604_s0] sm:$0xff]  ;;  %v206_v10 = vld [vmem:[%s605_s1 + $0x8] sm:$0xff] }
   0x4   :  { %459 = vmatpush3.bf16.msra.mxu0 %v458_v4  ;;  %v205_v9 = vld [vmem:[%s605_s1] sm:$0xff]  ;;  %v123_v12 = vld [vmem:[%s606_s4 + $0x8] sm:$0xff] }
   0x5   :  { %465 = vmatprep.subr.msk.bf16.mxu0 %vm464_vm3, %v463_v7  ;;  %v122_v11 = vld [vmem:[%s606_s4] sm:$0xff]  ;;  %v305_v15 = vld [vmem:[%s607_s8 + $0x8] sm:$0xff] }
   0x6   :  { %v461_v13 = vpack.c.bf16 %v123_v12, %v122_v11  ;;  %v304_v14 = vld [vmem:[%s607_s8] sm:$0xff] }
   0x7   :  { %434 = vmatmul.mubr.msk.f32.vlgmr.msra.gmra.mrb[0].mxu0 %vm47_vm4, %v37_v8  ;;  %v469_v16 = vpack.c.bf16 %v305_v15, %v304_v14  ;;  %v404_v17 = vld [vmem:[%s608_s3] ss:$0 sm:$0xff] }
   0x8   :  { %468 = vmatpush3.bf16.msk.msra.mxu0 %vm464_vm3, %v463_v7  ;;  %447 = vmatprep.mubr.msk.f32.mxu0 %vm216_vm5, %v205_v9  ;;  %v408_v21 = vld [vmem:[%s609_s7] ss:$0 sm:$0xff] }
   0x9   :  { %462 = vmatpush3.bf16.msra.mxu1 %v461_v13  ;;  %v406_v29 = vld [vmem:[%s610_s5] ss:$0 sm:$0xff] }
   0xa   :  { %470 = vmatprep.subr.bf16.mxu1 %v469_v16  ;;  %v412_v33 = vld [vmem:[%s612_s9] ss:$0 sm:$0xff] }
   0xb   :  { %448 = vmatmul.mubr.msk.f32.vlgmr.msra.gmra.mrb[2].mxu0 %vm216_vm5, %v206_v10 }
  0xda   :  { %v117_v18 = vpop.f32.mrb[0].mxu0 }
  0xdb   :  { %v118_v19 = vadd.f32 %v404_v17, %v117_v18  ;;  %v435_v20 = vpop.f32.mrb[1].mxu0 }
  0xdd   :  { %v121_v22 = vmax.f32 %v118_v19, 0.0 }
  0xde   :  { %v449_v23 = vpop.f32.mrb[2].mxu0 }
  0xdf   :  { %v299_v24 = vadd.f32 %v449_v23, %v408_v21  ;;  %441 = vmatmul.mubr.msk.f32.vlgmr.msra.gmra.mrb[0].mxu1 %vm47_vm4, %v121_v22  ;;  %v293_v25 = vpop.f32.mrb[3].mxu0 }
  0xe0   :  { %v294_v26 = vadd.f32 %v408_v21, %v293_v25  ;;  %472 = vmatpush3.bf16.msra.mxu1 %v469_v16 }
  0xe1   :  { %v303_v28 = vmax.f32 %v299_v24, 0.0 }
  0xe2   :  { %v302_v27 = vmax.f32 %v294_v26, 0.0 }
  0xe4   :  { %454 = vmatprep.mubr.msk.f32.mxu1 %vm47_vm4, %v302_v27 }
  0xe5   :  { %455 = vmatmul.mubr.msk.f32.vlgmr.msra.gmra.mrb[2].mxu1 %vm47_vm4, %v303_v28 }
 0x1b2   :  { %v200_v30 = vpop.f32.mrb[0].mxu1 }
 0x1b3   :  { %v201_v31 = vadd.f32 %v406_v29, %v200_v30  ;;  %v442_v32 = vpop.f32.mrb[1].mxu1 }
 0x1b5   :  { %204 = vst.msk [vmem:[%s611_s10] sm:$0xff] %vm47_vm4, %v201_v31 }
 0x1b8   :  { %v456_v34 = vpop.f32.mrb[2].mxu1 }
 0x1b9   :  { %v391_v35 = vadd.f32 %v456_v34, %v412_v33  ;;  %v385_v36 = vpop.f32.mrb[3].mxu1 }
 0x1ba   :  { %v386_v37 = vadd.f32 %v412_v33, %v385_v36 }
 0x1bb   :  { %395 = vst.msk [vmem:[%s613_s11 + $0x8] sm:$0xff] %vm47_vm4, %v391_v35 }
 0x1bc   :  { %394 = vst.msk [vmem:[%s613_s11] sm:$0xff] %vm47_vm4, %v386_v37 }

// kernel: gman_forward.10
= control target key start
LH: loop header
LB: loop body
LE: loop exit
PB: predicated region body
PF: predicated region fallthrough
CT: control target
= control target key end

     0   :  { %v317_v0 = vmov 0   ;;  %vm117_vm0 = vcmask 261120   ;;  %s433_s0 = inlined_call_operand.vmem [shape: f32[64,1], index: 0, kind: input, shape index: {}]   ;;  %s434_s3 = inlined_call_operand.vmem [shape: f32[32,32], index: 3, kind: input, shape index: {}]   ;;  %s435_s1 = inlined_call_operand.vmem [shape: f32[1,32], index: 1, kind: input, shape index: {}]   ;;  %s436_s2 = inlined_call_operand.vmem [shape: f32[1,32], index: 2, kind: input, shape index: {}]   ;;  %s437_s4 = inlined_call_operand.vmem [shape: f32[1,32], index: 4, kind: input, shape index: {}]   ;;  %s438_s5 = inlined_call_operand.vmem [shape: f32[64,32], index: 5, kind: output, shape index: {}]  }
   0x1   :  { %316 = vset.pattern.permute.xlu1 %v317_v0  ;;  %315 = vset.pattern.permute.xlu0 %v317_v0  ;;  %v21_v1 = vld [vmem:[%s433_s0 + $0x8] sm:$0xff]  ;;  %v20_v2 = vld [vmem:[%s433_s0] sm:$0xff]  ;;  %v108_v8 = vld [vmem:[%s434_s3 + $0x10] sm:$0xff] }
   0x2   :  { %37 = vperm.xlu1 %316, %v21_v1   ;;  %32 = vperm.xlu0 %315, %v20_v2   ;;  %v25_v3 = vld [vmem:[%s433_s0 + $0x28] sm:$0xff]  ;;  %v24_v4 = vld [vmem:[%s433_s0 + $0x20] sm:$0xff]  ;;  %v109_v9 = vld [vmem:[%s434_s3 + $0x18] sm:$0xff] }
   0x3   :  { %v106_v5 = vld [vmem:[%s434_s3] sm:$0xff]  ;;  %v107_v6 = vld [vmem:[%s434_s3 + $0x8] sm:$0xff]  ;;  %v306_v10 = vpack.c.bf16 %v109_v9, %v108_v8  ;;  %v26_v11 = vld [vmem:[%s433_s0 + $0x30] sm:$0xff] }
   0x4   :  { %v302_v7 = vpack.c.bf16 %v107_v6, %v106_v5  ;;  %v22_v12 = vld [vmem:[%s433_s0 + $0x10] sm:$0xff]  ;;  %v27_v13 = vld [vmem:[%s433_s0 + $0x38] sm:$0xff]  ;;  %v259_v15 = vld [vmem:[%s435_s1] ss:$0 sm:$0xff] }
   0x5   :  { %v23_v14 = vld [vmem:[%s433_s0 + $0x18] sm:$0xff]  ;;  %v260_v16 = vld [vmem:[%s436_s2] ss:$0 sm:$0xff] }
   0x6   :  { %57 = vperm.xlu1 %316, %v25_v3   ;;  %52 = vperm.xlu0 %315, %v24_v4   ;;  %v261_v49 = vld [vmem:[%s437_s4] ss:$0 sm:$0xff] }
   0x7   :  { %303 = vmatprep.subr.bf16.mxu0 %v302_v7  ;;  %310 = vmatprep.subr.bf16.mxu1 %v302_v7 }
   0x8   :  { %305 = vmatpush3.bf16.msra.mxu0 %v302_v7  ;;  %312 = vmatpush3.bf16.msra.mxu1 %v302_v7 }
   0x9   :  { %307 = vmatprep.subr.bf16.mxu0 %v306_v10  ;;  %311 = vmatprep.subr.bf16.mxu1 %v306_v10 }
   0xa   :  { %62 = vperm.xlu1 %316, %v26_v11   ;;  %42 = vperm.xlu0 %315, %v22_v12  }
   0xc   :  { %309 = vmatpush3.bf16.msra.mxu0 %v306_v10  ;;  %313 = vmatpush3.bf16.msra.mxu1 %v306_v10 }
   0xe   :  { %67 = vperm.xlu1 %316, %v27_v13   ;;  %47 = vperm.xlu0 %315, %v23_v14  }
  0x81   :  { %v38_v17 = vpop.permute.xlu1 %37  ;;  %v33_v18 = vpop.permute.xlu0 %32 }
  0x82   :  { %v77_v19 = vmul.f32 %v259_v15, %v38_v17  ;;  %v76_v20 = vmul.f32 %v259_v15, %v33_v18 }
  0x84   :  { %v91_v21 = vadd.f32 %v260_v16, %v77_v19  ;;  %v90_v22 = vadd.f32 %v260_v16, %v76_v20 }
  0x85   :  { %v58_v23 = vpop.permute.xlu1 %57  ;;  %v53_v24 = vpop.permute.xlu0 %52 }
  0x86   :  { %v99_v25 = vmax.f32 %v91_v21, 0.0  ;;  %v81_v26 = vmul.f32 %v259_v15, %v58_v23  ;;  %v80_v27 = vmul.f32 %v259_v15, %v53_v24  ;;  %v98_v28 = vmax.f32 %v90_v22, 0.0 }
  0x88   :  { %v95_v29 = vadd.f32 %v260_v16, %v81_v26  ;;  %290 = vmatprep.mubr.msk.f32.mxu0 %vm117_vm0, %v98_v28  ;;  %v94_v30 = vadd.f32 %v260_v16, %v80_v27 }
  0x89   :  { %v63_v31 = vpop.permute.xlu1 %62  ;;  %291 = vmatmul.mubr.msk.f32.vlgmr.msra.gmra.mrb[0].mxu0 %vm117_vm0, %v99_v25  ;;  %v43_v32 = vpop.permute.xlu0 %42 }
  0x8a   :  { %v103_v33 = vmax.f32 %v95_v29, 0.0  ;;  %v82_v34 = vmul.f32 %v259_v15, %v63_v31  ;;  %v78_v35 = vmul.f32 %v259_v15, %v43_v32  ;;  %v102_v36 = vmax.f32 %v94_v30, 0.0 }
  0x8c   :  { %v96_v37 = vadd.f32 %v260_v16, %v82_v34  ;;  %v92_v38 = vadd.f32 %v260_v16, %v78_v35  ;;  %296 = vmatprep.mubr.msk.f32.mxu1 %vm117_vm0, %v102_v36 }
  0x8d   :  { %v68_v39 = vpop.permute.xlu1 %67  ;;  %297 = vmatmul.mubr.msk.f32.vlgmr.msra.gmra.mrb[0].mxu1 %vm117_vm0, %v103_v33  ;;  %v48_v40 = vpop.permute.xlu0 %47 }
  0x8e   :  { %v104_v41 = vmax.f32 %v96_v37, 0.0  ;;  %v100_v42 = vmax.f32 %v92_v38, 0.0  ;;  %v83_v43 = vmul.f32 %v259_v15, %v68_v39  ;;  %v79_v44 = vmul.f32 %v259_v15, %v48_v40 }
  0x90   :  { %v97_v45 = vadd.f32 %v260_v16, %v83_v43  ;;  %v93_v46 = vadd.f32 %v260_v16, %v79_v44  ;;  %293 = vmatprep.mubr.msk.f32.mxu0 %vm117_vm0, %v100_v42  ;;  %299 = vmatprep.mubr.msk.f32.mxu1 %vm117_vm0, %v104_v41 }
  0x92   :  { %v105_v47 = vmax.f32 %v97_v45, 0.0  ;;  %v101_v48 = vmax.f32 %v93_v46, 0.0 }
  0x94   :  { %294 = vmatmul.mubr.msk.f32.gmra.mrb[2].mxu0 %vm117_vm0, %v101_v48  ;;  %300 = vmatmul.mubr.msk.f32.gmra.mrb[2].mxu1 %vm117_vm0, %v105_v47 }
 0x15c   :  { %v292_v50 = vpop.f32.mrb[0].mxu0 }
 0x15d   :  { %v214_v51 = vadd.f32 %v292_v50, %v261_v49  ;;  %v208_v52 = vpop.f32.mrb[1].mxu0 }
 0x15e   :  { %v209_v53 = vadd.f32 %v261_v49, %v208_v52 }
 0x15f   :  { %248 = vst.msk [vmem:[%s438_s5 + $0x8] sm:$0xff] %vm117_vm0, %v214_v51 }
 0x160   :  { %247 = vst.msk [vmem:[%s438_s5] sm:$0xff] %vm117_vm0, %v209_v53  ;;  %v298_v54 = vpop.f32.mrb[0].mxu1 }
 0x161   :  { %v234_v55 = vadd.f32 %v298_v54, %v261_v49  ;;  %v228_v56 = vpop.f32.mrb[1].mxu1 }
 0x162   :  { %v229_v57 = vadd.f32 %v261_v49, %v228_v56 }
 0x163   :  { %252 = vst.msk [vmem:[%s438_s5 + $0x28] sm:$0xff] %vm117_vm0, %v234_v55 }
 0x164   :  { %251 = vst.msk [vmem:[%s438_s5 + $0x20] sm:$0xff] %vm117_vm0, %v229_v57 }
 0x167   :  { %v295_v58 = vpop.f32.mrb[2].mxu0  ;;  %v301_v59 = vpop.f32.mrb[2].mxu1 }
 0x168   :  { %v224_v60 = vadd.f32 %v295_v58, %v261_v49  ;;  %v244_v61 = vadd.f32 %v301_v59, %v261_v49  ;;  %v218_v62 = vpop.f32.mrb[3].mxu0  ;;  %v238_v63 = vpop.f32.mrb[3].mxu1 }
 0x169   :  { %v219_v0 = vadd.f32 %v261_v49, %v218_v62  ;;  %v239_v1 = vadd.f32 %v261_v49, %v238_v63 }
 0x16a   :  { %250 = vst.msk [vmem:[%s438_s5 + $0x18] sm:$0xff] %vm117_vm0, %v224_v60  ;;  %254 = vst.msk [vmem:[%s438_s5 + $0x38] sm:$0xff] %vm117_vm0, %v244_v61 }
 0x16b   :  { %249 = vst.msk [vmem:[%s438_s5 + $0x10] sm:$0xff] %vm117_vm0, %v219_v0  ;;  %253 = vst.msk [vmem:[%s438_s5 + $0x30] sm:$0xff] %vm117_vm0, %v239_v1 }

// kernel: gman_forward.13
= control target key start
LH: loop header
LB: loop body
LE: loop exit
PB: predicated region body
PF: predicated region fallthrough
CT: control target
= control target key end

     0   :  { %s2486_s18 = smov 0   ;;  %s2718_s0 = inlined_call_operand.vmem [shape: f32[16,4,32], index: 0, kind: input, shape index: {}]   ;;  %s2719_s1 = inlined_call_operand.vmem [shape: f32[16,4,16], index: 1, kind: input, shape index: {}]   ;;  %s2720_s2 = inlined_call_operand.vmem [shape: f32[32,32], index: 2, kind: input, shape index: {}]   ;;  %s2721_s3 = inlined_call_operand.vmem [shape: f32[16,32], index: 3, kind: input, shape index: {}]   ;;  %s2722_s4 = inlined_call_operand.vmem [shape: f32[1,32], index: 4, kind: input, shape index: {}]   ;;  %s2723_s5 = inlined_call_operand.vmem [shape: f32[32,32], index: 5, kind: input, shape index: {}]   ;;  %s2724_s6 = inlined_call_operand.vmem [shape: f32[16,32], index: 6, kind: input, shape index: {}]   ;;  %s2725_s7 = inlined_call_operand.vmem [shape: f32[1,32], index: 7, kind: input, shape index: {}]   ;;  %s2726_s8 = inlined_call_operand.vmem [shape: f32[32,32], index: 8, kind: input, shape index: {}]   ;;  %s2727_s9 = inlined_call_operand.vmem [shape: f32[16,32], index: 9, kind: input, shape index: {}]   ;;  %s2728_s10 = inlined_call_operand.vmem [shape: f32[1,32], index: 10, kind: input, shape index: {}]   ;;  %s2729_s11 = inlined_call_operand.vmem [shape: f32[32,32], index: 11, kind: input, shape index: {}]   ;;  %s2730_s12 = inlined_call_operand.vmem [shape: f32[1,32], index: 12, kind: input, shape index: {}]   ;;  %s2731_s13 = inlined_call_operand.vmem [shape: f32[32,32], index: 13, kind: input, shape index: {}]   ;;  %s2732_s14 = inlined_call_operand.vmem [shape: f32[1,32], index: 14, kind: input, shape index: {}]   ;;  %s2733_s15 = inlined_call_operand.vmem [shape: f32[16,4,32], index: 15, kind: output, shape index: {}]  }
   0x1 LB: > { %s2109_s19 = sadd.s32 4294967295, %s2398_s18   ;;  %p2113_p0 = scmp.ge.s32.totalorder %s2398_s18, 1  ;;  %s2398_s18 = sphi %s2486_s18, %s25_s18  }
   0x2   : > { %p445_p1 = scmp.lt.s32.totalorder %s2398_s18, 17 }
   0x4   : > { %p446_p2 = pnand %p2113_p0, %p445_p1 }
   0x5   : > { %v513_v0 = vld [vmem:[%s2721_s3] sm:$0xff] (!%p446_p2)  ;;  %v514_v1 = vld [vmem:[%s2721_s3 + $0x8] sm:$0xff] (!%p446_p2)  ;;  %v2400_v3 = vmov (!%p446_p2), 0.0|0.0   ;;  %p495_p3 = scmp.lt.s32.totalorder (!%p446_p2), %s2109_s19, 15  ;;  %v511_v6 = vld [vmem:[%s2720_s2 + $0x10] sm:$0xff] (!%p446_p2)  ;;  %vm2401_vm0 = vmmov (!%p446_p2), 0  }
   0x6   : > { %449 = sbr.rel (%p446_p2) target bundleno = 2815 (0xaff), region = 80  ;;  %v509_v2 = vld [vmem:[%s2720_s2] sm:$0xff] (!%p446_p2)  ;;  %2329 = vmatprep.subr.bf16.mxu0 (!%p446_p2), %v2400_v3  ;;  %2332 = vmatprep.subr.bf16.mxu1 (!%p446_p2), %v2400_v3  ;;  %v2330_v4 = vpack.c.bf16 (!%p446_p2), %v514_v1, %v513_v0  ;;  %v510_v5 = vld [vmem:[%s2720_s2 + $0x8] sm:$0xff] (!%p446_p2)  ;;  %v512_v7 = vld [vmem:[%s2720_s2 + $0x18] sm:$0xff] (!%p446_p2)  ;;  %v2402_v9 = vmov (!%p446_p2), 0.0   ;;  %vm515_vm1 = vcmask (!%p446_p2), 130048  }
   0x7   : > { %v2333_v8 = vpack.c.bf16 (!%p446_p2), %v510_v5, %v509_v2  ;;  %2208 = vmatprep.mubr.msk.f32.mxu0 (!%p446_p2), %vm2401_vm0, %v2402_v9  ;;  %v676_v10 = vld [vmem:[%s2724_s6] sm:$0xff] (!%p446_p2)  ;;  %v677_v11 = vld [vmem:[%s2724_s6 + $0x8] sm:$0xff] (!%p446_p2)  ;;  %2219 = vmatprep.mubr.msk.f32.mxu1 (!%p446_p2), %vm2401_vm0, %v2402_v9  ;;  %v2336_v12 = vpack.c.bf16 (!%p446_p2), %v512_v7, %v511_v6  ;;  %vm589_vm2 = vcmask (!%p446_p2), 261120   ;;  %v674_v19 = vld [vmem:[%s2723_s5 + $0x10] sm:$0xff] (!%p446_p2)  ;;  %vm986_vm3 = vcmask (!%p446_p2), 64512   ;;  %s2403_s28 = smov (!%p446_p2), 120  }
   0x8   : > { %2331 = vmatpush3.bf16.msra.mxu0 (!%p446_p2), %v2330_v4  ;;  %v2339_v13 = vpack.c.bf16 (!%p446_p2), %v677_v11, %v676_v10  ;;  %v672_v14 = vld [vmem:[%s2723_s5] sm:$0xff] (!%p446_p2)  ;;  %v673_v15 = vld [vmem:[%s2723_s5 + $0x8] sm:$0xff] (!%p446_p2)  ;;  %v675_v20 = vld [vmem:[%s2723_s5 + $0x18] sm:$0xff] (!%p446_p2)  ;;  %vm1080_vm4 = vcmask (!%p446_p2), 1043456   ;;  %vm1064_vm5 = vcmask (!%p446_p2), 27648   ;;  %s2404_s16 = smov (!%p446_p2), 112  }
   0x9   : > { %2334 = vmatpush3.bf16.msra.mxu1 (!%p446_p2), %v2333_v8  ;;  %2338 = vmatprep.subr.bf16.mxu0 (!%p446_p2), %v2400_v3  ;;  %v2342_v18 = vpack.c.bf16 (!%p446_p2), %v673_v15, %v672_v14  ;;  %v2345_v21 = vpack.c.bf16 (!%p446_p2), %v675_v20, %v674_v19  ;;  %v831_v22 = vld [vmem:[%s2727_s9] sm:$0xff] (!%p446_p2)  ;;  %v832_v23 = vld [vmem:[%s2727_s9 + $0x8] sm:$0xff] (!%p446_p2)  ;;  %v829_v28 = vld [vmem:[%s2726_s8 + $0x10] sm:$0xff] (!%p446_p2)  ;;  %s2405_s17 = smov (!%p446_p2), 104   ;;  %vm1076_vm6 = vcmask (!%p446_p2), 31744   ;;  %vm2042_vm7 = vcmask (!%p446_p2), 257024  }
   0xa   : > { %2335 = vmatprep.subr.bf16.mxu1 (!%p446_p2), %v2400_v3  ;;  %v827_v24 = vld [vmem:[%s2726_s8] sm:$0xff] (!%p446_p2)  ;;  %v2348_v25 = vpack.c.bf16 (!%p446_p2), %v832_v23, %v831_v22  ;;  %v828_v26 = vld [vmem:[%s2726_s8 + $0x8] sm:$0xff] (!%p446_p2)  ;;  %v830_v29 = vld [vmem:[%s2726_s8 + $0x18] sm:$0xff] (!%p446_p2) }
   0xb   : > { %v2351_v27 = vpack.c.bf16 (!%p446_p2), %v828_v26, %v827_v24  ;;  %v2354_v30 = vpack.c.bf16 (!%p446_p2), %v830_v29, %v829_v28  ;;  %v2122_v39 = vld [vmem:[%s2725_s7] ss:$0 sm:$0xff] (!%p446_p2) }
   0xc   : > { %v2119_v40 = vld [vmem:[%s2722_s4] ss:$0 sm:$0xff] (!%p446_p2) }
   0xd   : > { %s2735_s19 = smov (!%p495_p3, %s2109_s19), 15  ;;  %2337 = vmatpush3.bf16.msra.mxu1 %v2336_v12  ;;  %v2125_v50 = vld [vmem:[%s2728_s10] ss:$0 sm:$0xff] }
   0xe   : > { %s2526_s23 = sshll.u32 %s2735_s19, 2  ;;  %2347 = vmatprep.subr.bf16.mxu1 %v2400_v3 }
   0xf   : > { %s502_s26 = scalar_lea.vmem %s2719_s1, %s2526_s23  ;;  %s498_s29 = scalar_lea.vmem %s2718_s0, %s2526_s23 }
  0x10   : > { %v508_v16 = vld [vmem:[%s502_s26] sm:$0xf] }
  0x11   : > { %2209 = vmatmul.mubr.msk.f32.vlgmr.msra.gmra.mrb[0].mxu0 %vm515_vm1, %v508_v16  ;;  %v507_v17 = vld [vmem:[%s498_s29] sm:$0xf]  ;;  %s506_s29 = scalar_lea.vmem %s2733_s15, %s2526_s23 }
  0x12   : > { %2340 = vmatpush3.bf16.msra.mxu0 %v2339_v13  ;;  %2226 = vmatprep.mubr.msk.f32.mxu0 %vm2401_vm0, %v2402_v9 }
  0x13   : > { %2341 = vmatprep.subr.bf16.mxu0 %v2400_v3  ;;  %2220 = vmatmul.mubr.msk.f32.vlgmr.msra.gmra.mrb[0].mxu1 %vm589_vm2, %v507_v17 }
  0x14   : > { %2244 = vmatprep.mubr.msk.f32.mxu1 %vm2401_vm0, %v2402_v9  ;;  %2349 = vmatpush3.bf16.msra.mxu1 %v2348_v25 }
  0x15   : > { %2227 = vmatmul.mubr.msk.f32.vlgmr.msra.gmra.mrb[2].mxu0 %vm515_vm1, %v508_v16  ;;  %2350 = vmatprep.subr.bf16.mxu1 %v2400_v3 }
  0x16   : > { %2343 = vmatpush3.bf16.msra.mxu0 %v2342_v18  ;;  %2237 = vmatprep.mubr.msk.f32.mxu0 %vm2401_vm0, %v2402_v9 }
  0x17   : > { %2344 = vmatprep.subr.bf16.mxu0 %v2400_v3  ;;  %2245 = vmatmul.mubr.msk.f32.vlgmr.msra.gmra.mrb[2].mxu1 %vm515_vm1, %v508_v16  ;;  %v983_v16 = vld [vmem:[%s2729_s11 + $0x8] sm:$0xff] }
  0x18   : > { %2352 = vmatpush3.bf16.msra.mxu1 %v2351_v27  ;;  %2255 = vmatprep.mubr.msk.f32.mxu1 %vm2401_vm0, %v2402_v9 }
  0x19   : > { %2353 = vmatprep.subr.bf16.mxu1 %v2400_v3 }
  0x1a   : > { %2346 = vmatpush3.bf16.msra.mxu0 %v2345_v21  ;;  %v982_v21 = vld [vmem:[%s2729_s11] sm:$0xff] }
  0x1b   : > { %2258 = vmatprep.subr.mxu0 %v2402_v9 }
  0x1c   : > { %2355 = vmatpush3.bf16.msra.mxu1 %v2354_v30 }
  0x1d   : > { %2238 = vmatmul.mubr.msk.f32.vlgmr.msra.gmra.mrb[4].mxu0 %vm589_vm2, %v507_v17  ;;  %2268 = vmatprep.subr.mxu1 %v2402_v9 }
  0x1e   : > { %2260 = vmatprep.mubr.msk.f32.mxu0 %vm2401_vm0, %v2402_v9 }
  0x1f   : > { %2256 = vmatmul.mubr.msk.f32.vlgmr.msra.gmra.mrb[4].mxu1 %vm589_vm2, %v507_v17 }
  0x20   : > { %2270 = vmatprep.mubr.msk.f32.mxu1 %vm2401_vm0, %v2402_v9 }
  0xe4   : > { %v585_v31 = vpop.f32.mrb[0].mxu0 }
  0xe5   : > { %v2210_v32 = vpop.f32.mrb[1].mxu0 }
  0xe6   : > { %v659_v33 = vpop.f32.mrb[0].mxu1 }
  0xe7   : > { %v660_v34 = vadd.f32 %v659_v33, %v585_v31  ;;  %v2221_v36 = vpop.f32.mrb[1].mxu1 }
  0xe8   : > { %v744_v35 = vpop.f32.mrb[2].mxu0 }
  0xe9   : > { %v2228_v37 = vpop.f32.mrb[3].mxu0  ;;  %v670_v44 = vadd.f32 %v2119_v40, %v660_v34 }
  0xea   : > { %v899_v47 = vpop.f32.mrb[2].mxu1 }
  0xeb   : > { %v2599_v46 = vmax.f32 %v670_v44, 0.0  ;;  %v2246_v48 = vpop.f32.mrb[3].mxu1 }
  0xf0   : > { %v814_v38 = vpop.f32.mrb[4].mxu0 }
  0xf1   : > { %v815_v41 = vadd.f32 %v814_v38, %v744_v35  ;;  %v2239_v42 = vpop.f32.mrb[5].mxu0 }
  0xf2   : > { %v969_v49 = vpop.f32.mrb[4].mxu1 }
  0xf3   : > { %v825_v43 = vadd.f32 %v2122_v39, %v815_v41  ;;  %v970_v51 = vadd.f32 %v969_v49, %v899_v47  ;;  %v2257_v52 = vpop.f32.mrb[5].mxu1 }
  0xf5   : > { %v826_v45 = vmax.f32 %v825_v43, 0.0  ;;  %v980_v53 = vadd.f32 %v2125_v50, %v970_v51 }
  0xf7   : > { %1156 = vrot.lane.b32.xlu0 %v826_v45, %s2403_s28  ;;  %2259 = vmatpush3.xpose.msk.msra.mxu0 %vm986_vm3, %v826_v45  ;;  %v2611_v54 = vmax.f32 %v980_v53, 0.0 }
  0xf8   : > { %2263 = vmatprep.subr.mxu0 %v2402_v9 }
  0xfa   : > { %2261 = vmatmul.mubr.msk.f32.vlgmr.msra.gmra.mrb[6].mxu0 %vm986_vm3, %v2599_v46 }
  0xfb   : > { %1154 = vrot.lane.b32.xlu0 %v2599_v46, %s2403_s28  ;;  %2265 = vmatprep.mubr.msk.f32.mxu0 %vm2401_vm0, %v2402_v9 }
  0xfc   : > { %2264 = vmatpush3.msk.msra.mxu0 %vm1080_vm4, %v2611_v54 }
  0xfd   : > { %2273 = vmatprep.subr.mxu0 %v2402_v9 }
 0x169   : > { %v1157_v55 = vpop.permute.xlu0 %1156 }
 0x16a   : > { %2269 = vmatpush3.xpose.msk.msra.mxu1 %vm986_vm3, %v1157_v55 }
 0x16b   : > { %2278 = vmatprep.subr.mxu1 %v2402_v9 }
 0x16d   : > { %v1155_v56 = vpop.permute.xlu0 %1154 }
 0x16e   : > { %2271 = vmatmul.mubr.msk.f32.vlgmr.msra.gmra.mrb[6].mxu1 %vm986_vm3, %v1155_v56 }
 0x16f   : > { %2280 = vmatprep.mubr.msk.f32.mxu1 %vm2401_vm0, %v2402_v9  ;;  %2279 = vmatpush3.msra.mxu1 %v983_v16 }
 0x170   : > { %2288 = vmatprep.subr.mxu1 %v2402_v9 }
 0x1cd   : > { %v1059_v57 = vpop.f32.mrb[6].mxu0 }
 0x1ce   : > { %v1063_v58 = vmul.f32 0.35355338, %v1059_v57  ;;  %v2262_v59 = vpop.f32.mrb[7].mxu0 }
 0x1d0   : > { %v1065_v60 = vsel %vm1064_vm5, %v1063_v58, -inf }
 0x1d1   : > { %1066 = vmax.xlane.f32.xlu1 %v1065_v60 }
 0x241   : > { %v1228_v61 = vpop.f32.mrb[6].mxu1 }
 0x242   : > { %v1232_v62 = vmul.f32 0.35355338, %v1228_v61  ;;  %v2272_v63 = vpop.f32.mrb[7].mxu1  ;;  %v985_v61 = vld [vmem:[%s2729_s11 + $0x18] sm:$0xff] }
 0x244   : > { %v1233_v0 = vsel %vm1064_vm5, %v1232_v62, -inf }
 0x245   : > { %1234 = vmax.xlane.f32.xlu1 %v1233_v0 }
 0x25e   : > { %v1067_v1 = vpop.xlane.xlu1 %1066 }
 0x25f   : > { %v1068_v2 = vsub.f32 %v1063_v58, %v1067_v1 }
 0x261   : > { %v1069_v4 = vmul.f32 1.442695, %v1068_v2 }
 0x263   : > { %2376 = vpow2.f32 %v1069_v4 }
 0x26d   : > { %v2377_v5 = vpop.eup %2376 }
 0x26e   : > { %v1071_v6 = vsel %vm1064_vm5, %v2377_v5, 0.0 }
 0x26f   : > { %1072 = vadd.xlane.f32.xlu0 %v1071_v6 }
 0x285   : > { %1557 = vrot.lane.b32.xlu0 %v2611_v54, %s2404_s16 }
 0x289   : > { %1710 = vrot.lane.b32.xlu0 %v826_v45, %s2405_s17 }
 0x2d2   : > { %v1235_v7 = vpop.xlane.xlu1 %1234 }
 0x2d3   : > { %v1236_v8 = vsub.f32 %v1232_v62, %v1235_v7  ;;  %v1958_v7 = vld [vmem:[%s2731_s13] sm:$0xff] }
 0x2d5   : > { %v1237_v10 = vmul.f32 1.442695, %v1236_v8  ;;  %v1959_v8 = vld [vmem:[%s2731_s13 + $0x8] sm:$0xff] }
 0x2d7   : > { %2378 = vpow2.f32 %v1237_v10  ;;  %v2357_v10 = vpack.c.bf16 %v1959_v8, %v1958_v7 }
 0x2e1   : > { %v2379_v11 = vpop.eup %2378 }
 0x2e2   : > { %v1239_v12 = vsel %vm1064_vm5, %v2379_v11, 0.0 }
 0x2e3   : > { %1240 = vadd.xlane.f32.xlu1 %v1239_v12 }
 0x2f4   : > { %1244 = vrot.lane.b32.xlu1 %v2611_v54, %s2403_s28 }
 0x2f8   : > { %1469 = vrot.lane.b32.xlu1 %v826_v45, %s2404_s16 }
 0x2fc   : > { %v1073_v13 = vpop.xlane.xlu0 %1072  ;;  %1467 = vrot.lane.b32.xlu1 %v2599_v46, %s2404_s16 }
 0x2fd   : > { %2380 = vrcp.f32 %v1073_v13 }
 0x300   : > { %v1558_v23 = vpop.permute.xlu0 %1557 }
 0x304   : > { %v1711_v43 = vpop.permute.xlu0 %1710 }
 0x307   : > { %v2381_v14 = vpop.eup %2380 }
 0x308   : > { %v1075_v15 = vmul.f32 %v2381_v14, %v2377_v5  ;;  %v2146_v14 = vld [vmem:[%s2730_s12] ss:$0 sm:$0xff] }
 0x30a   : > { %2266 = vmatmul.mubr.msk.f32.vlgmr.msra.gmra.mrb[8].mxu0 %vm1076_vm6, %v1075_v15 }
 0x30b   : > { %2275 = vmatprep.mubr.msk.f32.mxu0 %vm2401_vm0, %v2402_v9 }
 0x370   : > { %v1241_v17 = vpop.xlane.xlu1 %1240 }
 0x371   : > { %2382 = vrcp.f32 %v1241_v17 }
 0x374   : > { %v1245_v18 = vpop.permute.xlu1 %1244 }
 0x375   : > { %2274 = vmatpush3.msk.msra.mxu0 %vm1080_vm4, %v1245_v18 }
 0x376   : > { %2283 = vmatprep.subr.mxu0 %v2402_v9 }
 0x378   : > { %v1470_v25 = vpop.permute.xlu1 %1469 }
 0x37b   : > { %v2383_v19 = vpop.eup %2382 }
 0x37c   : > { %v1243_v20 = vmul.f32 %v2383_v19, %v2379_v11  ;;  %v1468_v28 = vpop.permute.xlu1 %1467  ;;  %v1961_v11 = vld [vmem:[%s2731_s13 + $0x18] sm:$0xff] }
 0x37e   : > { %2276 = vmatmul.mubr.msk.f32.vlgmr.msra.gmra.mrb[10].mxu0 %vm1076_vm6, %v1243_v20 }
 0x37f   : > { %2284 = vmatpush3.msra.mxu0 %v982_v21  ;;  %2285 = vmatprep.mubr.msk.f32.mxu0 %vm2401_vm0, %v2402_v9 }
 0x380   : > { %2293 = vmatprep.subr.mxu0 %v2402_v9 }
 0x3dd   : > { %v1150_v22 = vpop.f32.mrb[8].mxu0 }
 0x3de   : > { %v2267_v24 = vpop.f32.mrb[9].mxu0  ;;  %2286 = vmatmul.mubr.msk.f32.vlgmr.msra.gmra.mrb[12].mxu0 %vm986_vm3, %v1150_v22 }
 0x3df   : > { %2294 = vmatpush3.msk.msra.mxu0 %vm1080_vm4, %v1558_v23  ;;  %2295 = vmatprep.mubr.msk.f32.mxu0 %vm2401_vm0, %v2402_v9 }
 0x3e0   : > { %2303 = vmatprep.subr.mxu0 %v2402_v9 }
 0x451   : > { %v1317_v26 = vpop.f32.mrb[10].mxu0 }
 0x452   : > { %v2277_v27 = vpop.f32.mrb[11].mxu0  ;;  %2281 = vmatmul.mubr.msk.f32.vlgmr.msra.gmra.mrb[8].mxu1 %vm986_vm3, %v1317_v26 }
 0x453   : > { %2289 = vmatpush3.xpose.msk.msra.mxu1 %vm986_vm3, %v1470_v25  ;;  %2290 = vmatprep.mubr.msk.f32.mxu1 %vm2401_vm0, %v2402_v9 }
 0x454   : > { %2298 = vmatprep.subr.mxu1 %v2402_v9 }
 0x456   : > { %2291 = vmatmul.mubr.msk.f32.vlgmr.msra.gmra.mrb[10].mxu1 %vm986_vm3, %v1468_v28 }
 0x457   : > { %2300 = vmatprep.mubr.msk.f32.mxu1 %vm2401_vm0, %v2402_v9 }
 0x4b1   : > { %v1463_v29 = vpop.f32.mrb[12].mxu0 }
 0x4b2   : > { %v2287_v30 = vpop.f32.mrb[13].mxu0 }
 0x525   : > { %v1390_v31 = vpop.f32.mrb[8].mxu1 }
 0x526   : > { %v1464_v32 = vadd.f32 %v1463_v29, %v1390_v31  ;;  %v2282_v33 = vpop.f32.mrb[9].mxu1 }
 0x529   : > { %v1541_v34 = vpop.f32.mrb[10].mxu1 }
 0x52a   : > { %v1545_v35 = vmul.f32 0.35355338, %v1541_v34  ;;  %v2292_v36 = vpop.f32.mrb[11].mxu1 }
 0x52c   : > { %v1546_v37 = vsel %vm1064_vm5, %v1545_v35, -inf }
 0x52d   : > { %1547 = vmax.xlane.f32.xlu1 %v1546_v37 }
 0x5ba   : > { %v1548_v38 = vpop.xlane.xlu1 %1547 }
 0x5bb   : > { %v1549_v39 = vsub.f32 %v1545_v35, %v1548_v38 }
 0x5bd   : > { %v1550_v40 = vmul.f32 1.442695, %v1549_v39 }
 0x5bf   : > { %2384 = vpow2.f32 %v1550_v40 }
 0x5c9   : > { %v2385_v41 = vpop.eup %2384 }
 0x5ca   : > { %v1552_v42 = vsel %vm1064_vm5, %v2385_v41, 0.0 }
 0x5cb   : > { %1553 = vadd.xlane.f32.xlu0 %v1552_v42 }
 0x5e1   : > { %1708 = vrot.lane.b32.xlu0 %v2599_v46, %s2405_s17  ;;  %v984_v46 = vld [vmem:[%s2729_s11 + $0x10] sm:$0xff] }
 0x5e2   : > { %2299 = vmatpush3.msra.mxu1 %v984_v46 }
 0x5e3   : > { %2308 = vmatprep.subr.mxu1 %v2402_v9 }
 0x658   : > { %v1554_v44 = vpop.xlane.xlu0 %1553 }
 0x659   : > { %2386 = vrcp.f32 %v1554_v44 }
 0x65c   : > { %v1709_v48 = vpop.permute.xlu0 %1708 }
 0x663   : > { %v2387_v45 = vpop.eup %2386 }
 0x664   : > { %v1556_v47 = vmul.f32 %v2387_v45, %v2385_v41 }
 0x666   : > { %2296 = vmatmul.mubr.msk.f32.vlgmr.msra.gmra.mrb[14].mxu0 %vm1076_vm6, %v1556_v47 }
 0x667   : > { %2304 = vmatpush3.xpose.msk.msra.mxu0 %vm986_vm3, %v1711_v43  ;;  %2305 = vmatprep.mubr.msk.f32.mxu0 %vm2401_vm0, %v2402_v9 }
 0x668   : > { %2313 = vmatprep.subr.mxu0 %v2402_v9 }
 0x66a   : > { %2306 = vmatmul.mubr.msk.f32.vlgmr.msra.gmra.mrb[16].mxu0 %vm986_vm3, %v1709_v48 }
 0x66b   : > { %2315 = vmatprep.mubr.msk.f32.mxu0 %vm2401_vm0, %v2402_v9  ;;  %2314 = vmatpush3.msra.mxu0 %v985_v61 }
 0x739   : > { %v1630_v49 = vpop.f32.mrb[14].mxu0 }
 0x73a   : > { %v2297_v50 = vpop.f32.mrb[15].mxu0  ;;  %2301 = vmatmul.mubr.msk.f32.vlgmr.msra.gmra.mrb[12].mxu1 %vm986_vm3, %v1630_v49 }
 0x73b   : > { %2310 = vmatprep.mubr.msk.f32.mxu1 %vm2401_vm0, %v2402_v9 }
 0x73d   : > { %v1782_v51 = vpop.f32.mrb[16].mxu0 }
 0x73e   : > { %v1786_v52 = vmul.f32 0.35355338, %v1782_v51  ;;  %v2307_v53 = vpop.f32.mrb[17].mxu0 }
 0x740   : > { %v1787_v55 = vsel %vm1064_vm5, %v1786_v52, -inf }
 0x741   : > { %1788 = vmax.xlane.f32.xlu0 %v1787_v55 }
 0x7ce   : > { %v1789_v56 = vpop.xlane.xlu0 %1788 }
 0x7cf   : > { %v1790_v57 = vsub.f32 %v1786_v52, %v1789_v56 }
 0x7d1   : > { %v1791_v58 = vmul.f32 1.442695, %v1790_v57 }
 0x7d3   : > { %2388 = vpow2.f32 %v1791_v58 }
 0x7dd   : > { %v2389_v59 = vpop.eup %2388 }
 0x7de   : > { %v1793_v60 = vsel %vm1064_vm5, %v2389_v59, 0.0 }
 0x7df   : > { %1794 = vadd.xlane.f32.xlu1 %v1793_v60 }
 0x7f0   : > { %1798 = vrot.lane.b32.xlu1 %v2611_v54, %s2405_s17 }
 0x80d   : > { %v1703_v62 = vpop.f32.mrb[12].mxu1 }
 0x80e   : > { %v1707_v63 = vadd.f32 %v1703_v62, %v1464_v32  ;;  %v2302_v0 = vpop.f32.mrb[13].mxu1 }
 0x86c   : > { %v1795_v1 = vpop.xlane.xlu1 %1794 }
 0x86d   : > { %2390 = vrcp.f32 %v1795_v1 }
 0x870   : > { %v1799_v2 = vpop.permute.xlu1 %1798 }
 0x871   : > { %2309 = vmatpush3.msk.msra.mxu1 %vm1080_vm4, %v1799_v2 }
 0x872   : > { %2356 = vmatprep.subr.bf16.mxu1 %v2400_v3 }
 0x877   : > { %v2391_v4 = vpop.eup %2390 }
 0x878   : > { %v1797_v5 = vmul.f32 %v2391_v4, %v2389_v59 }
 0x87a   : > { %2311 = vmatmul.mubr.msk.f32.vlgmr.msra.gmra.mrb[14].mxu1 %vm1076_vm6, %v1797_v5 }
 0x87b   : > { %2326 = vmatprep.mubr.msk.f32.mxu1 %vm2401_vm0, %v2402_v9  ;;  %2358 = vmatpush3.bf16.msra.mxu1 %v2357_v10  ;;  %v1960_v9 = vld [vmem:[%s2731_s13 + $0x10] sm:$0xff] }
 0x87c   : > { %2359 = vmatprep.subr.bf16.mxu1 %v2400_v3  ;;  %v2360_v12 = vpack.c.bf16 %v1961_v11, %v1960_v9  ;;  %v2147_v3 = vld [vmem:[%s2732_s14] ss:$0 sm:$0xff] }
 0x87f   : > { %2361 = vmatpush3.bf16.msra.mxu1 %v2360_v12 }
 0x94d   : > { %v1871_v54 = vpop.f32.mrb[14].mxu1 }
 0x94e   : > { %v2312_v6 = vpop.f32.mrb[15].mxu1  ;;  %2316 = vmatmul.mubr.msk.f32.vlgmr.msra.gmra.mrb[18].mxu0 %vm986_vm3, %v1871_v54 }
 0xa21   : > { %v1944_v13 = vpop.f32.mrb[18].mxu0 }
 0xa22   : > { %v1948_v15 = vadd.f32 %v1944_v13, %v1707_v63  ;;  %v2317_v16 = vpop.f32.mrb[19].mxu0 }
 0xa24   : > { %v1956_v17 = vadd.f32 %v2146_v14, %v1948_v15 }
 0xa26   : > { %v1957_v18 = vmax.f32 %v1956_v17, 0.0 }
 0xa28   : > { %2327 = vmatmul.mubr.msk.f32.vlgmr.msra.gmra.mrb[16].mxu1 %vm589_vm2, %v1957_v18 }
 0xafb   : > { %v2038_v19 = vpop.f32.mrb[16].mxu1 }
 0xafc   : > { %v2039_v20 = vadd.f32 %v2147_v3, %v2038_v19  ;;  %v2328_v21 = vpop.f32.mrb[17].mxu1 }
 0xafe   : > { %2043 = vst.msk [vmem:[%s506_s29] sm:$0xf] %vm2042_vm7, %v2039_v20 }
 0xaff PF: > { %s25_s18 = sadd.s32 1, %s2398_s18  }
 0xb00   : > { %p22_p4 = scmp.ge.s32.totalorder %s25_s18, 18  }
 0xb02   :  { %24 = sbr.rel (!%p22_p4) target bundleno = 1 (0x1), region = 113 }

// kernel: gman_forward.14
= control target key start
LH: loop header
LB: loop body
LE: loop exit
PB: predicated region body
PF: predicated region fallthrough
CT: control target
= control target key end

     0   :  { %vm66_vm0 = vcmask 261120   ;;  %s1288_s4 = inlined_call_operand.vmem [shape: f32[32,32], index: 4, kind: input, shape index: {}]   ;;  %s1289_s1 = inlined_call_operand.vmem [shape: f32[64,32], index: 1, kind: input, shape index: {}]   ;;  %s1290_s3 = inlined_call_operand.vmem [shape: f32[32,32], index: 3, kind: input, shape index: {}]   ;;  %s1291_s0 = inlined_call_operand.vmem [shape: f32[64,32], index: 0, kind: input, shape index: {}]   ;;  %s1292_s6 = inlined_call_operand.vmem [shape: f32[32,32], index: 6, kind: input, shape index: {}]   ;;  %s1293_s8 = inlined_call_operand.vmem [shape: f32[32,32], index: 8, kind: input, shape index: {}]   ;;  %s1294_s5 = inlined_call_operand.vmem [shape: f32[1,32], index: 5, kind: input, shape index: {}]   ;;  %s1295_s7 = inlined_call_operand.vmem [shape: f32[1,32], index: 7, kind: input, shape index: {}]   ;;  %s1296_s9 = inlined_call_operand.vmem [shape: f32[1,32], index: 9, kind: input, shape index: {}]   ;;  %s1297_s2 = inlined_call_operand.vmem [shape: f32[64,32], index: 2, kind: input, shape index: {}]   ;;  %s1298_s10 = inlined_call_operand.vmem [shape: f32[64,32], index: 10, kind: output, shape index: {}]  }
   0x1   :  { %v55_v0 = vld [vmem:[%s1288_s4] sm:$0xff]  ;;  %v56_v1 = vld [vmem:[%s1288_s4 + $0x8] sm:$0xff]  ;;  %v57_v2 = vld [vmem:[%s1288_s4 + $0x10] sm:$0xff] }
   0x2   :  { %v892_v3 = vpack.c.bf16 %v56_v1, %v55_v0  ;;  %v58_v4 = vld [vmem:[%s1288_s4 + $0x18] sm:$0xff]  ;;  %v1042_v5 = vld [vmem:[%s1289_s1] sm:$0xff]  ;;  %v52_v8 = vld [vmem:[%s1290_s3 + $0x8] sm:$0xff] }
   0x3   :  { %v896_v6 = vpack.c.bf16 %v58_v4, %v57_v2  ;;  %820 = vmatprep.mubr.msk.f32.mxu0 %vm66_vm0, %v1042_v5  ;;  %v51_v7 = vld [vmem:[%s1290_s3] sm:$0xff]  ;;  %v53_v10 = vld [vmem:[%s1290_s3 + $0x10] sm:$0xff]  ;;  %v54_v11 = vld [vmem:[%s1290_s3 + $0x18] sm:$0xff] }
   0x4   :  { %893 = vmatprep.subr.bf16.mxu0 %v892_v3  ;;  %v900_v9 = vpack.c.bf16 %v52_v8, %v51_v7  ;;  %v1061_v12 = vld [vmem:[%s1289_s1 + $0x8] sm:$0xff]  ;;  %v1066_v13 = vld [vmem:[%s1289_s1 + $0x10] sm:$0xff]  ;;  %v904_v14 = vpack.c.bf16 %v54_v11, %v53_v10  ;;  %v1075_v15 = vld [vmem:[%s1289_s1 + $0x18] sm:$0xff] }
   0x5   :  { %895 = vmatpush3.bf16.msra.mxu0 %v892_v3  ;;  %v1080_v16 = vld [vmem:[%s1289_s1 + $0x20] sm:$0xff]  ;;  %v1089_v17 = vld [vmem:[%s1289_s1 + $0x28] sm:$0xff]  ;;  %v1094_v18 = vld [vmem:[%s1289_s1 + $0x30] sm:$0xff] }
   0x6   :  { %897 = vmatprep.subr.bf16.mxu0 %v896_v6  ;;  %v1103_v19 = vld [vmem:[%s1289_s1 + $0x38] sm:$0xff]  ;;  %v1108_v20 = vld [vmem:[%s1291_s0] sm:$0xff]  ;;  %v1117_v21 = vld [vmem:[%s1291_s0 + $0x8] sm:$0xff] }
   0x7   :  { %v1122_v22 = vld [vmem:[%s1291_s0 + $0x10] sm:$0xff]  ;;  %v1131_v23 = vld [vmem:[%s1291_s0 + $0x18] sm:$0xff]  ;;  %v1136_v24 = vld [vmem:[%s1291_s0 + $0x20] sm:$0xff] }
   0x8   :  { %v1145_v25 = vld [vmem:[%s1291_s0 + $0x28] sm:$0xff]  ;;  %v1150_v26 = vld [vmem:[%s1291_s0 + $0x30] sm:$0xff]  ;;  %v1159_v27 = vld [vmem:[%s1291_s0 + $0x38] sm:$0xff] }
   0x9   :  { %899 = vmatpush3.bf16.msra.mxu0 %v896_v6  ;;  %v405_v28 = vld [vmem:[%s1292_s6] sm:$0xff]  ;;  %v406_v29 = vld [vmem:[%s1292_s6 + $0x8] sm:$0xff]  ;;  %v407_v31 = vld [vmem:[%s1292_s6 + $0x10] sm:$0xff] }
   0xa   :  { %901 = vmatprep.subr.bf16.mxu0 %v900_v9  ;;  %v908_v30 = vpack.c.bf16 %v406_v29, %v405_v28  ;;  %v408_v32 = vld [vmem:[%s1292_s6 + $0x18] sm:$0xff]  ;;  %v553_v34 = vld [vmem:[%s1293_s8] sm:$0xff]  ;;  %v554_v35 = vld [vmem:[%s1293_s8 + $0x8] sm:$0xff] }
   0xb   :  { %v912_v33 = vpack.c.bf16 %v408_v32, %v407_v31  ;;  %v1181_v36 = vpack.c.bf16 %v554_v35, %v553_v34  ;;  %v721_v37 = vld [vmem:[%s1294_s5] ss:$0 sm:$0xff] }
   0xc   :  { %821 = vmatmul.mubr.msk.f32.vlgmr.msra.gmra.mrb[0].mxu0 %vm66_vm0, %v1061_v12  ;;  %909 = vmatprep.subr.bf16.mxu1 %v908_v30 }
   0xd   :  { %903 = vmatpush3.bf16.msra.mxu0 %v900_v9  ;;  %823 = vmatprep.mubr.msk.f32.mxu0 %vm66_vm0, %v1066_v13 }
   0xe   :  { %905 = vmatprep.subr.bf16.mxu0 %v904_v14  ;;  %911 = vmatpush3.bf16.msra.mxu1 %v908_v30 }
   0xf   :  { %913 = vmatprep.subr.bf16.mxu1 %v912_v33 }
  0x10   :  { %824 = vmatmul.mubr.msk.f32.gmra.mrb[2].mxu0 %vm66_vm0, %v1075_v15 }
  0x11   :  { %826 = vmatprep.mubr.msk.f32.mxu0 %vm66_vm0, %v1080_v16  ;;  %907 = vmatpush3.bf16.msra.mxu0 %v904_v14 }
  0x12   :  { %915 = vmatpush3.bf16.msra.mxu1 %v912_v33 }
  0x13   :  { %917 = vmatprep.subr.bf16.mxu1 %v1181_v36 }
  0x14   :  { %827 = vmatmul.mubr.msk.f32.gmra.mrb[4].mxu0 %vm66_vm0, %v1089_v17 }
  0x15   :  { %829 = vmatprep.mubr.msk.f32.mxu0 %vm66_vm0, %v1094_v18 }
  0x18   :  { %830 = vmatmul.mubr.msk.f32.gmra.mrb[6].mxu0 %vm66_vm0, %v1103_v19 }
  0x19   :  { %840 = vmatprep.mubr.msk.f32.mxu0 %vm66_vm0, %v1108_v20 }
  0x1c   :  { %841 = vmatmul.mubr.msk.f32.vlgmr.msra.gmra.mrb[0].mxu0 %vm66_vm0, %v1117_v21 }
  0x1d   :  { %843 = vmatprep.mubr.msk.f32.mxu0 %vm66_vm0, %v1122_v22 }
  0x20   :  { %844 = vmatmul.mubr.msk.f32.gmra.mrb[2].mxu0 %vm66_vm0, %v1131_v23 }
  0x21   :  { %846 = vmatprep.mubr.msk.f32.mxu0 %vm66_vm0, %v1136_v24 }
  0x24   :  { %847 = vmatmul.mubr.msk.f32.gmra.mrb[4].mxu0 %vm66_vm0, %v1145_v25 }
  0x25   :  { %849 = vmatprep.mubr.msk.f32.mxu0 %vm66_vm0, %v1150_v26 }
  0x28   :  { %850 = vmatmul.mubr.msk.f32.gmra.mrb[6].mxu0 %vm66_vm0, %v1159_v27 }
  0xef   :  { %v842_v38 = vpop.f32.mrb[0].mxu0 }
  0xf0   :  { %v924_v39 = vadd.f32 %v842_v38, %v721_v37  ;;  %v286_v40 = vpop.f32.mrb[1].mxu0 }
  0xf1   :  { %v925_v41 = vadd.f32 %v721_v37, %v286_v40  ;;  %v556_v40 = vld [vmem:[%s1293_s8 + $0x18] sm:$0xff] }
  0xf2   :  { %v739_v42 = vmul.f32 -1.442695, %v924_v39  ;;  %v555_v39 = vld [vmem:[%s1293_s8 + $0x10] sm:$0xff] }
  0xf3   :  { %v738_v43 = vmul.f32 -1.442695, %v925_v41  ;;  %v845_v44 = vpop.f32.mrb[2].mxu0 }
  0xf4   :  { %940 = vpow2.f32 %v739_v42  ;;  %v926_v45 = vadd.f32 %v845_v44, %v721_v37  ;;  %v296_v46 = vpop.f32.mrb[3].mxu0 }
  0xf5   :  { %942 = vpow2.f32 %v738_v43  ;;  %v927_v47 = vadd.f32 %v721_v37, %v296_v46  ;;  %v920_v46 = vpack.c.bf16 %v556_v40, %v555_v39  ;;  %v693_v40 = vld [vmem:[%s1297_s2] sm:$0xff] }
  0xf6   :  { %v741_v48 = vmul.f32 -1.442695, %v926_v45 }
  0xf7   :  { %v740_v49 = vmul.f32 -1.442695, %v927_v47  ;;  %v848_v50 = vpop.f32.mrb[4].mxu0 }
  0xf8   :  { %944 = vpow2.f32 %v741_v48  ;;  %v928_v51 = vadd.f32 %v848_v50, %v721_v37  ;;  %v306_v52 = vpop.f32.mrb[5].mxu0 }
  0xf9   :  { %946 = vpow2.f32 %v740_v49  ;;  %v929_v53 = vadd.f32 %v721_v37, %v306_v52 }
  0xfa   :  { %v743_v54 = vmul.f32 -1.442695, %v928_v51 }
  0xfb   :  { %v742_v55 = vmul.f32 -1.442695, %v929_v53  ;;  %v851_v56 = vpop.f32.mrb[6].mxu0 }
  0xfc   :  { %948 = vpow2.f32 %v743_v54  ;;  %v930_v57 = vadd.f32 %v851_v56, %v721_v37  ;;  %v316_v58 = vpop.f32.mrb[7].mxu0 }
  0xfd   :  { %950 = vpow2.f32 %v742_v55  ;;  %v931_v59 = vadd.f32 %v721_v37, %v316_v58 }
  0xfe   :  { %v941_v60 = vpop.eup %940  ;;  %v745_v61 = vmul.f32 -1.442695, %v930_v57 }
  0xff   :  { %v943_v62 = vpop.eup %942  ;;  %v350_v63 = vadd.f32 1.0, %v941_v60  ;;  %v744_v0 = vmul.f32 -1.442695, %v931_v59 }
 0x100   :  { %v349_v1 = vadd.f32 1.0, %v943_v62  ;;  %952 = vpow2.f32 %v745_v61  ;;  %v746_v61 = vld [vmem:[%s1295_s7] ss:$0 sm:$0xff] }
 0x101   :  { %954 = vrcp.f32 %v350_v63 }
 0x102   :  { %v945_v2 = vpop.eup %944  ;;  %956 = vrcp.f32 %v349_v1 }
 0x103   :  { %v947_v3 = vpop.eup %946  ;;  %v352_v4 = vadd.f32 1.0, %v945_v2  ;;  %958 = vpow2.f32 %v744_v0 }
 0x104   :  { %v351_v6 = vadd.f32 1.0, %v947_v3 }
 0x105   :  { %960 = vrcp.f32 %v352_v4 }
 0x106   :  { %v949_v7 = vpop.eup %948  ;;  %962 = vrcp.f32 %v351_v6 }
 0x107   :  { %v951_v8 = vpop.eup %950  ;;  %v354_v9 = vadd.f32 1.0, %v949_v7 }
 0x108   :  { %v353_v10 = vadd.f32 1.0, %v951_v8 }
 0x109   :  { %964 = vrcp.f32 %v354_v9 }
 0x10a   :  { %v953_v11 = vpop.eup %952  ;;  %966 = vrcp.f32 %v353_v10 }
 0x10b   :  { %v955_v14 = vpop.eup %954  ;;  %v356_v28 = vadd.f32 1.0, %v953_v11 }
 0x10c   :  { %v957_v29 = vpop.eup %956  ;;  %v382_v30 = vsub.f32 1.0, %v955_v14  ;;  %v374_v42 = vmul.f32 %v955_v14, %v1117_v21 }
 0x10d   :  { %v959_v31 = vpop.eup %958  ;;  %968 = vrcp.f32 %v356_v28  ;;  %v381_v32 = vsub.f32 1.0, %v957_v29  ;;  %v373_v37 = vmul.f32 %v957_v29, %v1108_v20 }
 0x10e   :  { %v355_v33 = vadd.f32 1.0, %v959_v31  ;;  %v390_v34 = vmul.f32 %v382_v30, %v1061_v12 }
 0x10f   :  { %v961_v35 = vpop.eup %960  ;;  %v389_v38 = vmul.f32 %v381_v32, %v1042_v5 }
 0x110   :  { %v963_v41 = vpop.eup %962  ;;  %970 = vrcp.f32 %v355_v33  ;;  %v384_v43 = vsub.f32 1.0, %v961_v35  ;;  %v398_v45 = vadd.f32 %v390_v34, %v374_v42  ;;  %v376_v50 = vmul.f32 %v961_v35, %v1131_v23  ;;  %v755_v34 = vld [vmem:[%s1296_s9] ss:$0 sm:$0xff] }
 0x111   :  { %v397_v44 = vadd.f32 %v389_v38, %v373_v37  ;;  %v383_v12 = vsub.f32 1.0, %v963_v41  ;;  %v375_v47 = vmul.f32 %v963_v41, %v1122_v22  ;;  %v694_v37 = vld [vmem:[%s1297_s2 + $0x8] sm:$0xff] }
 0x112   :  { %v392_v20 = vmul.f32 %v384_v43, %v1075_v15 }
 0x113   :  { %v965_v5 = vpop.eup %964  ;;  %860 = vmatprep.mubr.msk.f32.mxu1 %vm66_vm0, %v397_v44  ;;  %v391_v48 = vmul.f32 %v383_v12, %v1066_v13  ;;  %v696_v12 = vld [vmem:[%s1297_s2 + $0x18] sm:$0xff] }
 0x114   :  { %v967_v49 = vpop.eup %966  ;;  %861 = vmatmul.mubr.msk.f32.vlgmr.msra.gmra.mrb[0].mxu1 %vm66_vm0, %v398_v45  ;;  %v386_v21 = vsub.f32 1.0, %v965_v5  ;;  %v400_v53 = vadd.f32 %v392_v20, %v376_v50  ;;  %v378_v23 = vmul.f32 %v965_v5, %v1145_v25  ;;  %v698_v50 = vld [vmem:[%s1297_s2 + $0x28] sm:$0xff] }
 0x115   :  { %v399_v51 = vadd.f32 %v391_v48, %v375_v47  ;;  %v385_v52 = vsub.f32 1.0, %v967_v49  ;;  %919 = vmatpush3.bf16.msra.mxu1 %v1181_v36  ;;  %v377_v22 = vmul.f32 %v967_v49, %v1136_v24 }
 0x116   :  { %v394_v15 = vmul.f32 %v386_v21, %v1089_v17  ;;  %921 = vmatprep.subr.bf16.mxu1 %v920_v46 }
 0x117   :  { %v969_v54 = vpop.eup %968  ;;  %863 = vmatprep.mubr.msk.f32.mxu1 %vm66_vm0, %v399_v51  ;;  %v393_v13 = vmul.f32 %v385_v52, %v1080_v16  ;;  %v697_v52 = vld [vmem:[%s1297_s2 + $0x20] sm:$0xff] }
 0x118   :  { %864 = vmatmul.mubr.msk.f32.gmra.mrb[2].mxu1 %vm66_vm0, %v400_v53  ;;  %v388_v55 = vsub.f32 1.0, %v969_v54  ;;  %v402_v36 = vadd.f32 %v394_v15, %v378_v23  ;;  %v380_v59 = vmul.f32 %v969_v54, %v1159_v27 }
 0x119   :  { %v401_v56 = vadd.f32 %v393_v13, %v377_v22  ;;  %923 = vmatpush3.bf16.msra.mxu1 %v920_v46  ;;  %v695_v46 = vld [vmem:[%s1297_s2 + $0x10] sm:$0xff]  ;;  %v700_v13 = vld [vmem:[%s1297_s2 + $0x38] sm:$0xff] }
 0x11a   :  { %v971_v57 = vpop.eup %970  ;;  %v396_v58 = vmul.f32 %v388_v55, %v1103_v19 }
 0x11b   :  { %866 = vmatprep.mubr.msk.f32.mxu1 %vm66_vm0, %v401_v56  ;;  %v387_v17 = vsub.f32 1.0, %v971_v57  ;;  %v379_v24 = vmul.f32 %v971_v57, %v1150_v26  ;;  %v699_v56 = vld [vmem:[%s1297_s2 + $0x30] sm:$0xff] }
 0x11c   :  { %867 = vmatmul.mubr.msk.f32.gmra.mrb[4].mxu1 %vm66_vm0, %v402_v36  ;;  %v404_v25 = vadd.f32 %v396_v58, %v380_v59 }
 0x11d   :  { %v395_v16 = vmul.f32 %v387_v17, %v1094_v18 }
 0x11f   :  { %v403_v60 = vadd.f32 %v395_v16, %v379_v24 }
 0x121   :  { %869 = vmatprep.mubr.msk.f32.mxu1 %vm66_vm0, %v403_v60 }
 0x122   :  { %870 = vmatmul.mubr.msk.f32.gmra.mrb[6].mxu1 %vm66_vm0, %v404_v25 }
 0x1e7   :  { %v862_v62 = vpop.f32.mrb[0].mxu1 }
 0x1e8   :  { %v512_v63 = vadd.f32 %v862_v62, %v746_v61  ;;  %v506_v0 = vpop.f32.mrb[1].mxu1 }
 0x1e9   :  { %v507_v19 = vadd.f32 %v746_v61, %v506_v0 }
 0x1ea   :  { %v546_v2 = vmax.f32 %v512_v63, 0.0 }
 0x1eb   :  { %v545_v1 = vmax.f32 %v507_v19, 0.0  ;;  %v865_v26 = vpop.f32.mrb[2].mxu1 }
 0x1ec   :  { %v522_v18 = vadd.f32 %v865_v26, %v746_v61  ;;  %v516_v3 = vpop.f32.mrb[3].mxu1 }
 0x1ed   :  { %v517_v27 = vadd.f32 %v746_v61, %v516_v3  ;;  %880 = vmatprep.mubr.msk.f32.mxu1 %vm66_vm0, %v545_v1 }
 0x1ee   :  { %881 = vmatmul.mubr.msk.f32.vlgmr.msra.gmra.mrb[8].mxu1 %vm66_vm0, %v546_v2  ;;  %v548_v7 = vmax.f32 %v522_v18, 0.0 }
 0x1ef   :  { %v547_v4 = vmax.f32 %v517_v27, 0.0  ;;  %v868_v6 = vpop.f32.mrb[4].mxu1 }
 0x1f0   :  { %v532_v8 = vadd.f32 %v868_v6, %v746_v61  ;;  %v526_v9 = vpop.f32.mrb[5].mxu1 }
 0x1f1   :  { %v527_v10 = vadd.f32 %v746_v61, %v526_v9  ;;  %883 = vmatprep.mubr.msk.f32.mxu1 %vm66_vm0, %v547_v4 }
 0x1f2   :  { %884 = vmatmul.mubr.msk.f32.gmra.mrb[10].mxu1 %vm66_vm0, %v548_v7  ;;  %v550_v14 = vmax.f32 %v532_v8, 0.0 }
 0x1f3   :  { %v549_v11 = vmax.f32 %v527_v10, 0.0 }
 0x1f5   :  { %v871_v28 = vpop.f32.mrb[6].mxu1  ;;  %886 = vmatprep.mubr.msk.f32.mxu1 %vm66_vm0, %v549_v11 }
 0x1f6   :  { %v542_v29 = vadd.f32 %v871_v28, %v746_v61  ;;  %v536_v30 = vpop.f32.mrb[7].mxu1  ;;  %887 = vmatmul.mubr.msk.f32.gmra.mrb[12].mxu1 %vm66_vm0, %v550_v14 }
 0x1f7   :  { %v537_v31 = vadd.f32 %v746_v61, %v536_v30 }
 0x1f8   :  { %v552_v33 = vmax.f32 %v542_v29, 0.0 }
 0x1f9   :  { %v551_v32 = vmax.f32 %v537_v31, 0.0 }
 0x1fb   :  { %889 = vmatprep.mubr.msk.f32.mxu1 %vm66_vm0, %v551_v32 }
 0x1fc   :  { %890 = vmatmul.mubr.msk.f32.gmra.mrb[14].mxu1 %vm66_vm0, %v552_v33 }
 0x2c1   :  { %v882_v35 = vpop.f32.mrb[8].mxu1 }
 0x2c2   :  { %v660_v38 = vadd.f32 %v882_v35, %v755_v34  ;;  %v654_v39 = vpop.f32.mrb[9].mxu1 }
 0x2c3   :  { %v655_v41 = vadd.f32 %v755_v34, %v654_v39 }
 0x2c4   :  { %v702_v42 = vadd.f32 %v694_v37, %v660_v38 }
 0x2c5   :  { %v701_v43 = vadd.f32 %v693_v40, %v655_v41  ;;  %v885_v44 = vpop.f32.mrb[10].mxu1 }
 0x2c6   :  { %710 = vst.msk [vmem:[%s1298_s10 + $0x8] sm:$0xff] %vm66_vm0, %v702_v42  ;;  %v670_v45 = vadd.f32 %v885_v44, %v755_v34  ;;  %v664_v20 = vpop.f32.mrb[11].mxu1 }
 0x2c7   :  { %709 = vst.msk [vmem:[%s1298_s10] sm:$0xff] %vm66_vm0, %v701_v43  ;;  %v665_v5 = vadd.f32 %v755_v34, %v664_v20 }
 0x2c8   :  { %v704_v47 = vadd.f32 %v696_v12, %v670_v45 }
 0x2c9   :  { %v703_v48 = vadd.f32 %v695_v46, %v665_v5  ;;  %v888_v49 = vpop.f32.mrb[12].mxu1 }
 0x2ca   :  { %712 = vst.msk [vmem:[%s1298_s10 + $0x18] sm:$0xff] %vm66_vm0, %v704_v47  ;;  %v680_v21 = vadd.f32 %v888_v49, %v755_v34  ;;  %v674_v51 = vpop.f32.mrb[13].mxu1 }
 0x2cb   :  { %711 = vst.msk [vmem:[%s1298_s10 + $0x10] sm:$0xff] %vm66_vm0, %v703_v48  ;;  %v675_v53 = vadd.f32 %v755_v34, %v674_v51 }
 0x2cc   :  { %v706_v15 = vadd.f32 %v698_v50, %v680_v21 }
 0x2cd   :  { %v705_v54 = vadd.f32 %v697_v52, %v675_v53 }
 0x2ce   :  { %714 = vst.msk [vmem:[%s1298_s10 + $0x28] sm:$0xff] %vm66_vm0, %v706_v15 }
 0x2cf   :  { %713 = vst.msk [vmem:[%s1298_s10 + $0x20] sm:$0xff] %vm66_vm0, %v705_v54  ;;  %v891_v22 = vpop.f32.mrb[14].mxu1 }
 0x2d0   :  { %v690_v23 = vadd.f32 %v891_v22, %v755_v34  ;;  %v684_v55 = vpop.f32.mrb[15].mxu1 }
 0x2d1   :  { %v685_v57 = vadd.f32 %v755_v34, %v684_v55 }
 0x2d2   :  { %v708_v36 = vadd.f32 %v700_v13, %v690_v23 }
 0x2d3   :  { %v707_v17 = vadd.f32 %v699_v56, %v685_v57 }
 0x2d4   :  { %716 = vst.msk [vmem:[%s1298_s10 + $0x38] sm:$0xff] %vm66_vm0, %v708_v36 }
 0x2d5   :  { %715 = vst.msk [vmem:[%s1298_s10 + $0x30] sm:$0xff] %vm66_vm0, %v707_v17 }

// kernel: gman_forward.12
= control target key start
LH: loop header
LB: loop body
LE: loop exit
PB: predicated region body
PF: predicated region fallthrough
CT: control target
= control target key end

     0   :  { %s2571_s21 = smov 0   ;;  %s2830_s0 = inlined_call_operand.vmem [shape: f32[8,8,32], index: 0, kind: input, shape index: {}]   ;;  %s2831_s1 = inlined_call_operand.vmem [shape: f32[8,8,16], index: 1, kind: input, shape index: {}]   ;;  %s2832_s2 = inlined_call_operand.vmem [shape: f32[32,48], index: 2, kind: input, shape index: {}]   ;;  %s2833_s3 = inlined_call_operand.vmem [shape: f32[16,48], index: 3, kind: input, shape index: {}]   ;;  %s2834_s4 = inlined_call_operand.vmem [shape: f32[1,48], index: 4, kind: input, shape index: {}]   ;;  %s2835_s5 = inlined_call_operand.vmem [shape: f32[32,48], index: 5, kind: input, shape index: {}]   ;;  %s2836_s6 = inlined_call_operand.vmem [shape: f32[16,48], index: 6, kind: input, shape index: {}]   ;;  %s2837_s7 = inlined_call_operand.vmem [shape: f32[1,48], index: 7, kind: input, shape index: {}]   ;;  %s2838_s8 = inlined_call_operand.vmem [shape: f32[48,48], index: 8, kind: input, shape index: {}]   ;;  %s2839_s9 = inlined_call_operand.vmem [shape: f32[1,48], index: 9, kind: input, shape index: {}]   ;;  %s2840_s10 = inlined_call_operand.vmem [shape: f32[48,32], index: 10, kind: input, shape index: {}]   ;;  %s2841_s11 = inlined_call_operand.vmem [shape: f32[1,32], index: 11, kind: input, shape index: {}]   ;;  %s2842_s12 = inlined_call_operand.vmem [shape: f32[8,8,32], index: 12, kind: output, shape index: {}]  }
   0x1 LB: > { %s2156_s22 = sadd.s32 4294967295, %s2497_s21   ;;  %p2160_p0 = scmp.ge.s32.totalorder %s2497_s21, 1  ;;  %s2497_s21 = sphi %s2571_s21, %s22_s21  }
   0x2   : > { %p370_p1 = scmp.lt.s32.totalorder %s2497_s21, 9 }
   0x4   : > { %p371_p2 = pnand %p2160_p0, %p370_p1 }
   0x5   : > { %v432_v0 = vld [vmem:[%s2833_s3] sm:$0xff] (!%p371_p2)  ;;  %v433_v1 = vld [vmem:[%s2833_s3 + $0x8] sm:$0xff] (!%p371_p2)  ;;  %p414_p3 = scmp.lt.s32.totalorder (!%p371_p2), %s2156_s22, 7  ;;  %v2499_v2 = vmov (!%p371_p2), 0.0|0.0   ;;  %vm2500_vm0 = vmmov (!%p371_p2), 0   ;;  %v2501_v4 = vmov (!%p371_p2), 0.0  }
   0x6   : > { %374 = sbr.rel (%p371_p2) target bundleno = 2822 (0xb06), region = 68  ;;  %2385 = vmatprep.subr.bf16.mxu1 (!%p371_p2), %v2499_v2  ;;  %v2386_v3 = vpack.c.bf16 (!%p371_p2), %v433_v1, %v432_v0  ;;  %2262 = vmatprep.mubr.msk.f32.mxu1 (!%p371_p2), %vm2500_vm0, %v2501_v4  ;;  %v428_v5 = vld [vmem:[%s2832_s2] sm:$0xff] (!%p371_p2)  ;;  %v429_v6 = vld [vmem:[%s2832_s2 + $0x8] sm:$0xff] (!%p371_p2)  ;;  %vm434_vm1 = vcmask (!%p371_p2), 130048   ;;  %v430_v8 = vld [vmem:[%s2832_s2 + $0x10] sm:$0xff] (!%p371_p2)  ;;  %vm508_vm2 = vcmask (!%p371_p2), 261120  }
   0x7   : > { %2394 = vmatprep.subr.bf16.mxu0 (!%p371_p2), %v2499_v2  ;;  %2280 = vmatprep.mubr.msk.f32.mxu0 (!%p371_p2), %vm2500_vm0, %v2501_v4  ;;  %v2389_v7 = vpack.c.bf16 (!%p371_p2), %v429_v6, %v428_v5  ;;  %v431_v9 = vld [vmem:[%s2832_s2 + $0x18] sm:$0xff] (!%p371_p2)  ;;  %v2166_v16 = vld [vmem:[%s2834_s4] ss:$0 sm:$0xff] (!%p371_p2)  ;;  %vm974_vm3 = vcmask (!%p371_p2), 195680   ;;  %vm750_vm4 = vcmask (!%p371_p2), 97280   ;;  %v595_v26 = vld [vmem:[%s2836_s6 + $0x8] sm:$0xff] (!%p371_p2) }
   0x8   : > { %2387 = vmatpush3.bf16.msra.mxu1 (!%p371_p2), %v2386_v3  ;;  %v2392_v11 = vpack.c.bf16 (!%p371_p2), %v431_v9, %v430_v8  ;;  %v594_v25 = vld [vmem:[%s2836_s6] sm:$0xff] (!%p371_p2)  ;;  %v591_v29 = vld [vmem:[%s2835_s5 + $0x8] sm:$0xff] (!%p371_p2)  ;;  %v592_v31 = vld [vmem:[%s2835_s5 + $0x10] sm:$0xff] (!%p371_p2)  ;;  %s2502_s23 = smov (!%p371_p2), 116   ;;  %vm1366_vm5 = vcmask (!%p371_p2), 294080   ;;  %vm1678_vm6 = vcmask (!%p371_p2), 392480  }
   0x9   : > { %2388 = vmatprep.subr.bf16.mxu1 (!%p371_p2), %v2499_v2  ;;  %v590_v27 = vld [vmem:[%s2835_s5] sm:$0xff] (!%p371_p2)  ;;  %v2395_v28 = vpack.c.bf16 (!%p371_p2), %v595_v26, %v594_v25  ;;  %v593_v32 = vld [vmem:[%s2835_s5 + $0x18] sm:$0xff] (!%p371_p2)  ;;  %vm815_vm7 = vcmask (!%p371_p2), 64512   ;;  %s2503_s26 = smov (!%p371_p2), 104   ;;  %vm900_vm8 = vcmask (!%p371_p2), 1043456   ;;  %vm2504_vm9 = vmmov (!%p371_p2), 1  }
   0xa   : > { %v2398_v30 = vpack.c.bf16 (!%p371_p2), %v591_v29, %v590_v27  ;;  %v2401_v34 = vpack.c.bf16 (!%p371_p2), %v593_v32, %v592_v31  ;;  %v2169_v45 = vld [vmem:[%s2837_s7] ss:$0 sm:$0xff] (!%p371_p2)  ;;  %vm2698_vm10 = vmpackc.low (!%p371_p2), %vm900_vm8, %vm2504_vm9  ;;  %vm2015_vm11 = vcmask (!%p371_p2), 392192  }
   0xb   : > { %2396 = vmatpush3.bf16.msra.mxu0 (!%p371_p2), %v2395_v28 }
   0xc   : > { %2397 = vmatprep.subr.bf16.mxu0 (!%p371_p2), %v2499_v2 }
   0xd   : > { %s2846_s22 = smov (!%p414_p3, %s2156_s22), 7 }
   0xe   : > { %s2598_s13 = sshll.u32 %s2846_s22, 3 }
   0xf   : > { %s421_s16 = scalar_lea.vmem %s2831_s1, %s2598_s13  ;;  %s417_s24 = scalar_lea.vmem %s2830_s0, %s2598_s13 }
  0x10   : > { %v427_v10 = vld [vmem:[%s421_s16] sm:$0xff]  ;;  %s2505_s16 = smov 92  }
  0x11   : > { %2263 = vmatmul.mubr.msk.f32.vlgmr.msra.gmra.mrb[0].mxu1 %vm434_vm1, %v427_v10  ;;  %v426_v12 = vld [vmem:[%s417_s24] sm:$0xff]  ;;  %2281 = vmatmul.mubr.msk.f32.vlgmr.msra.gmra.mrb[0].mxu0 %vm434_vm1, %v427_v10 }
  0x12   : > { %2390 = vmatpush3.bf16.msra.mxu1 %v2389_v7  ;;  %2273 = vmatprep.mubr.msk.f32.mxu1 %vm2500_vm0, %v2501_v4 }
  0x13   : > { %2391 = vmatprep.subr.bf16.mxu1 %v2499_v2  ;;  %2399 = vmatpush3.bf16.msra.mxu0 %v2398_v30 }
  0x14   : > { %2291 = vmatprep.mubr.msk.f32.mxu0 %vm2500_vm0, %v2501_v4  ;;  %2400 = vmatprep.subr.bf16.mxu0 %v2499_v2 }
  0x16   : > { %2393 = vmatpush3.bf16.msra.mxu1 %v2392_v11 }
  0x17   : > { %2402 = vmatpush3.bf16.msra.mxu0 %v2401_v34 }
  0x19   : > { %2274 = vmatmul.mubr.msk.f32.vlgmr.msra.gmra.mrb[2].mxu1 %vm508_vm2, %v426_v12 }
  0x1a   : > { %2292 = vmatmul.mubr.msk.f32.vlgmr.msra.gmra.mrb[2].mxu0 %vm508_vm2, %v426_v12 }
  0xe4   : > { %v504_v13 = vpop.f32.mrb[0].mxu1  ;;  %v662_v42 = vpop.f32.mrb[0].mxu0 }
  0xe5   : > { %v2264_v14 = vpop.f32.mrb[1].mxu1  ;;  %v2282_v43 = vpop.f32.mrb[1].mxu0 }
  0xec   : > { %v578_v15 = vpop.f32.mrb[2].mxu1 }
  0xed   : > { %v579_v17 = vadd.f32 %v578_v15, %v504_v13  ;;  %v2275_v18 = vpop.f32.mrb[3].mxu1  ;;  %v732_v44 = vpop.f32.mrb[2].mxu0 }
  0xee   : > { %v733_v46 = vadd.f32 %v732_v44, %v662_v42  ;;  %v2293_v47 = vpop.f32.mrb[3].mxu0 }
  0xef   : > { %v2622_v19 = vadd.f32 %v2166_v16, %v579_v17 }
  0xf0   : > { %v2660_v48 = vadd.f32 %v2169_v45, %v733_v46 }
  0xf1   : > { %v975_v20 = vsel %vm974_vm3, %v2622_v19, -inf  ;;  %v751_v21 = vsel %vm750_vm4, %v2622_v19, -inf }
  0xf2   : > { %976 = vmax.xlane.f32.xlu0 %v975_v20  ;;  %752 = vmax.xlane.f32.xlu1 %v751_v21 }
  0xf3   : > { %2294 = vmatprep.subr.mxu1 %v2660_v48 }
  0xf4   : > { %2295 = vmatpush3.msra.mxu1 %v2660_v48 }
  0xf5   : > { %2403 = vmatprep.subr.bf16.mxu1 %v2499_v2 }
 0x17f   : > { %v977_v22 = vpop.xlane.xlu0 %976  ;;  %v753_v35 = vpop.xlane.xlu1 %752 }
 0x180   : > { %v978_v23 = vsub.f32 %v2622_v19, %v977_v22  ;;  %v754_v36 = vsub.f32 %v2622_v19, %v753_v35 }
 0x182   : > { %v979_v24 = vmul.f32 1.442695, %v978_v23  ;;  %v755_v37 = vmul.f32 1.442695, %v754_v36 }
 0x184   : > { %2459 = vpow2.f32 %v979_v24 }
 0x185   : > { %2461 = vpow2.f32 %v755_v37 }
 0x18e   : > { %v2460_v33 = vpop.eup %2459 }
 0x18f   : > { %982 = vrot.lane.b32.xlu0 %v2460_v33, %s2502_s23  ;;  %v2462_v40 = vpop.eup %2461 }
 0x190   : > { %v757_v41 = vsel %vm750_vm4, %v2462_v40, 0.0 }
 0x193   : > { %1048 = vrot.lane.b32.xlu0 %v2660_v48, %s2502_s23 }
 0x201   : > { %v983_v38 = vpop.permute.xlu0 %982 }
 0x202   : > { %v985_v39 = vsel %vm750_vm4, %v983_v38, 0.0  ;;  %v1367_v38 = vsel %vm1366_vm5, %v2622_v19, -inf }
 0x203   : > { %986 = vadd.xlane.f32.xlu1 %v985_v39  ;;  %v1679_v39 = vsel %vm1678_vm6, %v2622_v19, -inf }
 0x205   : > { %v1049_v36 = vpop.permute.xlu0 %1048 }
 0x206   : > { %2306 = vmatprep.subr.mxu0 %v1049_v36 }
 0x207   : > { %758 = vadd.xlane.f32.xlu1 %v757_v41  ;;  %2307 = vmatpush3.msra.mxu0 %v1049_v36 }
 0x208   : > { %2411 = vmatprep.subr.bf16.mxu0 %v2499_v2 }
 0x290   : > { %v987_v49 = vpop.xlane.xlu1 %986 }
 0x291   : > { %2463 = vrcp.f32 %v987_v49 }
 0x294   : > { %v759_v50 = vpop.xlane.xlu1 %758 }
 0x295   : > { %2465 = vrcp.f32 %v759_v50 }
 0x29b   : > { %v2464_v51 = vpop.eup %2463 }
 0x29c   : > { %v989_v52 = vmul.f32 %v2464_v51, %v2460_v33  ;;  %v2004_v51 = vld [vmem:[%s2840_s10 + $0x10] sm:$0xff] }
 0x29e   : > { %v2667_v53 = vmul.f32 0.73299724, %v989_v52 }
 0x29f   : > { %v2466_v54 = vpop.eup %2465 }
 0x2a0   : > { %v991_v55 = vsel %vm974_vm3, %v2667_v53, -inf  ;;  %v761_v56 = vmul.f32 %v2466_v54, %v2462_v40 }
 0x2a1   : > { %v992_v57 = vrot.slane %v991_v55, 4 }
 0x2a2   : > { %v2671_v58 = vmul.f32 0.73299724, %v761_v56 }
 0x2a3   : > { %v993_v59 = vmax.f32 %v991_v55, %v992_v57 }
 0x2a4   : > { %v763_v60 = vsel %vm750_vm4, %v2671_v58, -inf }
 0x2a5   : > { %v994_v61 = vrot.slane %v993_v59, 2  ;;  %v764_v62 = vrot.slane %v763_v60, 4 }
 0x2a7   : > { %v995_v63 = vmax.f32 %v993_v59, %v994_v61  ;;  %v765_v1 = vmax.f32 %v763_v60, %v764_v62  ;;  %v745_v60 = vld [vmem:[%s2838_s8 + $0x8] sm:$0xff] }
 0x2a8   : > { %v1212_v62 = vrot.slane %v745_v60, 4 }
 0x2a9   : > { %v996_v0 = vrot.slane %v995_v63, 1  ;;  %v766_v6 = vrot.slane %v765_v1, 2 }
 0x2ab   : > { %v997_v3 = vmax.f32 %v995_v63, %v996_v0  ;;  %v767_v8 = vmax.f32 %v765_v1, %v766_v6  ;;  %v746_v63 = vld [vmem:[%s2838_s8 + $0x10] sm:$0xff] }
 0x2ac   : > { %v1213_v0 = vrot.slane %v746_v63, 4 }
 0x2ad   : > { %v998_v5 = vsub.f32 %v2667_v53, %v997_v3  ;;  %v768_v9 = vrot.slane %v767_v8, 1 }
 0x2ae   : > { %v1214_v1 = vsel %vm900_vm8, %v1212_v62, %v1213_v0 }
 0x2af   : > { %v999_v7 = vmul.f32 1.442695, %v998_v5  ;;  %v769_v10 = vmax.f32 %v767_v8, %v768_v9  ;;  %v2412_v3 = vpack.c.bf16 %v1213_v0, %v1214_v1 }
 0x2b1   : > { %2467 = vpow2.f32 %v999_v7  ;;  %v770_v14 = vsub.f32 %v2671_v58, %v769_v10 }
 0x2b3   : > { %v771_v17 = vmul.f32 1.442695, %v770_v14 }
 0x2b5   : > { %2469 = vpow2.f32 %v771_v17 }
 0x2bb   : > { %v2468_v11 = vpop.eup %2467 }
 0x2bc   : > { %v1001_v12 = vsel %vm974_vm3, %v2468_v11, 0.0 }
 0x2bd   : > { %v1002_v13 = vrot.slane %v1001_v12, 4 }
 0x2bf   : > { %v1003_v15 = vadd.f32 %v1002_v13, %v1001_v12  ;;  %v2470_v22 = vpop.eup %2469 }
 0x2c0   : > { %v773_v24 = vsel %vm750_vm4, %v2470_v22, 0.0 }
 0x2c1   : > { %v1004_v16 = vrot.slane %v1003_v15, 2  ;;  %v774_v27 = vrot.slane %v773_v24, 4 }
 0x2c3   : > { %v1005_v18 = vadd.f32 %v1004_v16, %v1003_v15  ;;  %v775_v28 = vadd.f32 %v774_v27, %v773_v24 }
 0x2c5   : > { %v1006_v20 = vrot.slane %v1005_v18, 1  ;;  %v776_v29 = vrot.slane %v775_v28, 2 }
 0x2c7   : > { %v1007_v21 = vadd.f32 %v1006_v20, %v1005_v18  ;;  %v777_v30 = vadd.f32 %v776_v29, %v775_v28 }
 0x2c9   : > { %2471 = vrcp.f32 %v1007_v21  ;;  %v778_v31 = vrot.slane %v777_v30, 1 }
 0x2cb   : > { %v779_v32 = vadd.f32 %v778_v31, %v777_v30 }
 0x2cd   : > { %2473 = vrcp.f32 %v779_v32 }
 0x2d3   : > { %v2472_v23 = vpop.eup %2471 }
 0x2d4   : > { %v1009_v25 = vmul.f32 %v2472_v23, %v2468_v11 }
 0x2d6   : > { %v1010_v26 = vmul.f32 0.73299724, %v1009_v25 }
 0x2d7   : > { %v2474_v33 = vpop.eup %2473 }
 0x2d8   : > { %1012 = vrot.lane.b32.xlu1 %v1010_v26, %s2502_s23  ;;  %v781_v34 = vmul.f32 %v2474_v33, %v2470_v22 }
 0x2da   : > { %v782_v35 = vmul.f32 0.73299724, %v781_v34 }
 0x301   : > { %783 = vxpose.xlu1.b32.start.end [1/1] (short) (narrow) %v782_v35, 16 }
 0x34a   : > { %v1013_v37 = vpop.permute.xlu1 %1012 }
 0x34b   : > { %1015 = vxpose.xlu0.b32.start.end [1/1] (short) (narrow) %v1013_v37, 16 }
 0x37c   : > { %1368 = vmax.xlane.f32.xlu0 %v1367_v38 }
 0x380   : > { %1680 = vmax.xlane.f32.xlu0 %v1679_v39 }
 0x381   : > { %v799_v40 = vpop.trf.xlu1 }
 0x382   : > { %2296 = vmatprep.mubr.msk.f32.mxu1 %vm815_vm7, %v799_v40 }
 0x385   : > { %v800_v41 = vpop.trf.xlu1 }
 0x386   : > { %2297 = vmatmul.mubr.msk.f32.vlgmr.msra.gmra.mrb[4].mxu1 %vm815_vm7, %v800_v41 }
 0x387   : > { %2303 = vmatprep.mubr.msk.f32.mxu1 %vm2500_vm0, %v2501_v4 }
 0x3cb   : > { %v1031_v42 = vpop.trf.xlu0 }
 0x3cc   : > { %2308 = vmatprep.mubr.msk.f32.mxu0 %vm815_vm7, %v1031_v42 }
 0x3cf   : > { %v1032_v43 = vpop.trf.xlu0 }
 0x3d0   : > { %2309 = vmatmul.mubr.msk.f32.vlgmr.msra.gmra.mrb[4].mxu0 %vm815_vm7, %v1032_v43 }
 0x3d1   : > { %2322 = vmatprep.mubr.msk.f32.mxu0 %vm2500_vm0, %v2501_v4  ;;  %2414 = vmatpush3.bf16.msk.msra.mxu0 %vm2698_vm10, %v2412_v3 }
 0x409   : > { %v1369_v44 = vpop.xlane.xlu0 %1368 }
 0x40a   : > { %v1370_v45 = vsub.f32 %v2622_v19, %v1369_v44 }
 0x40c   : > { %v1371_v46 = vmul.f32 1.442695, %v1370_v45 }
 0x40d   : > { %v1681_v28 = vpop.xlane.xlu0 %1680 }
 0x40e   : > { %2475 = vpow2.f32 %v1371_v46  ;;  %v1682_v30 = vsub.f32 %v2622_v19, %v1681_v28 }
 0x410   : > { %v1683_v31 = vmul.f32 1.442695, %v1682_v30 }
 0x418   : > { %v2476_v47 = vpop.eup %2475 }
 0x419   : > { %1374 = vrot.lane.b32.xlu1 %v2476_v47, %s2503_s26 }
 0x41d   : > { %1133 = vrot.lane.b32.xlu1 %v2667_v53, %s2502_s23 }
 0x459   : > { %v2298_v49 = vpop.f32.mrb[4].mxu1 }
 0x45a   : > { %v888_v50 = vpop.f32.mrb[5].mxu1 }
 0x45b   : > { %v2404_v52 = vpack.c.bf16 %v2298_v49, %v888_v50 }
 0x45d   : > { %2406 = vmatpush3.bf16.msk.msra.mxu1 %vm2698_vm10, %v2404_v52 }
 0x45e   : > { %2407 = vmatprep.subr.bf16.mxu1 %v2499_v2 }
 0x460   : > { %2304 = vmatmul.mubr.msk.f32.vlgmr.msra.gmra.mrb[6].mxu1 %vm750_vm4, %v2671_v58  ;;  %v744_v58 = vld [vmem:[%s2838_s8] sm:$0xff] }
 0x461   : > { %2315 = vmatprep.mubr.msk.f32.mxu1 %vm2500_vm0, %v2501_v4  ;;  %v2416_v61 = vpack.c.bf16 %v745_v60, %v744_v58 }
 0x48b   : > { %v1375_v53 = vpop.permute.xlu1 %1374 }
 0x48c   : > { %v1377_v54 = vsel %vm750_vm4, %v1375_v53, 0.0 }
 0x48d   : > { %1378 = vadd.xlane.f32.xlu1 %v1377_v54 }
 0x48f   : > { %v1134_v59 = vpop.permute.xlu1 %1133 }
 0x4a3   : > { %v2310_v55 = vpop.f32.mrb[4].mxu0 }
 0x4a4   : > { %v1123_v56 = vpop.f32.mrb[5].mxu0 }
 0x4a5   : > { %v2408_v57 = vpack.c.bf16 %v2310_v55, %v1123_v56 }
 0x4a7   : > { %2410 = vmatpush3.bf16.msk.msra.mxu1 %vm2698_vm10, %v2408_v57 }
 0x4a8   : > { %2415 = vmatprep.subr.bf16.mxu1 %v2499_v2 }
 0x4aa   : > { %2316 = vmatmul.mubr.msk.f32.vlgmr.msra.gmra.mrb[8].mxu1 %vm750_vm4, %v1134_v59 }
 0x4ab   : > { %2329 = vmatprep.mubr.msk.f32.mxu1 %vm2500_vm0, %v2501_v4  ;;  %2418 = vmatpush3.bf16.msk.msra.mxu1 %vm2698_vm10, %v2416_v61 }
 0x4ac   : > { %2419 = vmatprep.subr.bf16.mxu1 %v2499_v2 }
 0x51a   : > { %v1379_v5 = vpop.xlane.xlu1 %1378 }
 0x51b   : > { %2477 = vrcp.f32 %v1379_v5 }
 0x525   : > { %v2478_v6 = vpop.eup %2477 }
 0x526   : > { %v1381_v7 = vmul.f32 %v2478_v6, %v2476_v47 }
 0x528   : > { %v2731_v8 = vmul.f32 0.73299724, %v1381_v7 }
 0x52a   : > { %v1383_v9 = vsel %vm1366_vm5, %v2731_v8, -inf }
 0x52b   : > { %v1384_v10 = vrot.slane %v1383_v9, 4 }
 0x52d   : > { %v1385_v11 = vmax.f32 %v1383_v9, %v1384_v10 }
 0x52f   : > { %v1386_v12 = vrot.slane %v1385_v11, 2 }
 0x531   : > { %v1387_v13 = vmax.f32 %v1385_v11, %v1386_v12 }
 0x533   : > { %v970_v14 = vpop.f32.mrb[6].mxu1  ;;  %v1388_v15 = vrot.slane %v1387_v13, 1 }
 0x534   : > { %v2305_v16 = vpop.f32.mrb[7].mxu1  ;;  %2330 = vmatmul.mubr.msk.f32.vlgmr.msra.gmra.mrb[10].mxu1 %vm750_vm4, %v970_v14  ;;  %v747_v14 = vld [vmem:[%s2838_s8 + $0x18] sm:$0xff] }
 0x535   : > { %v1389_v17 = vmax.f32 %v1387_v13, %v1388_v15  ;;  %2341 = vmatprep.mubr.msk.f32.mxu1 %vm2500_vm0, %v2501_v4  ;;  %v748_v15 = vld [vmem:[%s2838_s8 + $0x20] sm:$0xff] }
 0x536   : > { %v2424_v16 = vpack.c.bf16 %v748_v15, %v747_v14 }
 0x537   : > { %v1390_v18 = vsub.f32 %v2731_v8, %v1389_v17 }
 0x539   : > { %v1391_v20 = vmul.f32 1.442695, %v1390_v18 }
 0x53b   : > { %2479 = vpow2.f32 %v1391_v20 }
 0x545   : > { %v2480_v21 = vpop.eup %2479 }
 0x546   : > { %v1393_v22 = vsel %vm1366_vm5, %v2480_v21, 0.0 }
 0x547   : > { %v1394_v23 = vrot.slane %v1393_v22, 4 }
 0x549   : > { %v1395_v24 = vadd.f32 %v1394_v23, %v1393_v22 }
 0x54b   : > { %v1396_v25 = vrot.slane %v1395_v24, 2 }
 0x54d   : > { %v1397_v26 = vadd.f32 %v1396_v25, %v1395_v24  ;;  %v1914_v25 = vrot.slane %v748_v15, 4 }
 0x54f   : > { %v1398_v27 = vrot.slane %v1397_v26, 1 }
 0x551   : > { %v1399_v29 = vadd.f32 %v1398_v27, %v1397_v26  ;;  %v749_v26 = vld [vmem:[%s2838_s8 + $0x28] sm:$0xff] }
 0x552   : > { %v1915_v27 = vrot.slane %v749_v26, 4 }
 0x553   : > { %2481 = vrcp.f32 %v1399_v29 }
 0x554   : > { %2483 = vpow2.f32 %v1683_v31  ;;  %v1916_v28 = vsel %vm900_vm8, %v1914_v25, %v1915_v27 }
 0x555   : > { %v2432_v29 = vpack.c.bf16 %v1915_v27, %v1916_v28 }
 0x55d   : > { %v2482_v32 = vpop.eup %2481 }
 0x55e   : > { %v1401_v33 = vmul.f32 %v2482_v32, %v2480_v21  ;;  %v2484_v35 = vpop.eup %2483 }
 0x560   : > { %v1402_v34 = vmul.f32 0.73299724, %v1401_v33 }
 0x562   : > { %1404 = vrot.lane.b32.xlu0 %v1402_v34, %s2503_s26  ;;  %v2002_v34 = vld [vmem:[%s2840_s10] sm:$0xff] }
 0x566   : > { %1686 = vrot.lane.b32.xlu0 %v2484_v35, %s2505_s16 }
 0x56a   : > { %1439 = vrot.lane.b32.xlu0 %v2660_v48, %s2503_s26 }
 0x57d   : > { %v1206_v36 = vpop.f32.mrb[8].mxu1 }
 0x57e   : > { %v2317_v37 = vpop.f32.mrb[9].mxu1  ;;  %2323 = vmatmul.mubr.msk.f32.vlgmr.msra.gmra.mrb[6].mxu0 %vm750_vm4, %v1206_v36 }
 0x57f   : > { %v2005_v37 = vld [vmem:[%s2840_s10 + $0x18] sm:$0xff] }
 0x5d4   : > { %v1405_v19 = vpop.permute.xlu0 %1404 }
 0x5d5   : > { %1407 = vxpose.xlu0.b32.start.end [1/1] (short) (narrow) %v1405_v19, 16  ;;  %v2439_v19 = vpack.c.bf16 %v2005_v37, %v2004_v51 }
 0x5d8   : > { %v1687_v38 = vpop.permute.xlu0 %1686 }
 0x5d9   : > { %v1689_v39 = vsel %vm750_vm4, %v1687_v38, 0.0 }
 0x5da   : > { %1690 = vadd.xlane.f32.xlu1 %v1689_v39 }
 0x5dc   : > { %v1440_v40 = vpop.permute.xlu0 %1439 }
 0x5dd   : > { %2332 = vmatprep.subr.mxu0 %v1440_v40 }
 0x5de   : > { %2333 = vmatpush3.msra.mxu0 %v1440_v40 }
 0x5df   : > { %2423 = vmatprep.subr.bf16.mxu0 %v2499_v2 }
 0x607   : > { %v1362_v41 = vpop.f32.mrb[10].mxu1 }
 0x608   : > { %v2331_v42 = vpop.f32.mrb[11].mxu1 }
 0x609   : > { %v2006_v42 = vld [vmem:[%s2840_s10 + $0x20] sm:$0xff] }
 0x651   : > { %v1287_v43 = vpop.f32.mrb[6].mxu0 }
 0x652   : > { %v2748_v44 = vadd.f32 %v1362_v41, %v1287_v43  ;;  %v2324_v45 = vpop.f32.mrb[7].mxu0  ;;  %v2007_v43 = vld [vmem:[%s2840_s10 + $0x28] sm:$0xff] }
 0x653   : > { %v2442_v45 = vpack.c.bf16 %v2007_v43, %v2006_v42 }
 0x655   : > { %v1423_v46 = vpop.trf.xlu0 }
 0x656   : > { %2334 = vmatprep.mubr.msk.f32.mxu0 %vm815_vm7, %v1423_v46 }
 0x659   : > { %v1424_v47 = vpop.trf.xlu0 }
 0x65a   : > { %2335 = vmatmul.mubr.msk.f32.vlgmr.msra.gmra.mrb[8].mxu0 %vm815_vm7, %v1424_v47 }
 0x65b   : > { %2348 = vmatprep.mubr.msk.f32.mxu0 %vm2500_vm0, %v2501_v4  ;;  %2426 = vmatpush3.bf16.msk.msra.mxu0 %vm2698_vm10, %v2424_v16 }
 0x65c   : > { %2427 = vmatprep.subr.bf16.mxu0 %v2499_v2 }
 0x667   : > { %v1691_v49 = vpop.xlane.xlu1 %1690 }
 0x668   : > { %2485 = vrcp.f32 %v1691_v49 }
 0x672   : > { %v2486_v50 = vpop.eup %2485 }
 0x673   : > { %v1693_v52 = vmul.f32 %v2486_v50, %v2484_v35  ;;  %v2003_v35 = vld [vmem:[%s2840_s10 + $0x8] sm:$0xff]  ;;  %v2195_v50 = vld [vmem:[%s2841_s11] ss:$0 sm:$0xff] }
 0x674   : > { %v2436_v36 = vpack.c.bf16 %v2003_v35, %v2002_v34 }
 0x675   : > { %v1694_v53 = vmul.f32 0.73299724, %v1693_v52 }
 0x677   : > { %v1695_v54 = vsel %vm1678_vm6, %v1694_v53, -inf }
 0x678   : > { %v1696_v55 = vrot.slane %v1695_v54, 4 }
 0x67a   : > { %v1697_v56 = vmax.f32 %v1695_v54, %v1696_v55 }
 0x67c   : > { %v1698_v57 = vrot.slane %v1697_v56, 2 }
 0x67e   : > { %v1699_v59 = vmax.f32 %v1697_v56, %v1698_v57 }
 0x680   : > { %v1700_v58 = vrot.slane %v1699_v59, 1 }
 0x682   : > { %v1701_v60 = vmax.f32 %v1699_v59, %v1700_v58 }
 0x684   : > { %v1702_v61 = vsub.f32 %v1694_v53, %v1701_v60 }
 0x686   : > { %v1703_v62 = vmul.f32 1.442695, %v1702_v61 }
 0x688   : > { %2487 = vpow2.f32 %v1703_v62 }
 0x692   : > { %v2488_v63 = vpop.eup %2487 }
 0x693   : > { %v1705_v0 = vsel %vm1678_vm6, %v2488_v63, 0.0 }
 0x694   : > { %v1706_v1 = vrot.slane %v1705_v0, 4 }
 0x696   : > { %v1707_v3 = vadd.f32 %v1706_v1, %v1705_v0 }
 0x698   : > { %v1708_v5 = vrot.slane %v1707_v3, 2 }
 0x69a   : > { %v1709_v6 = vadd.f32 %v1708_v5, %v1707_v3 }
 0x69c   : > { %v1710_v7 = vrot.slane %v1709_v6, 1 }
 0x69e   : > { %v1711_v9 = vadd.f32 %v1710_v7, %v1709_v6 }
 0x6a0   : > { %2489 = vrcp.f32 %v1711_v9 }
 0x6aa   : > { %v2490_v10 = vpop.eup %2489 }
 0x6ab   : > { %v1713_v11 = vmul.f32 %v2490_v10, %v2488_v63 }
 0x6ad   : > { %v1714_v12 = vmul.f32 0.73299724, %v1713_v11 }
 0x6af   : > { %1716 = vrot.lane.b32.xlu1 %v1714_v12, %s2505_s16 }
 0x6b3   : > { %1524 = vrot.lane.b32.xlu1 %v2731_v8, %s2503_s26  ;;  %s425_s26 = scalar_lea.vmem %s2842_s12, %s2598_s13 }
 0x6b7   : > { %1751 = vrot.lane.b32.xlu1 %v2660_v48, %s2505_s16 }
 0x6bb   : > { %1836 = vrot.lane.b32.xlu1 %v1694_v53, %s2505_s16 }
 0x721   : > { %v1717_v13 = vpop.permute.xlu1 %1716 }
 0x722   : > { %1719 = vxpose.xlu0.b32.start.end [1/1] (short) (narrow) %v1717_v13, 16 }
 0x725   : > { %v1525_v8 = vpop.permute.xlu1 %1524 }
 0x729   : > { %v1752_v20 = vpop.permute.xlu1 %1751 }
 0x72d   : > { %v2336_v48 = vpop.f32.mrb[8].mxu0  ;;  %v1837_v33 = vpop.permute.xlu1 %1836 }
 0x72e   : > { %v1514_v17 = vpop.f32.mrb[9].mxu0 }
 0x72f   : > { %v2420_v18 = vpack.c.bf16 %v2336_v48, %v1514_v17 }
 0x731   : > { %2422 = vmatpush3.bf16.msk.msra.mxu1 %vm2698_vm10, %v2420_v18 }
 0x732   : > { %2351 = vmatprep.subr.mxu1 %v1752_v20 }
 0x734   : > { %2342 = vmatmul.mubr.msk.f32.vlgmr.msra.gmra.mrb[12].mxu1 %vm750_vm4, %v1525_v8 }
 0x735   : > { %2352 = vmatpush3.msra.mxu1 %v1752_v20 }
 0x736   : > { %2431 = vmatprep.subr.bf16.mxu1 %v2499_v2 }
 0x7a2   : > { %v1735_v21 = vpop.trf.xlu0 }
 0x7a3   : > { %2353 = vmatprep.mubr.msk.f32.mxu1 %vm815_vm7, %v1735_v21 }
 0x7a6   : > { %v1736_v22 = vpop.trf.xlu0 }
 0x7a7   : > { %2354 = vmatmul.mubr.msk.f32.vlgmr.msra.gmra.mrb[14].mxu1 %vm815_vm7, %v1736_v22 }
 0x7a8   : > { %2367 = vmatprep.mubr.msk.f32.mxu1 %vm2500_vm0, %v2501_v4  ;;  %2434 = vmatpush3.bf16.msk.msra.mxu1 %vm2698_vm10, %v2432_v29 }
 0x807   : > { %v1597_v23 = vpop.f32.mrb[12].mxu1 }
 0x808   : > { %v2343_v24 = vpop.f32.mrb[13].mxu1  ;;  %2349 = vmatmul.mubr.msk.f32.vlgmr.msra.gmra.mrb[10].mxu0 %vm750_vm4, %v1597_v23 }
 0x809   : > { %2360 = vmatprep.mubr.msk.f32.mxu0 %vm2500_vm0, %v2501_v4 }
 0x87a   : > { %v2355_v30 = vpop.f32.mrb[14].mxu1 }
 0x87b   : > { %v1826_v31 = vpop.f32.mrb[15].mxu1 }
 0x87c   : > { %v2428_v32 = vpack.c.bf16 %v2355_v30, %v1826_v31 }
 0x87e   : > { %2430 = vmatpush3.bf16.msk.msra.mxu0 %vm2698_vm10, %v2428_v32 }
 0x87f   : > { %2435 = vmatprep.subr.bf16.mxu0 %v2499_v2 }
 0x881   : > { %2361 = vmatmul.mubr.msk.f32.vlgmr.msra.gmra.mrb[12].mxu0 %vm750_vm4, %v1837_v33 }
 0x882   : > { %2382 = vmatprep.mubr.msk.f32.mxu0 %vm2500_vm0, %v2501_v4  ;;  %2437 = vmatpush3.bf16.msra.mxu0 %v2436_v36 }
 0x883   : > { %2438 = vmatprep.subr.bf16.mxu0 %v2499_v2 }
 0x886   : > { %2440 = vmatpush3.bf16.msra.mxu0 %v2439_v19 }
 0x887   : > { %2441 = vmatprep.subr.bf16.mxu0 %v2499_v2  ;;  %v2194_v2 = vld [vmem:[%s2839_s9] ss:$0 sm:$0xff] }
 0x88a   : > { %2443 = vmatpush3.bf16.msra.mxu0 %v2442_v45 }
 0x8db   : > { %v1673_v4 = vpop.f32.mrb[10].mxu0 }
 0x8dc   : > { %v1677_v38 = vadd.f32 %v1673_v4, %v2748_v44  ;;  %v2350_v39 = vpop.f32.mrb[11].mxu0 }
 0x954   : > { %v1909_v40 = vpop.f32.mrb[12].mxu0 }
 0x955   : > { %v2362_v41 = vpop.f32.mrb[13].mxu0  ;;  %2368 = vmatmul.mubr.msk.f32.vlgmr.msra.gmra.mrb[16].mxu1 %vm750_vm4, %v1909_v40 }
 0xa28   : > { %v1989_v44 = vpop.f32.mrb[16].mxu1 }
 0xa29   : > { %v1993_v46 = vadd.f32 %v1989_v44, %v1677_v38  ;;  %v2369_v47 = vpop.f32.mrb[17].mxu1 }
 0xa2b   : > { %v2001_v49 = vadd.f32 %v2194_v2, %v1993_v46 }
 0xa2d   : > { %2383 = vmatmul.mubr.msk.f32.vlgmr.msra.gmra.mrb[14].mxu0 %vm2015_vm11, %v2001_v49 }
 0xb00   : > { %v2085_v52 = vpop.f32.mrb[14].mxu0 }
 0xb01   : > { %v2086_v53 = vadd.f32 %v2195_v50, %v2085_v52  ;;  %v2384_v54 = vpop.f32.mrb[15].mxu0 }
 0xb03   : > { %v2089_v55 = vmax.f32 %v2086_v53, 0.0 }
 0xb05   : > { %2090 = vst.msk [vmem:[%s425_s26] sm:$0xff] %vm508_vm2, %v2089_v55 }
 0xb06 PF: > { %s22_s21 = sadd.s32 1, %s2497_s21  }
 0xb07   : > { %p19_p4 = scmp.ge.s32.totalorder %s22_s21, 10  }
 0xb09   :  { %21 = sbr.rel (!%p19_p4) target bundleno = 1 (0x1), region = 101 }

// kernel: gman_forward.15
= control target key start
LH: loop header
LB: loop body
LE: loop exit
PB: predicated region body
PF: predicated region fallthrough
CT: control target
= control target key end

     0   :  { %s2173_s25 = smov 0   ;;  %s2363_s0 = inlined_call_operand.vmem [shape: f32[16,4,32], index: 0, kind: input, shape index: {}]   ;;  %s2364_s1 = inlined_call_operand.vmem [shape: f32[16,4,16], index: 1, kind: input, shape index: {}]   ;;  %s2365_s2 = inlined_call_operand.vmem [shape: f32[16,4,16], index: 2, kind: input, shape index: {}]   ;;  %s2366_s3 = inlined_call_operand.vmem [shape: f32[16,32], index: 3, kind: input, shape index: {}]   ;;  %s2367_s4 = inlined_call_operand.vmem [shape: f32[1,32], index: 4, kind: input, shape index: {}]   ;;  %s2368_s5 = inlined_call_operand.vmem [shape: f32[16,32], index: 5, kind: input, shape index: {}]   ;;  %s2369_s6 = inlined_call_operand.vmem [shape: f32[1,32], index: 6, kind: input, shape index: {}]   ;;  %s2370_s7 = inlined_call_operand.vmem [shape: f32[32,32], index: 7, kind: input, shape index: {}]   ;;  %s2371_s8 = inlined_call_operand.vmem [shape: f32[1,32], index: 8, kind: input, shape index: {}]   ;;  %s2372_s9 = inlined_call_operand.vmem [shape: f32[32,32], index: 9, kind: input, shape index: {}]   ;;  %s2373_s10 = inlined_call_operand.vmem [shape: f32[1,32], index: 10, kind: input, shape index: {}]   ;;  %s2374_s11 = inlined_call_operand.vmem [shape: f32[32,32], index: 11, kind: input, shape index: {}]   ;;  %s2375_s12 = inlined_call_operand.vmem [shape: f32[1,32], index: 12, kind: input, shape index: {}]   ;;  %s2376_s13 = inlined_call_operand.vmem [shape: f32[16,4,32], index: 13, kind: output, shape index: {}]  }
   0x1 LB: > { %s1865_s26 = sadd.s32 4294967295, %s2095_s25   ;;  %p1869_p0 = scmp.ge.s32.totalorder %s2095_s25, 1  ;;  %s2095_s25 = sphi %s2173_s25, %s23_s25  }
   0x2   : > { %p404_p1 = scmp.lt.s32.totalorder %s2095_s25, 17 }
   0x4   : > { %p405_p2 = pnand %p1869_p0, %p404_p1 }
   0x5   : > { %v473_v0 = vld [vmem:[%s2366_s3] sm:$0xff] (!%p405_p2)  ;;  %v474_v1 = vld [vmem:[%s2366_s3 + $0x8] sm:$0xff] (!%p405_p2)  ;;  %p454_p3 = scmp.lt.s32.totalorder (!%p405_p2), %s1865_s26, 15  ;;  %v2097_v2 = vmov (!%p405_p2), 0.0|0.0   ;;  %vm2098_vm0 = vmmov (!%p405_p2), 0   ;;  %v2099_v4 = vmov (!%p405_p2), 0.0  }
   0x6   : > { %408 = sbr.rel (%p405_p2) target bundleno = 2805 (0xaf5), region = 72  ;;  %2041 = vmatprep.subr.bf16.mxu1 (!%p405_p2), %v2097_v2  ;;  %v2042_v3 = vpack.c.bf16 (!%p405_p2), %v474_v1, %v473_v0  ;;  %1949 = vmatprep.mubr.msk.f32.mxu1 (!%p405_p2), %vm2098_vm0, %v2099_v4  ;;  %v557_v5 = vld [vmem:[%s2368_s5] sm:$0xff] (!%p405_p2)  ;;  %v558_v6 = vld [vmem:[%s2368_s5 + $0x8] sm:$0xff] (!%p405_p2)  ;;  %vm482_vm1 = vcmask (!%p405_p2), 130048   ;;  %v642_v12 = vld [vmem:[%s2370_s7 + $0x10] sm:$0xff] (!%p405_p2)  ;;  %vm651_vm2 = vcmask (!%p405_p2), 261120  }
   0x7   : > { %2047 = vmatprep.subr.bf16.mxu0 (!%p405_p2), %v2097_v2  ;;  %1967 = vmatprep.mubr.msk.f32.mxu0 (!%p405_p2), %vm2098_vm0, %v2099_v4  ;;  %v2045_v7 = vpack.c.bf16 (!%p405_p2), %v558_v6, %v557_v5  ;;  %v640_v10 = vld [vmem:[%s2370_s7] sm:$0xff] (!%p405_p2)  ;;  %v641_v11 = vld [vmem:[%s2370_s7 + $0x8] sm:$0xff] (!%p405_p2)  ;;  %v643_v14 = vld [vmem:[%s2370_s7 + $0x18] sm:$0xff] (!%p405_p2)  ;;  %vm730_vm3 = vcmask (!%p405_p2), 64512   ;;  %vm824_vm4 = vcmask (!%p405_p2), 1043456   ;;  %vm808_vm5 = vcmask (!%p405_p2), 27648  }
   0x8   : > { %2043 = vmatpush3.bf16.msra.mxu1 (!%p405_p2), %v2042_v3  ;;  %v2048_v13 = vpack.c.bf16 (!%p405_p2), %v641_v11, %v640_v10  ;;  %v2051_v15 = vpack.c.bf16 (!%p405_p2), %v643_v14, %v642_v12  ;;  %v1876_v19 = vld [vmem:[%s2369_s6] ss:$0 sm:$0xff] (!%p405_p2)  ;;  %s2101_s29 = smov (!%p405_p2), 112   ;;  %s2102_s30 = smov (!%p405_p2), 104   ;;  %vm820_vm6 = vcmask (!%p405_p2), 31744   ;;  %v727_v55 = vld [vmem:[%s2372_s9 + $0x8] sm:$0xff] (!%p405_p2) }
   0x9   : > { %2044 = vmatprep.subr.bf16.mxu1 (!%p405_p2), %v2097_v2  ;;  %v1874_v20 = vld [vmem:[%s2367_s4] ss:$0 sm:$0xff] (!%p405_p2)  ;;  %vm1786_vm7 = vcmask (!%p405_p2), 257024  }
   0xa   : > { %2049 = vmatpush3.bf16.msra.mxu0 (!%p405_p2), %v2048_v13  ;;  %v1878_v29 = vld [vmem:[%s2371_s8] ss:$0 sm:$0xff] (!%p405_p2) }
   0xb   : > { %2050 = vmatprep.subr.bf16.mxu0 (!%p405_p2), %v2097_v2  ;;  %v726_v60 = vld [vmem:[%s2372_s9] sm:$0xff] (!%p405_p2) }
   0xd   : > { %s2378_s26 = smov (!%p454_p3, %s1865_s26), 15 }
   0xe   : > { %s2200_s18 = sshll.u32 %s2378_s26, 2  ;;  %2052 = vmatpush3.bf16.msra.mxu0 %v2051_v15  ;;  %s2100_s26 = smov 120  }
   0xf   : > { %s465_s21 = scalar_lea.vmem %s2365_s2, %s2200_s18  ;;  %s461_s24 = scalar_lea.vmem %s2364_s1, %s2200_s18  ;;  %1980 = vmatprep.subr.mxu0 %v2099_v4 }
  0x10   : > { %v472_v8 = vld [vmem:[%s465_s21] sm:$0xf]  ;;  %s457_s20 = scalar_lea.vmem %s2363_s0, %s2200_s18  ;;  %s469_s22 = scalar_lea.vmem %s2376_s13, %s2200_s18 }
  0x11   : > { %1950 = vmatmul.mubr.msk.f32.vlgmr.msra.gmra.mrb[0].mxu1 %vm482_vm1, %v472_v8  ;;  %v471_v9 = vld [vmem:[%s461_s24] sm:$0xf] }
  0x12   : > { %2046 = vmatpush3.bf16.msra.mxu1 %v2045_v7  ;;  %1956 = vmatprep.mubr.msk.f32.mxu1 %vm2098_vm0, %v2099_v4  ;;  %v470_v16 = vld [vmem:[%s457_s20] sm:$0xf] }
  0x13   : > { %1970 = vmatprep.subr.mxu1 %v2099_v4  ;;  %1968 = vmatmul.mubr.msk.f32.vlgmr.msra.gmra.mrb[0].mxu0 %vm651_vm2, %v470_v16 }
  0x14   : > { %1982 = vmatprep.mubr.msk.f32.mxu0 %vm2098_vm0, %v2099_v4 }
  0x15   : > { %1957 = vmatmul.mubr.msk.f32.vlgmr.msra.gmra.mrb[2].mxu1 %vm482_vm1, %v471_v9 }
  0x16   : > { %1972 = vmatprep.mubr.msk.f32.mxu1 %vm2098_vm0, %v2099_v4 }
  0xe4   : > { %v552_v17 = vpop.f32.mrb[0].mxu1 }
  0xe5   : > { %v1951_v18 = vpop.f32.mrb[1].mxu1  ;;  %v553_v24 = vadd.f32 %v1874_v20, %v552_v17 }
  0xe6   : > { %v721_v30 = vpop.f32.mrb[0].mxu0 }
  0xe7   : > { %v2244_v26 = vmax.f32 %v553_v24, 0.0  ;;  %v722_v31 = vadd.f32 %v1878_v29, %v721_v30  ;;  %v1969_v32 = vpop.f32.mrb[1].mxu0 }
  0xe8   : > { %v635_v21 = vpop.f32.mrb[2].mxu1 }
  0xe9   : > { %v636_v22 = vadd.f32 %v1876_v19, %v635_v21  ;;  %v1958_v23 = vpop.f32.mrb[3].mxu1  ;;  %v2261_v33 = vmax.f32 %v722_v31, 0.0 }
  0xeb   : > { %v639_v25 = vmax.f32 %v636_v22, 0.0 }
  0xed   : > { %900 = vrot.lane.b32.xlu0 %v639_v25, %s2100_s26  ;;  %1971 = vmatpush3.xpose.msk.msra.mxu1 %vm730_vm3, %v639_v25 }
  0xee   : > { %1975 = vmatprep.subr.mxu1 %v2099_v4 }
  0xf0   : > { %1973 = vmatmul.mubr.msk.f32.vlgmr.msra.gmra.mrb[4].mxu1 %vm730_vm3, %v2244_v26 }
  0xf1   : > { %898 = vrot.lane.b32.xlu0 %v2244_v26, %s2100_s26  ;;  %1977 = vmatprep.mubr.msk.f32.mxu1 %vm2098_vm0, %v2099_v4 }
  0xf2   : > { %1976 = vmatpush3.msk.msra.mxu1 %vm824_vm4, %v2261_v33 }
  0xf3   : > { %1985 = vmatprep.subr.mxu1 %v2099_v4 }
 0x15f   : > { %v901_v27 = vpop.permute.xlu0 %900 }
 0x160   : > { %1981 = vmatpush3.xpose.msk.msra.mxu0 %vm730_vm3, %v901_v27 }
 0x161   : > { %1990 = vmatprep.subr.mxu0 %v2099_v4 }
 0x163   : > { %v899_v28 = vpop.permute.xlu0 %898 }
 0x164   : > { %1983 = vmatmul.mubr.msk.f32.vlgmr.msra.gmra.mrb[2].mxu0 %vm730_vm3, %v899_v28 }
 0x165   : > { %1992 = vmatprep.mubr.msk.f32.mxu0 %vm2098_vm0, %v2099_v4  ;;  %1991 = vmatpush3.msra.mxu0 %v727_v55 }
 0x166   : > { %2000 = vmatprep.subr.mxu0 %v2099_v4 }
 0x1c3   : > { %v803_v34 = vpop.f32.mrb[4].mxu1 }
 0x1c4   : > { %v807_v35 = vmul.f32 0.35355338, %v803_v34  ;;  %v1974_v36 = vpop.f32.mrb[5].mxu1 }
 0x1c6   : > { %v809_v37 = vsel %vm808_vm5, %v807_v35, -inf }
 0x1c7   : > { %810 = vmax.xlane.f32.xlu1 %v809_v37 }
 0x237   : > { %v972_v38 = vpop.f32.mrb[2].mxu0 }
 0x238   : > { %v976_v39 = vmul.f32 0.35355338, %v972_v38  ;;  %v1984_v40 = vpop.f32.mrb[3].mxu0  ;;  %v729_v38 = vld [vmem:[%s2372_s9 + $0x18] sm:$0xff] }
 0x23a   : > { %v977_v41 = vsel %vm808_vm5, %v976_v39, -inf }
 0x23b   : > { %978 = vmax.xlane.f32.xlu1 %v977_v41 }
 0x254   : > { %v811_v42 = vpop.xlane.xlu1 %810 }
 0x255   : > { %v812_v43 = vsub.f32 %v807_v35, %v811_v42 }
 0x257   : > { %v813_v44 = vmul.f32 1.442695, %v812_v43 }
 0x259   : > { %2073 = vpow2.f32 %v813_v44 }
 0x263   : > { %v2074_v45 = vpop.eup %2073 }
 0x264   : > { %v815_v46 = vsel %vm808_vm5, %v2074_v45, 0.0 }
 0x265   : > { %816 = vadd.xlane.f32.xlu0 %v815_v46 }
 0x27b   : > { %1301 = vrot.lane.b32.xlu0 %v2261_v33, %s2101_s29 }
 0x27f   : > { %1454 = vrot.lane.b32.xlu0 %v639_v25, %s2102_s30 }
 0x2c8   : > { %v979_v47 = vpop.xlane.xlu1 %978 }
 0x2c9   : > { %v980_v48 = vsub.f32 %v976_v39, %v979_v47  ;;  %v1702_v47 = vld [vmem:[%s2374_s11] sm:$0xff] }
 0x2cb   : > { %v981_v49 = vmul.f32 1.442695, %v980_v48  ;;  %v1703_v48 = vld [vmem:[%s2374_s11 + $0x8] sm:$0xff] }
 0x2cd   : > { %2075 = vpow2.f32 %v981_v49  ;;  %v2054_v49 = vpack.c.bf16 %v1703_v48, %v1702_v47 }
 0x2d7   : > { %v2076_v50 = vpop.eup %2075 }
 0x2d8   : > { %v983_v51 = vsel %vm808_vm5, %v2076_v50, 0.0 }
 0x2d9   : > { %984 = vadd.xlane.f32.xlu1 %v983_v51 }
 0x2ea   : > { %988 = vrot.lane.b32.xlu1 %v2261_v33, %s2100_s26 }
 0x2ee   : > { %1213 = vrot.lane.b32.xlu1 %v639_v25, %s2101_s29  ;;  %v728_v25 = vld [vmem:[%s2372_s9 + $0x10] sm:$0xff] }
 0x2f2   : > { %v817_v52 = vpop.xlane.xlu0 %816  ;;  %1211 = vrot.lane.b32.xlu1 %v2244_v26, %s2101_s29 }
 0x2f3   : > { %2077 = vrcp.f32 %v817_v52 }
 0x2f6   : > { %v1302_v62 = vpop.permute.xlu0 %1301 }
 0x2fa   : > { %v1455_v20 = vpop.permute.xlu0 %1454 }
 0x2fd   : > { %v2078_v53 = vpop.eup %2077 }
 0x2fe   : > { %v819_v54 = vmul.f32 %v2078_v53, %v2074_v45  ;;  %v1900_v53 = vld [vmem:[%s2373_s10] ss:$0 sm:$0xff] }
 0x300   : > { %1978 = vmatmul.mubr.msk.f32.vlgmr.msra.gmra.mrb[6].mxu1 %vm820_vm6, %v819_v54 }
 0x301   : > { %1987 = vmatprep.mubr.msk.f32.mxu1 %vm2098_vm0, %v2099_v4 }
 0x366   : > { %v985_v56 = vpop.xlane.xlu1 %984 }
 0x367   : > { %2079 = vrcp.f32 %v985_v56 }
 0x36a   : > { %v989_v57 = vpop.permute.xlu1 %988 }
 0x36b   : > { %1986 = vmatpush3.msk.msra.mxu1 %vm824_vm4, %v989_v57 }
 0x36c   : > { %1995 = vmatprep.subr.mxu1 %v2099_v4 }
 0x36e   : > { %v1214_v0 = vpop.permute.xlu1 %1213 }
 0x371   : > { %v2080_v58 = vpop.eup %2079 }
 0x372   : > { %v987_v59 = vmul.f32 %v2080_v58, %v2076_v50  ;;  %v1212_v5 = vpop.permute.xlu1 %1211  ;;  %v1705_v50 = vld [vmem:[%s2374_s11 + $0x18] sm:$0xff] }
 0x374   : > { %1988 = vmatmul.mubr.msk.f32.vlgmr.msra.gmra.mrb[8].mxu1 %vm820_vm6, %v987_v59 }
 0x375   : > { %1996 = vmatpush3.msra.mxu1 %v726_v60  ;;  %1997 = vmatprep.mubr.msk.f32.mxu1 %vm2098_vm0, %v2099_v4 }
 0x376   : > { %2005 = vmatprep.subr.mxu1 %v2099_v4 }
 0x3d3   : > { %v894_v61 = vpop.f32.mrb[6].mxu1 }
 0x3d4   : > { %v1979_v63 = vpop.f32.mrb[7].mxu1  ;;  %1998 = vmatmul.mubr.msk.f32.vlgmr.msra.gmra.mrb[10].mxu1 %vm730_vm3, %v894_v61 }
 0x3d5   : > { %2006 = vmatpush3.msk.msra.mxu1 %vm824_vm4, %v1302_v62  ;;  %2007 = vmatprep.mubr.msk.f32.mxu1 %vm2098_vm0, %v2099_v4 }
 0x3d6   : > { %2015 = vmatprep.subr.mxu1 %v2099_v4 }
 0x447   : > { %v1061_v1 = vpop.f32.mrb[8].mxu1 }
 0x448   : > { %v1989_v3 = vpop.f32.mrb[9].mxu1  ;;  %1993 = vmatmul.mubr.msk.f32.vlgmr.msra.gmra.mrb[4].mxu0 %vm730_vm3, %v1061_v1 }
 0x449   : > { %2001 = vmatpush3.xpose.msk.msra.mxu0 %vm730_vm3, %v1214_v0  ;;  %2002 = vmatprep.mubr.msk.f32.mxu0 %vm2098_vm0, %v2099_v4 }
 0x44a   : > { %2010 = vmatprep.subr.mxu0 %v2099_v4 }
 0x44c   : > { %2003 = vmatmul.mubr.msk.f32.vlgmr.msra.gmra.mrb[6].mxu0 %vm730_vm3, %v1212_v5 }
 0x44d   : > { %2012 = vmatprep.mubr.msk.f32.mxu0 %vm2098_vm0, %v2099_v4  ;;  %2011 = vmatpush3.msra.mxu0 %v728_v25 }
 0x44e   : > { %2020 = vmatprep.subr.mxu0 %v2099_v4 }
 0x4a7   : > { %v1207_v6 = vpop.f32.mrb[10].mxu1 }
 0x4a8   : > { %v1999_v7 = vpop.f32.mrb[11].mxu1 }
 0x51b   : > { %v1134_v8 = vpop.f32.mrb[4].mxu0 }
 0x51c   : > { %v1208_v9 = vadd.f32 %v1207_v6, %v1134_v8  ;;  %v1994_v10 = vpop.f32.mrb[5].mxu0 }
 0x51f   : > { %v1285_v11 = vpop.f32.mrb[6].mxu0 }
 0x520   : > { %v1289_v12 = vmul.f32 0.35355338, %v1285_v11  ;;  %v2004_v13 = vpop.f32.mrb[7].mxu0 }
 0x522   : > { %v1290_v14 = vsel %vm808_vm5, %v1289_v12, -inf }
 0x523   : > { %1291 = vmax.xlane.f32.xlu1 %v1290_v14 }
 0x5b0   : > { %v1292_v15 = vpop.xlane.xlu1 %1291 }
 0x5b1   : > { %v1293_v16 = vsub.f32 %v1289_v12, %v1292_v15 }
 0x5b3   : > { %v1294_v17 = vmul.f32 1.442695, %v1293_v16 }
 0x5b5   : > { %2081 = vpow2.f32 %v1294_v17 }
 0x5bf   : > { %v2082_v18 = vpop.eup %2081 }
 0x5c0   : > { %v1296_v19 = vsel %vm808_vm5, %v2082_v18, 0.0 }
 0x5c1   : > { %1297 = vadd.xlane.f32.xlu0 %v1296_v19 }
 0x5d7   : > { %1452 = vrot.lane.b32.xlu0 %v2244_v26, %s2102_s30 }
 0x64e   : > { %v1298_v21 = vpop.xlane.xlu0 %1297 }
 0x64f   : > { %2083 = vrcp.f32 %v1298_v21 }
 0x652   : > { %v1453_v24 = vpop.permute.xlu0 %1452 }
 0x659   : > { %v2084_v22 = vpop.eup %2083 }
 0x65a   : > { %v1300_v23 = vmul.f32 %v2084_v22, %v2082_v18 }
 0x65c   : > { %2008 = vmatmul.mubr.msk.f32.vlgmr.msra.gmra.mrb[12].mxu1 %vm820_vm6, %v1300_v23 }
 0x65d   : > { %2016 = vmatpush3.xpose.msk.msra.mxu1 %vm730_vm3, %v1455_v20  ;;  %2017 = vmatprep.mubr.msk.f32.mxu1 %vm2098_vm0, %v2099_v4 }
 0x65e   : > { %2025 = vmatprep.subr.mxu1 %v2099_v4 }
 0x660   : > { %2018 = vmatmul.mubr.msk.f32.vlgmr.msra.gmra.mrb[14].mxu1 %vm730_vm3, %v1453_v24 }
 0x661   : > { %2027 = vmatprep.mubr.msk.f32.mxu1 %vm2098_vm0, %v2099_v4  ;;  %2026 = vmatpush3.msra.mxu1 %v729_v38 }
 0x72f   : > { %v1374_v26 = vpop.f32.mrb[12].mxu1 }
 0x730   : > { %v2009_v27 = vpop.f32.mrb[13].mxu1  ;;  %2013 = vmatmul.mubr.msk.f32.vlgmr.msra.gmra.mrb[8].mxu0 %vm730_vm3, %v1374_v26 }
 0x731   : > { %2022 = vmatprep.mubr.msk.f32.mxu0 %vm2098_vm0, %v2099_v4 }
 0x733   : > { %v1526_v28 = vpop.f32.mrb[14].mxu1 }
 0x734   : > { %v1530_v29 = vmul.f32 0.35355338, %v1526_v28  ;;  %v2019_v30 = vpop.f32.mrb[15].mxu1 }
 0x736   : > { %v1531_v31 = vsel %vm808_vm5, %v1530_v29, -inf }
 0x737   : > { %1532 = vmax.xlane.f32.xlu0 %v1531_v31 }
 0x7c4   : > { %v1533_v32 = vpop.xlane.xlu0 %1532 }
 0x7c5   : > { %v1534_v34 = vsub.f32 %v1530_v29, %v1533_v32 }
 0x7c7   : > { %v1535_v35 = vmul.f32 1.442695, %v1534_v34 }
 0x7c9   : > { %2085 = vpow2.f32 %v1535_v35 }
 0x7d3   : > { %v2086_v36 = vpop.eup %2085 }
 0x7d4   : > { %v1537_v37 = vsel %vm808_vm5, %v2086_v36, 0.0 }
 0x7d5   : > { %1538 = vadd.xlane.f32.xlu1 %v1537_v37 }
 0x7e6   : > { %1542 = vrot.lane.b32.xlu1 %v2261_v33, %s2102_s30 }
 0x803   : > { %v1447_v39 = vpop.f32.mrb[8].mxu0 }
 0x804   : > { %v1451_v40 = vadd.f32 %v1447_v39, %v1208_v9  ;;  %v2014_v41 = vpop.f32.mrb[9].mxu0 }
 0x862   : > { %v1539_v42 = vpop.xlane.xlu1 %1538 }
 0x863   : > { %2087 = vrcp.f32 %v1539_v42 }
 0x866   : > { %v1543_v43 = vpop.permute.xlu1 %1542 }
 0x867   : > { %2021 = vmatpush3.msk.msra.mxu0 %vm824_vm4, %v1543_v43 }
 0x868   : > { %2053 = vmatprep.subr.bf16.mxu0 %v2097_v2 }
 0x86d   : > { %v2088_v44 = vpop.eup %2087 }
 0x86e   : > { %v1541_v45 = vmul.f32 %v2088_v44, %v2086_v36 }
 0x870   : > { %2023 = vmatmul.mubr.msk.f32.vlgmr.msra.gmra.mrb[10].mxu0 %vm820_vm6, %v1541_v45 }
 0x871   : > { %2038 = vmatprep.mubr.msk.f32.mxu0 %vm2098_vm0, %v2099_v4  ;;  %2055 = vmatpush3.bf16.msra.mxu0 %v2054_v49  ;;  %v1704_v4 = vld [vmem:[%s2374_s11 + $0x10] sm:$0xff] }
 0x872   : > { %2056 = vmatprep.subr.bf16.mxu0 %v2097_v2  ;;  %v2057_v51 = vpack.c.bf16 %v1705_v50, %v1704_v4  ;;  %v1901_v2 = vld [vmem:[%s2375_s12] ss:$0 sm:$0xff] }
 0x875   : > { %2058 = vmatpush3.bf16.msra.mxu0 %v2057_v51 }
 0x943   : > { %v1615_v33 = vpop.f32.mrb[10].mxu0 }
 0x944   : > { %v2024_v46 = vpop.f32.mrb[11].mxu0  ;;  %2028 = vmatmul.mubr.msk.f32.vlgmr.msra.gmra.mrb[16].mxu1 %vm730_vm3, %v1615_v33 }
 0xa17   : > { %v1688_v52 = vpop.f32.mrb[16].mxu1 }
 0xa18   : > { %v1692_v54 = vadd.f32 %v1688_v52, %v1451_v40  ;;  %v2029_v55 = vpop.f32.mrb[17].mxu1 }
 0xa1a   : > { %v1700_v56 = vadd.f32 %v1900_v53, %v1692_v54 }
 0xa1c   : > { %v1701_v57 = vmax.f32 %v1700_v56, 0.0 }
 0xa1e   : > { %2039 = vmatmul.mubr.msk.f32.vlgmr.msra.gmra.mrb[12].mxu0 %vm651_vm2, %v1701_v57 }
 0xaf1   : > { %v1782_v58 = vpop.f32.mrb[12].mxu0 }
 0xaf2   : > { %v1783_v59 = vadd.f32 %v1901_v2, %v1782_v58  ;;  %v2040_v60 = vpop.f32.mrb[13].mxu0 }
 0xaf4   : > { %1787 = vst.msk [vmem:[%s469_s22] sm:$0xf] %vm1786_vm7, %v1783_v59 }
 0xaf5 PF: > { %s23_s25 = sadd.s32 1, %s2095_s25  }
 0xaf6   : > { %p20_p4 = scmp.ge.s32.totalorder %s23_s25, 18  }
 0xaf8   :  { %22 = sbr.rel (!%p20_p4) target bundleno = 1 (0x1), region = 108 }

// kernel: gman_forward.19
= control target key start
LH: loop header
LB: loop body
LE: loop exit
PB: predicated region body
PF: predicated region fallthrough
CT: control target
= control target key end

     0   :  { %vm41_vm0 = vcmask 261120   ;;  %vm319_vm1 = vcmask 7168   ;;  %s562_s1 = inlined_call_operand.vmem [shape: f32[32,32], index: 1, kind: input, shape index: {}]   ;;  %s563_s0 = inlined_call_operand.vmem [shape: f32[64,32], index: 0, kind: input, shape index: {}]   ;;  %s564_s3 = inlined_call_operand.vmem [shape: f32[32,1], index: 3, kind: input, shape index: {}]   ;;  %s565_s4 = inlined_call_operand.<no memory space> [shape: f32[1,1], index: 4, kind: input, shape index: {}]   ;;  %s566_s2 = inlined_call_operand.vmem [shape: f32[1,32], index: 2, kind: input, shape index: {}]   ;;  %s567_s5 = inlined_call_operand.vmem [shape: f32[64,1], index: 5, kind: output, shape index: {}]  }
   0x1   :  { %v30_v0 = vld [vmem:[%s562_s1] sm:$0xff]  ;;  %v31_v1 = vld [vmem:[%s562_s1 + $0x8] sm:$0xff]  ;;  %v32_v2 = vld [vmem:[%s562_s1 + $0x10] sm:$0xff]  ;;  %v10_v20 = vstv %s565_s4 }
   0x2   :  { %v414_v3 = vpack.c.bf16 %v31_v1, %v30_v0  ;;  %v33_v4 = vld [vmem:[%s562_s1 + $0x18] sm:$0xff]  ;;  %v22_v5 = vld [vmem:[%s563_s0] sm:$0xff]  ;;  %v180_v8 = vld [vmem:[%s564_s3 + $0x8] sm:$0xff]  ;;  %11 = vst [vmem:[#allocation2] sm:$0x1] %v10_v20 }
   0x3   :  { %v418_v6 = vpack.c.bf16 %v33_v4, %v32_v2  ;;  %382 = vmatprep.mubr.msk.f32.mxu0 %vm41_vm0, %v22_v5  ;;  %v179_v7 = vld [vmem:[%s564_s3] sm:$0xff]  ;;  %v23_v10 = vld [vmem:[%s563_s0 + $0x8] sm:$0xff]  ;;  %v24_v11 = vld [vmem:[%s563_s0 + $0x10] sm:$0xff] }
   0x4   :  { %415 = vmatprep.subr.bf16.mxu0 %v414_v3  ;;  %v422_v9 = vpack.c.bf16 %v180_v8, %v179_v7  ;;  %v25_v12 = vld [vmem:[%s563_s0 + $0x18] sm:$0xff]  ;;  %v26_v13 = vld [vmem:[%s563_s0 + $0x20] sm:$0xff]  ;;  %v27_v14 = vld [vmem:[%s563_s0 + $0x28] sm:$0xff] }
   0x5   :  { %417 = vmatpush3.bf16.msra.mxu0 %v414_v3  ;;  %v28_v15 = vld [vmem:[%s563_s0 + $0x30] sm:$0xff]  ;;  %v29_v16 = vld [vmem:[%s563_s0 + $0x38] sm:$0xff]  ;;  %v332_v21 = vld [vmem:[%s566_s2] ss:$0 sm:$0xff] }
   0x6   :  { %419 = vmatprep.subr.bf16.mxu0 %v418_v6  ;;  %423 = vmatprep.subr.bf16.mxu1 %v422_v9  ;;  %v181_v17 = vld [vmem:[%s564_s3 + $0x10] sm:$0xff]  ;;  %v182_v18 = vld [vmem:[%s564_s3 + $0x18] sm:$0xff] }
   0x7   :  { %425 = vmatpush3.bf16.msra.mxu1 %v422_v9  ;;  %v426_v19 = vpack.c.bf16 %v182_v18, %v181_v17 }
   0x9   :  { %421 = vmatpush3.bf16.msra.mxu0 %v418_v6  ;;  %427 = vmatprep.subr.bf16.mxu1 %v426_v19  ;;  %v341_v46 = vld [vmem:[#allocation2] ss:$0 sm:$0xff] }
   0xb   :  { %429 = vmatpush3.bf16.msra.mxu1 %v426_v19 }
   0xc   :  { %383 = vmatmul.mubr.msk.f32.vlgmr.msra.gmra.mrb[0].mxu0 %vm41_vm0, %v23_v10 }
   0xd   :  { %385 = vmatprep.mubr.msk.f32.mxu0 %vm41_vm0, %v24_v11 }
  0x10   :  { %386 = vmatmul.mubr.msk.f32.gmra.mrb[2].mxu0 %vm41_vm0, %v25_v12 }
  0x11   :  { %388 = vmatprep.mubr.msk.f32.mxu0 %vm41_vm0, %v26_v13 }
  0x14   :  { %389 = vmatmul.mubr.msk.f32.gmra.mrb[4].mxu0 %vm41_vm0, %v27_v14 }
  0x15   :  { %391 = vmatprep.mubr.msk.f32.mxu0 %vm41_vm0, %v28_v15 }
  0x18   :  { %392 = vmatmul.mubr.msk.f32.gmra.mrb[6].mxu0 %vm41_vm0, %v29_v16 }
  0xdf   :  { %v384_v22 = vpop.f32.mrb[0].mxu0 }
  0xe0   :  { %v138_v23 = vadd.f32 %v384_v22, %v332_v21  ;;  %v132_v24 = vpop.f32.mrb[1].mxu0 }
  0xe1   :  { %v133_v25 = vadd.f32 %v332_v21, %v132_v24 }
  0xe2   :  { %v172_v28 = vmax.f32 %v138_v23, 0.0 }
  0xe3   :  { %v171_v26 = vmax.f32 %v133_v25, 0.0  ;;  %v387_v27 = vpop.f32.mrb[2].mxu0 }
  0xe4   :  { %v148_v29 = vadd.f32 %v387_v27, %v332_v21  ;;  %v142_v30 = vpop.f32.mrb[3].mxu0 }
  0xe5   :  { %v143_v31 = vadd.f32 %v332_v21, %v142_v30  ;;  %402 = vmatprep.mubr.msk.f32.mxu1 %vm41_vm0, %v171_v26 }
  0xe6   :  { %403 = vmatmul.mubr.msk.f32.vlgmr.msra.gmra.mrb[0].mxu1 %vm41_vm0, %v172_v28  ;;  %v174_v34 = vmax.f32 %v148_v29, 0.0 }
  0xe7   :  { %v173_v32 = vmax.f32 %v143_v31, 0.0  ;;  %v390_v33 = vpop.f32.mrb[4].mxu0 }
  0xe8   :  { %v158_v35 = vadd.f32 %v390_v33, %v332_v21  ;;  %v152_v36 = vpop.f32.mrb[5].mxu0 }
  0xe9   :  { %v153_v37 = vadd.f32 %v332_v21, %v152_v36  ;;  %405 = vmatprep.mubr.msk.f32.mxu1 %vm41_vm0, %v173_v32 }
  0xea   :  { %406 = vmatmul.mubr.msk.f32.gmra.mrb[2].mxu1 %vm41_vm0, %v174_v34  ;;  %v176_v40 = vmax.f32 %v158_v35, 0.0 }
  0xeb   :  { %v175_v38 = vmax.f32 %v153_v37, 0.0  ;;  %v393_v39 = vpop.f32.mrb[6].mxu0 }
  0xec   :  { %v168_v41 = vadd.f32 %v393_v39, %v332_v21  ;;  %v162_v42 = vpop.f32.mrb[7].mxu0 }
  0xed   :  { %v163_v43 = vadd.f32 %v332_v21, %v162_v42  ;;  %408 = vmatprep.mubr.msk.f32.mxu1 %vm41_vm0, %v175_v38 }
  0xee   :  { %409 = vmatmul.mubr.msk.f32.gmra.mrb[4].mxu1 %vm41_vm0, %v176_v40  ;;  %v178_v45 = vmax.f32 %v168_v41, 0.0 }
  0xef   :  { %v177_v44 = vmax.f32 %v163_v43, 0.0 }
  0xf1   :  { %411 = vmatprep.mubr.msk.f32.mxu1 %vm41_vm0, %v177_v44 }
  0xf2   :  { %412 = vmatmul.mubr.msk.f32.gmra.mrb[6].mxu1 %vm41_vm0, %v178_v45 }
 0x1b9   :  { %v404_v47 = vpop.f32.mrb[0].mxu1 }
 0x1ba   :  { %v286_v48 = vadd.f32 %v404_v47, %v341_v46  ;;  %v280_v49 = vpop.f32.mrb[1].mxu1 }
 0x1bb   :  { %v281_v50 = vadd.f32 %v341_v46, %v280_v49 }
 0x1bc   :  { %321 = vst.msk [vmem:[%s567_s5 + $0x8] sm:$0xff] %vm319_vm1, %v286_v48 }
 0x1bd   :  { %320 = vst.msk [vmem:[%s567_s5] sm:$0xff] %vm319_vm1, %v281_v50  ;;  %v407_v51 = vpop.f32.mrb[2].mxu1 }
 0x1be   :  { %v296_v52 = vadd.f32 %v407_v51, %v341_v46  ;;  %v290_v53 = vpop.f32.mrb[3].mxu1 }
 0x1bf   :  { %v291_v54 = vadd.f32 %v341_v46, %v290_v53 }
 0x1c0   :  { %323 = vst.msk [vmem:[%s567_s5 + $0x18] sm:$0xff] %vm319_vm1, %v296_v52 }
 0x1c1   :  { %322 = vst.msk [vmem:[%s567_s5 + $0x10] sm:$0xff] %vm319_vm1, %v291_v54  ;;  %v410_v55 = vpop.f32.mrb[4].mxu1 }
 0x1c2   :  { %v306_v56 = vadd.f32 %v410_v55, %v341_v46  ;;  %v300_v57 = vpop.f32.mrb[5].mxu1 }
 0x1c3   :  { %v301_v58 = vadd.f32 %v341_v46, %v300_v57 }
 0x1c4   :  { %325 = vst.msk [vmem:[%s567_s5 + $0x28] sm:$0xff] %vm319_vm1, %v306_v56 }
 0x1c5   :  { %324 = vst.msk [vmem:[%s567_s5 + $0x20] sm:$0xff] %vm319_vm1, %v301_v58  ;;  %v413_v59 = vpop.f32.mrb[6].mxu1 }
 0x1c6   :  { %v316_v60 = vadd.f32 %v413_v59, %v341_v46  ;;  %v310_v61 = vpop.f32.mrb[7].mxu1 }
 0x1c7   :  { %v311_v62 = vadd.f32 %v341_v46, %v310_v61 }
 0x1c8   :  { %327 = vst.msk [vmem:[%s567_s5 + $0x38] sm:$0xff] %vm319_vm1, %v316_v60 }
 0x1c9   :  { %326 = vst.msk [vmem:[%s567_s5 + $0x30] sm:$0xff] %vm319_vm1, %v311_v62 }

</bundles_post_ra>
